<compile_context>
chip_gen: v7x
topology: tpu7x:2x2x1
jax: 0.10.0
libtpu: 0.0.40
codegen_flags: <defaults>
</compile_context>

<pallas_src>
import functools

import jax
import jax.numpy as jnp
from jax.experimental import pallas as pl
from jax.experimental.pallas import tpu as pltpu


# ---------------------------------------------------------------------------
# Static network configuration (mirrors TCN(input_size, output_size) defaults)
# ---------------------------------------------------------------------------
CP = 128                       # channel padding (lane width)
K = 3                          # kernel_size
N_HIDDEN = 80
NUM_LAYERS = 4
DILATIONS = tuple(2 ** i for i in range(NUM_LAYERS))     # 1, 2, 4, 8
MAXPAD = max(DILATIONS) * (K - 1) // 2                    # 8
COMPUTE_DTYPE = jnp.bfloat16   # MXU input dtype; accumulation/epilogue are f32


# ---------------------------------------------------------------------------
# Fused TCN kernel: one grid step == one batch group, whole network.
# ---------------------------------------------------------------------------
def _tcn_kernel(x_ref, w1_ref, b1_ref, w2_ref, b2_ref,
                wd_ref, bd_ref, wf_ref, bf_ref, alpha_ref,
                o_ref, h_buf, t_buf, *, T, cin, bg, has_downsample):
    # x_ref  : (bg, T, cin)            raw input (no lane padding in HBM)
    # w1_ref : (L, K*CP, CP)  bf16     conv1 weights, taps stacked on contraction
    # b1_ref : (L, CP)        f32
    # w2_ref : (L, K*CP, CP)  bf16     conv2 weights
    # b2_ref : (L, CP)        f32
    # wd_ref : (CP, CP)       bf16     1x1 downsample (block 0 only)
    # bd_ref : (1, CP)        f32
    # wf_ref : (CP, CP)       bf16     final 1x1 conv
    # bf_ref : (1, CP)        f32
    # alpha  : (2*L,) in SMEM f32      PReLU slopes [a1_0, a2_0, a1_1, ...]
    # o_ref  : (bg, T, CP)             lane-dense output slab
    # h_buf  : (MAXPAD + bg*(T+MAXPAD) + MAXPAD, CP) f32   running activation
    # t_buf  : same shape                                  conv1 output per block
    stride = T + MAXPAD            # rows per sample incl. its trailing zero gap
    rc = bg * stride               # compute-region rows (samples + gaps)

    # ---- init -------------------------------------------------------------
    # h_buf must start all-zero: halos / inter-sample gaps realize the 'same'
    # zero padding, and lanes >= cin of the centre rows are the channel
    # padding of the raw input.  This single zero pass replaces the previous
    # two full-slab zero passes + the wrapper-side HBM pad pass.
    h_buf[...] = jnp.zeros_like(h_buf)
    # t_buf: only its top/bottom halo rows are read before being written; the
    # gap rows are re-zeroed by the row mask on every conv1 store.
    t_buf[0:MAXPAD, :] = jnp.zeros((MAXPAD, CP), t_buf.dtype)
    t_buf[MAXPAD + rc:MAXPAD + rc + MAXPAD, :] = jnp.zeros((MAXPAD, CP),
                                                           t_buf.dtype)

    # Scatter each sample's (T, cin) input into lanes [0, cin) of its centre
    # rows (masked narrow store); lanes >= cin stay zero from the pass above.
    for b in range(bg):
        r0 = MAXPAD + b * stride
        h_buf[r0:r0 + T, 0:cin] = x_ref[b]

    # Row mask over the compute region: 1 for real sample rows, 0 for the
    # MAXPAD zero-gap rows that separate samples (keeps gaps exactly zero).
    ridx = jax.lax.broadcasted_iota(jnp.int32, (rc, 1), 0)
    keep = (ridx % stride) < T

    def fused_lhs(buf, p, d):
        # (rc, K*CP) bf16: K dilated, shifted views concatenated along the
        # contraction axis -> one 384-deep MXU pass per conv.
        taps = [buf[MAXPAD - p + k * d: MAXPAD - p + k * d + rc, :]
                for k in range(K)]
        return jnp.concatenate(taps, axis=-1).astype(COMPUTE_DTYPE)

    # ---- 4 temporal blocks --------------------------------------------------
    for i, d in enumerate(DILATIONS):
        p = d * (K - 1) // 2

        # conv1 (dilated, 'same') + bias + PReLU  ->  t_buf compute region
        acc = jnp.dot(fused_lhs(h_buf, p, d), w1_ref[i],
                      preferred_element_type=jnp.float32)
        acc = acc + b1_ref[i:i + 1, :]
        a1 = alpha_ref[2 * i]
        acc = jnp.where(acc > 0, acc, a1 * acc)
        t_buf[MAXPAD:MAXPAD + rc, :] = jnp.where(keep, acc, 0.0)

        # residual path (1x1 downsample only when Cin != Cout, i.e. block 0)
        res = h_buf[MAXPAD:MAXPAD + rc, :]
        if i == 0 and has_downsample:
            res = jnp.dot(res.astype(COMPUTE_DTYPE), wd_ref[...],
                          preferred_element_type=jnp.float32) + bd_ref[...]

        # conv2 + bias + PReLU, residual add  ->  h_buf compute region
        acc2 = jnp.dot(fused_lhs(t_buf, p, d), w2_ref[i],
                       preferred_element_type=jnp.float32)
        acc2 = acc2 + b2_ref[i:i + 1, :]
        a2 = alpha_ref[2 * i + 1]
        acc2 = jnp.where(acc2 > 0, acc2, a2 * acc2)
        h_buf[MAXPAD:MAXPAD + rc, :] = jnp.where(keep, acc2 + res, 0.0)

    # ---- final 1x1 conv + sigmoid; per-sample lane-dense output -------------
    y = jnp.dot(h_buf[MAXPAD:MAXPAD + rc, :].astype(COMPUTE_DTYPE), wf_ref[...],
                preferred_element_type=jnp.float32) + bf_ref[...]
    y = jax.nn.sigmoid(y)
    for b in range(bg):
        r0 = b * stride
        o_ref[b] = y[r0:r0 + T, :].astype(o_ref.dtype)


# ---------------------------------------------------------------------------
# Wrapper: single pallas_call for the whole discriminator.
# ---------------------------------------------------------------------------
def quant_discriminator(x, packed, *, output_size, batch_group=None):
    """sigmoid(TCN(x)).  x: (B, T, input_size) -> (B, T, output_size)."""
    B, T, cin = x.shape
    bg = B if batch_group is None else batch_group
    assert B % bg == 0, "batch must be divisible by batch_group"
    L = NUM_LAYERS
    stride = T + MAXPAD
    rc = bg * stride
    buf_rows = MAXPAD + rc + MAXPAD

    # advisory cost estimate for the XLA scheduler
    steps = B // bg
    flops = steps * (L * 2 * (2 * rc * (K * CP) * CP) + 2 * (2 * rc * CP * CP))
    weight_bytes = (2 * (2 * L * K * CP * CP + 2 * CP * CP)
                    + 4 * (2 * L * CP + 2 * CP + 2 * L))
    bytes_accessed = 4 * B * T * cin + 4 * B * T * CP + weight_bytes

    kernel = functools.partial(_tcn_kernel, T=T, cin=cin, bg=bg,
                               has_downsample=packed["has_downsample"])

    y = pl.pallas_call(
        kernel,
        out_shape=jax.ShapeDtypeStruct((B, T, CP), jnp.float32),
        grid=(steps,),
        in_specs=[
            pl.BlockSpec((bg, T, cin), lambda g: (g, 0, 0)),           # x
            pl.BlockSpec((L, K * CP, CP), lambda g: (0, 0, 0)),        # w1
            pl.BlockSpec((L, CP), lambda g: (0, 0)),                   # b1
            pl.BlockSpec((L, K * CP, CP), lambda g: (0, 0, 0)),        # w2
            pl.BlockSpec((L, CP), lambda g: (0, 0)),                   # b2
            pl.BlockSpec((CP, CP), lambda g: (0, 0)),                  # wd
            pl.BlockSpec((1, CP), lambda g: (0, 0)),                   # bd
            pl.BlockSpec((CP, CP), lambda g: (0, 0)),                  # wf
            pl.BlockSpec((1, CP), lambda g: (0, 0)),                   # bf
            pl.BlockSpec(memory_space=pltpu.MemorySpace.SMEM),         # alphas
        ],
        out_specs=pl.BlockSpec((bg, T, CP), lambda g: (g, 0, 0)),
        scratch_shapes=[pltpu.VMEM((buf_rows, CP), jnp.float32),
                        pltpu.VMEM((buf_rows, CP), jnp.float32)],
        compiler_params=pltpu.CompilerParams(
            dimension_semantics=("parallel",),
            vmem_limit_bytes=64 * 1024 * 1024),
        cost_estimate=pl.CostEstimate(flops=flops,
                                      transcendentals=steps * rc * CP,
                                      bytes_accessed=bytes_accessed),
    )(x.astype(jnp.float32), packed["w1"], packed["b1"], packed["w2"],
      packed["b2"], packed["wd"], packed["bd"], packed["wf"], packed["bf"],
      packed["alpha"])

    # drop the zero-padded channels (kernel output is lane-dense on purpose)
    return y[:, :, :output_size]


# ---------------------------------------------------------------------------
# Parameter construction (mirrors module __init__ / init_weights) + packing.
# ---------------------------------------------------------------------------
def make_params(key, input_size, output_size, n_hidden=N_HIDDEN,
                num_layers=NUM_LAYERS, kernel_size=K):
    blocks = []
    for i in range(num_layers):
        cin = input_size if i == 0 else n_hidden
        key, k1, k2, k3, k4, k5, k6 = jax.random.split(key, 7)
        blk = {
            "dilation": 2 ** i,
            # conv weights ~ N(0, 0.01) as in init_weights(); stored (K,Cin,Cout)
            "w1": 0.01 * jax.random.normal(k1, (kernel_size, cin, n_hidden),
                                           jnp.float32),
            "b1": 0.05 * jax.random.normal(k2, (n_hidden,), jnp.float32),
            "w2": 0.01 * jax.random.normal(k3, (kernel_size, n_hidden,
                                                n_hidden), jnp.float32),
            "b2": 0.05 * jax.random.normal(k4, (n_hidden,), jnp.float32),
            "a1": 0.25,   # nn.PReLU() default: single shared slope 0.25
            "a2": 0.25,
        }
        if cin != n_hidden:   # 1x1 downsample on the residual path
            blk["wd"] = 0.01 * jax.random.normal(k5, (1, cin, n_hidden),
                                                 jnp.float32)
            blk["bd"] = 0.05 * jax.random.normal(k6, (n_hidden,), jnp.float32)
        blocks.append(blk)

    key, kf, kfb = jax.random.split(key, 3)
    return {
        "blocks": blocks,
        "wf": 0.01 * jax.random.normal(kf, (1, n_hidden, output_size),
                                       jnp.float32),
        "bf": 0.05 * jax.random.normal(kfb, (output_size,), jnp.float32),
    }


def pack_params(params, output_size, n_hidden=N_HIDDEN):
    """Pad channels to CP=128, stack the K taps along the contraction axis,
    and cast matmul weights to bf16 for the fused kernel."""
    L = len(params["blocks"])
    w1 = jnp.zeros((L, K * CP, CP), jnp.float32)
    w2 = jnp.zeros((L, K * CP, CP), jnp.float32)
    b1 = jnp.zeros((L, CP), jnp.float32)
    b2 = jnp.zeros((L, CP), jnp.float32)
    wd = jnp.zeros((CP, CP), jnp.float32)
    bd = jnp.zeros((1, CP), jnp.float32)
    alphas = []
    has_downsample = False
    for i, blk in enumerate(params["blocks"]):
        cin = blk["w1"].shape[1]
        for k in range(K):
            w1 = w1.at[i, k * CP:k * CP + cin, :n_hidden].set(blk["w1"][k])
            w2 = w2.at[i, k * CP:k * CP + n_hidden, :n_hidden].set(blk["w2"][k])
        b1 = b1.at[i, :n_hidden].set(blk["b1"])
        b2 = b2.at[i, :n_hidden].set(blk["b2"])
        alphas += [blk["a1"], blk["a2"]]
        if "wd" in blk:
            has_downsample = True
            wd = wd.at[:cin, :n_hidden].set(blk["wd"][0])
            bd = bd.at[0, :n_hidden].set(blk["bd"])
    wf = jnp.zeros((CP, CP), jnp.float32).at[:n_hidden, :output_size].set(
        params["wf"][0])
    bf = jnp.zeros((1, CP), jnp.float32).at[0, :output_size].set(params["bf"])
    return {
        "w1": w1.astype(COMPUTE_DTYPE), "b1": b1,
        "w2": w2.astype(COMPUTE_DTYPE), "b2": b2,
        "wd": wd.astype(COMPUTE_DTYPE), "bd": bd,
        "wf": wf.astype(COMPUTE_DTYPE), "bf": bf,
        "alpha": jnp.asarray(alphas, jnp.float32),
        "has_downsample": has_downsample,
    }


# ---------------------------------------------------------------------------
# Pure-JAX f32 reference (mirrors the PyTorch module) for a sanity check.
# ---------------------------------------------------------------------------
def tcn_reference(x, params):
    def conv1d(h, w, b, d):
        Kk = w.shape[0]
        p = d * (Kk - 1) // 2
        hp = jnp.pad(h, ((0, 0), (p, p), (0, 0)))
        T = h.shape[1]
        out = sum(jnp.einsum("btc,co->bto", hp[:, k * d:k * d + T, :], w[k])
                  for k in range(Kk))
        return out + b

    h = x
    for blk in params["blocks"]:
        d = blk["dilation"]
        o = conv1d(h, blk["w1"], blk["b1"], d)
        o = jnp.where(o > 0, o, blk["a1"] * o)
        o = conv1d(o, blk["w2"], blk["b2"], d)
        o = jnp.where(o > 0, o, blk["a2"] * o)
        res = (jnp.einsum("btc,co->bto", h, blk["wd"][0]) + blk["bd"]
               if "wd" in blk else h)
        h = o + res
    y = jnp.einsum("btc,co->bto", h, params["wf"][0]) + params["bf"]
    return jax.nn.sigmoid(y)


if __name__ == "__main__":
    key = jax.random.PRNGKey(0)
    k_param, k_x = jax.random.split(key)

    B, T, input_size, output_size = 2, 16, 4, 1
    params = make_params(k_param, input_size, output_size)
    packed = pack_params(params, output_size)
    x = jax.random.normal(k_x, (B, T, input_size), jnp.float32)

    y = quant_discriminator(x, packed, output_size=output_size)
    y = jax.block_until_ready(y)

    assert y.shape == (B, T, output_size), y.shape
    assert bool(jnp.all((y >= 0.0) & (y <= 1.0))), "sigmoid range violated"

    y_ref = tcn_reference(x, params)
    max_err = float(jnp.max(jnp.abs(y - y_ref)))
    assert max_err < 1e-2, f"mismatch vs reference (bf16 tolerance): {max_err}"
    print("KERNEL_OK")
</pallas_src>

<mosaic_0001>
module attributes {stable_mosaic.version = 11 : i64} {
  func.func @_tcn_kernel(%arg0: i32, %arg1: memref<2x16x4xf32, #tpu.memory_space<vmem>>, %arg2: memref<4x384x128xbf16, #tpu.memory_space<vmem>>, %arg3: memref<4x128xf32, #tpu.memory_space<vmem>>, %arg4: memref<4x384x128xbf16, #tpu.memory_space<vmem>>, %arg5: memref<4x128xf32, #tpu.memory_space<vmem>>, %arg6: memref<128x128xbf16, #tpu.memory_space<vmem>>, %arg7: memref<1x128xf32, #tpu.memory_space<vmem>>, %arg8: memref<128x128xbf16, #tpu.memory_space<vmem>>, %arg9: memref<1x128xf32, #tpu.memory_space<vmem>>, %arg10: memref<8xf32, #tpu.memory_space<smem>>, %arg11: memref<2x16x128xf32, #tpu.memory_space<vmem>>, %arg12: memref<64x128xf32, #tpu.memory_space<vmem>>, %arg13: memref<64x128xf32, #tpu.memory_space<vmem>>) attributes {dimension_semantics = [#tpu.dimension_semantics<parallel>], iteration_bounds = array<i64: 1>, scalar_prefetch = 0 : i64, scratch_operands = 2 : i64, tpu.core_type = #tpu.core_type<tc>, window_params = [{transform_indices = @transform_0, window_bounds = array<i64: 2, 16, 4>}, {pipeline_mode = #tpu.pipeline_mode<synchronous>, transform_indices = @transform_1, window_bounds = array<i64: 4, 384, 128>}, {pipeline_mode = #tpu.pipeline_mode<synchronous>, transform_indices = @transform_2, window_bounds = array<i64: 4, 128>}, {pipeline_mode = #tpu.pipeline_mode<synchronous>, transform_indices = @transform_3, window_bounds = array<i64: 4, 384, 128>}, {pipeline_mode = #tpu.pipeline_mode<synchronous>, transform_indices = @transform_4, window_bounds = array<i64: 4, 128>}, {pipeline_mode = #tpu.pipeline_mode<synchronous>, transform_indices = @transform_5, window_bounds = array<i64: 128, 128>}, {pipeline_mode = #tpu.pipeline_mode<synchronous>, transform_indices = @transform_6, window_bounds = array<i64: 1, 128>}, {pipeline_mode = #tpu.pipeline_mode<synchronous>, transform_indices = @transform_7, window_bounds = array<i64: 128, 128>}, {pipeline_mode = #tpu.pipeline_mode<synchronous>, transform_indices = @transform_8, window_bounds = array<i64: 1, 128>}, {transform_indices = @transform_9, window_bounds = array<i64: 8>}, {transform_indices = @transform_10, window_bounds = array<i64: 2, 16, 128>}]} {
    %cst = arith.constant 0.000000e+00 : f32
    %0 = vector.broadcast %cst : f32 to vector<64x128xf32>
    %c0 = arith.constant 0 : index
    %c0_0 = arith.constant 0 : index
    %1 = vector.load %arg12[%c0, %c0_0] : memref<64x128xf32, #tpu.memory_space<vmem>>, vector<64x128xf32>
    tpu.vector_store %arg12[%c0, %c0_0], %0 {strides = array<i32>} : memref<64x128xf32, #tpu.memory_space<vmem>>, vector<64x128xf32>,
    %cst_1 = arith.constant 0.000000e+00 : f32
    %2 = vector.broadcast %cst_1 : f32 to vector<8x128xf32>
    %c0_2 = arith.constant 0 : index
    %c0_3 = arith.constant 0 : index
    %3 = vector.load %arg13[%c0_2, %c0_3] : memref<64x128xf32, #tpu.memory_space<vmem>>, vector<8x128xf32>
    tpu.vector_store %arg13[%c0_2, %c0_3], %2 {strides = array<i32>} : memref<64x128xf32, #tpu.memory_space<vmem>>, vector<8x128xf32>,
    %cst_4 = arith.constant 0.000000e+00 : f32
    %4 = vector.broadcast %cst_4 : f32 to vector<8x128xf32>
    %c56 = arith.constant 56 : index
    %c0_5 = arith.constant 0 : index
    %5 = vector.load %arg13[%c56, %c0_5] : memref<64x128xf32, #tpu.memory_space<vmem>>, vector<8x128xf32>
    tpu.vector_store %arg13[%c56, %c0_5], %4 {strides = array<i32>} : memref<64x128xf32, #tpu.memory_space<vmem>>, vector<8x128xf32>,
    %c0_6 = arith.constant 0 : index
    %c0_7 = arith.constant 0 : index
    %c0_8 = arith.constant 0 : index
    %6 = vector.load %arg1[%c0_6, %c0_7, %c0_8] : memref<2x16x4xf32, #tpu.memory_space<vmem>>, vector<1x16x4xf32>
    %7 = vector.shape_cast %6 : vector<1x16x4xf32> to vector<16x4xf32>
    %c8 = arith.constant 8 : index
    %c0_9 = arith.constant 0 : index
    %8 = vector.load %arg12[%c8, %c0_9] : memref<64x128xf32, #tpu.memory_space<vmem>>, vector<16x4xf32>
    tpu.vector_store %arg12[%c8, %c0_9], %7 {strides = array<i32>} : memref<64x128xf32, #tpu.memory_space<vmem>>, vector<16x4xf32>,
    %c1 = arith.constant 1 : index
    %c0_10 = arith.constant 0 : index
    %c0_11 = arith.constant 0 : index
    %9 = vector.load %arg1[%c1, %c0_10, %c0_11] : memref<2x16x4xf32, #tpu.memory_space<vmem>>, vector<1x16x4xf32>
    %10 = vector.shape_cast %9 : vector<1x16x4xf32> to vector<16x4xf32>
    %c32 = arith.constant 32 : index
    %c0_12 = arith.constant 0 : index
    %11 = vector.load %arg12[%c32, %c0_12] : memref<64x128xf32, #tpu.memory_space<vmem>>, vector<16x4xf32>
    tpu.vector_store %arg12[%c32, %c0_12], %10 {strides = array<i32>} : memref<64x128xf32, #tpu.memory_space<vmem>>, vector<16x4xf32>,
    %12 = tpu.iota {dimensions = array<i32: 0>} : vector<48x1xi32>
    %c24_i32 = arith.constant 24 : i32
    %c0_i32 = arith.constant 0 : i32
    %13 = arith.cmpi eq, %c24_i32, %c0_i32 : i32
    %c1_i32 = arith.constant 1 : i32
    %14 = arith.select %13, %c1_i32, %c24_i32 : i32
    %15 = vector.broadcast %14 : i32 to vector<48x1xi32>
    %16 = arith.remsi %12, %15 : vector<48x1xi32>
    %c0_i32_13 = arith.constant 0 : i32
    %17 = vector.broadcast %c0_i32_13 : i32 to vector<48x1xi32>
    %18 = arith.cmpi ne, %16, %17 : vector<48x1xi32>
    %c0_i32_14 = arith.constant 0 : i32
    %19 = vector.broadcast %c0_i32_14 : i32 to vector<48x1xi32>
    %20 = arith.cmpi slt, %16, %19 : vector<48x1xi32>
    %c0_i32_15 = arith.constant 0 : i32
    %21 = arith.cmpi slt, %14, %c0_i32_15 : i32
    %22 = vector.broadcast %21 : i1 to vector<48x1xi1>
    %23 = vector.broadcast %22 : vector<48x1xi1> to vector<48x1xi1>
    %24 = arith.xori %20, %23 : vector<48x1xi1>
    %25 = arith.andi %24, %18 : vector<48x1xi1>
    %26 = vector.broadcast %14 : i32 to vector<48x1xi32>
    %27 = arith.addi %16, %26 : vector<48x1xi32>
    %28 = arith.select %25, %27, %16 : vector<48x1xi1>, vector<48x1xi32>
    %c16_i32 = arith.constant 16 : i32
    %29 = vector.broadcast %c16_i32 : i32 to vector<48x1xi32>
    %30 = arith.cmpi slt, %28, %29 : vector<48x1xi32>
    %c7 = arith.constant 7 : index
    %c0_16 = arith.constant 0 : index
    %31 = vector.load %arg12[%c7, %c0_16] : memref<64x128xf32, #tpu.memory_space<vmem>>, vector<48x128xf32>
    %c8_17 = arith.constant 8 : index
    %c0_18 = arith.constant 0 : index
    %32 = vector.load %arg12[%c8_17, %c0_18] : memref<64x128xf32, #tpu.memory_space<vmem>>, vector<48x128xf32>
    %c9 = arith.constant 9 : index
    %c0_19 = arith.constant 0 : index
    %33 = vector.load %arg12[%c9, %c0_19] : memref<64x128xf32, #tpu.memory_space<vmem>>, vector<48x128xf32>
    %34 = tpu.concatenate %31, %32, %33 in 1 : vector<48x128xf32>, vector<48x128xf32>, vector<48x128xf32> -> vector<48x384xf32>
    %35 = arith.truncf %34 : vector<48x384xf32> to vector<48x384xbf16>
    %c0_20 = arith.constant 0 : index
    %c0_21 = arith.constant 0 : index
    %c0_22 = arith.constant 0 : index
    %36 = vector.load %arg2[%c0_20, %c0_21, %c0_22] : memref<4x384x128xbf16, #tpu.memory_space<vmem>>, vector<1x384x128xbf16>
    %37 = vector.shape_cast %36 : vector<1x384x128xbf16> to vector<384x128xbf16>
    %cst_23 = arith.constant dense<0.000000e+00> : vector<48x128xf32>
    %38 = tpu.matmul %35, %37, %cst_23 {dimension_numbers = #tpu.dot_dimension_numbers<[1], [0], [0], [1], [0, 0, 1, 1], [], []>} : vector<48x384xbf16>, vector<384x128xbf16>, vector<48x128xf32> -> vector<48x128xf32>
    %c0_24 = arith.constant 0 : index
    %c0_25 = arith.constant 0 : index
    %39 = vector.load %arg3[%c0_24, %c0_25] : memref<4x128xf32, #tpu.memory_space<vmem>>, vector<1x128xf32>
    %40 = vector.broadcast %39 : vector<1x128xf32> to vector<48x128xf32>
    %41 = arith.addf %38, %40 : vector<48x128xf32>
    %c0_26 = arith.constant 0 : index
    %42 = memref.load %arg10[%c0_26] : memref<8xf32, #tpu.memory_space<smem>>
    %cst_27 = arith.constant 0.000000e+00 : f32
    %43 = vector.broadcast %cst_27 : f32 to vector<48x128xf32>
    %44 = arith.cmpf ogt, %41, %43 : vector<48x128xf32>
    %45 = vector.broadcast %42 : f32 to vector<48x128xf32>
    %46 = arith.mulf %45, %41 : vector<48x128xf32>
    %47 = arith.select %44, %41, %46 : vector<48x128xi1>, vector<48x128xf32>
    %cst_28 = arith.constant 0.000000e+00 : f32
    %48 = vector.shape_cast %30 : vector<48x1xi1> to vector<48x1xi1>
    %49 = vector.broadcast %48 : vector<48x1xi1> to vector<48x128xi1>
    %50 = vector.broadcast %cst_28 : f32 to vector<48x128xf32>
    %51 = arith.select %49, %47, %50 : vector<48x128xi1>, vector<48x128xf32>
    %c8_29 = arith.constant 8 : index
    %c0_30 = arith.constant 0 : index
    %52 = vector.load %arg13[%c8_29, %c0_30] : memref<64x128xf32, #tpu.memory_space<vmem>>, vector<48x128xf32>
    tpu.vector_store %arg13[%c8_29, %c0_30], %51 {strides = array<i32>} : memref<64x128xf32, #tpu.memory_space<vmem>>, vector<48x128xf32>,
    %c8_31 = arith.constant 8 : index
    %c0_32 = arith.constant 0 : index
    %53 = vector.load %arg12[%c8_31, %c0_32] : memref<64x128xf32, #tpu.memory_space<vmem>>, vector<48x128xf32>
    %54 = arith.truncf %53 : vector<48x128xf32> to vector<48x128xbf16>
    %c0_33 = arith.constant 0 : index
    %c0_34 = arith.constant 0 : index
    %55 = vector.load %arg6[%c0_33, %c0_34] : memref<128x128xbf16, #tpu.memory_space<vmem>>, vector<128x128xbf16>
    %cst_35 = arith.constant dense<0.000000e+00> : vector<48x128xf32>
    %56 = tpu.matmul %54, %55, %cst_35 {dimension_numbers = #tpu.dot_dimension_numbers<[1], [0], [0], [1], [0, 0, 1, 1], [], []>} : vector<48x128xbf16>, vector<128x128xbf16>, vector<48x128xf32> -> vector<48x128xf32>
    %c0_36 = arith.constant 0 : index
    %c0_37 = arith.constant 0 : index
    %57 = vector.load %arg7[%c0_36, %c0_37] : memref<1x128xf32, #tpu.memory_space<vmem>>, vector<1x128xf32>
    %58 = vector.broadcast %57 : vector<1x128xf32> to vector<48x128xf32>
    %59 = arith.addf %56, %58 : vector<48x128xf32>
    %c7_38 = arith.constant 7 : index
    %c0_39 = arith.constant 0 : index
    %60 = vector.load %arg13[%c7_38, %c0_39] : memref<64x128xf32, #tpu.memory_space<vmem>>, vector<48x128xf32>
    %c8_40 = arith.constant 8 : index
    %c0_41 = arith.constant 0 : index
    %61 = vector.load %arg13[%c8_40, %c0_41] : memref<64x128xf32, #tpu.memory_space<vmem>>, vector<48x128xf32>
    %c9_42 = arith.constant 9 : index
    %c0_43 = arith.constant 0 : index
    %62 = vector.load %arg13[%c9_42, %c0_43] : memref<64x128xf32, #tpu.memory_space<vmem>>, vector<48x128xf32>
    %63 = tpu.concatenate %60, %61, %62 in 1 : vector<48x128xf32>, vector<48x128xf32>, vector<48x128xf32> -> vector<48x384xf32>
    %64 = arith.truncf %63 : vector<48x384xf32> to vector<48x384xbf16>
    %c0_44 = arith.constant 0 : index
    %c0_45 = arith.constant 0 : index
    %c0_46 = arith.constant 0 : index
    %65 = vector.load %arg4[%c0_44, %c0_45, %c0_46] : memref<4x384x128xbf16, #tpu.memory_space<vmem>>, vector<1x384x128xbf16>
    %66 = vector.shape_cast %65 : vector<1x384x128xbf16> to vector<384x128xbf16>
    %cst_47 = arith.constant dense<0.000000e+00> : vector<48x128xf32>
    %67 = tpu.matmul %64, %66, %cst_47 {dimension_numbers = #tpu.dot_dimension_numbers<[1], [0], [0], [1], [0, 0, 1, 1], [], []>} : vector<48x384xbf16>, vector<384x128xbf16>, vector<48x128xf32> -> vector<48x128xf32>
    %c0_48 = arith.constant 0 : index
    %c0_49 = arith.constant 0 : index
    %68 = vector.load %arg5[%c0_48, %c0_49] : memref<4x128xf32, #tpu.memory_space<vmem>>, vector<1x128xf32>
    %69 = vector.broadcast %68 : vector<1x128xf32> to vector<48x128xf32>
    %70 = arith.addf %67, %69 : vector<48x128xf32>
    %c1_50 = arith.constant 1 : index
    %71 = memref.load %arg10[%c1_50] : memref<8xf32, #tpu.memory_space<smem>>
    %cst_51 = arith.constant 0.000000e+00 : f32
    %72 = vector.broadcast %cst_51 : f32 to vector<48x128xf32>
    %73 = arith.cmpf ogt, %70, %72 : vector<48x128xf32>
    %74 = vector.broadcast %71 : f32 to vector<48x128xf32>
    %75 = arith.mulf %74, %70 : vector<48x128xf32>
    %76 = arith.select %73, %70, %75 : vector<48x128xi1>, vector<48x128xf32>
    %77 = arith.addf %76, %59 : vector<48x128xf32>
    %cst_52 = arith.constant 0.000000e+00 : f32
    %78 = vector.shape_cast %30 : vector<48x1xi1> to vector<48x1xi1>
    %79 = vector.broadcast %78 : vector<48x1xi1> to vector<48x128xi1>
    %80 = vector.broadcast %cst_52 : f32 to vector<48x128xf32>
    %81 = arith.select %79, %77, %80 : vector<48x128xi1>, vector<48x128xf32>
    %c8_53 = arith.constant 8 : index
    %c0_54 = arith.constant 0 : index
    %82 = vector.load %arg12[%c8_53, %c0_54] : memref<64x128xf32, #tpu.memory_space<vmem>>, vector<48x128xf32>
    tpu.vector_store %arg12[%c8_53, %c0_54], %81 {strides = array<i32>} : memref<64x128xf32, #tpu.memory_space<vmem>>, vector<48x128xf32>,
    %c6 = arith.constant 6 : index
    %c0_55 = arith.constant 0 : index
    %83 = vector.load %arg12[%c6, %c0_55] : memref<64x128xf32, #tpu.memory_space<vmem>>, vector<48x128xf32>
    %c8_56 = arith.constant 8 : index
    %c0_57 = arith.constant 0 : index
    %84 = vector.load %arg12[%c8_56, %c0_57] : memref<64x128xf32, #tpu.memory_space<vmem>>, vector<48x128xf32>
    %c10 = arith.constant 10 : index
    %c0_58 = arith.constant 0 : index
    %85 = vector.load %arg12[%c10, %c0_58] : memref<64x128xf32, #tpu.memory_space<vmem>>, vector<48x128xf32>
    %86 = tpu.concatenate %83, %84, %85 in 1 : vector<48x128xf32>, vector<48x128xf32>, vector<48x128xf32> -> vector<48x384xf32>
    %87 = arith.truncf %86 : vector<48x384xf32> to vector<48x384xbf16>
    %c1_59 = arith.constant 1 : index
    %c0_60 = arith.constant 0 : index
    %c0_61 = arith.constant 0 : index
    %88 = vector.load %arg2[%c1_59, %c0_60, %c0_61] : memref<4x384x128xbf16, #tpu.memory_space<vmem>>, vector<1x384x128xbf16>
    %89 = vector.shape_cast %88 : vector<1x384x128xbf16> to vector<384x128xbf16>
    %cst_62 = arith.constant dense<0.000000e+00> : vector<48x128xf32>
    %90 = tpu.matmul %87, %89, %cst_62 {dimension_numbers = #tpu.dot_dimension_numbers<[1], [0], [0], [1], [0, 0, 1, 1], [], []>} : vector<48x384xbf16>, vector<384x128xbf16>, vector<48x128xf32> -> vector<48x128xf32>
    %c1_63 = arith.constant 1 : index
    %c0_64 = arith.constant 0 : index
    %91 = vector.load %arg3[%c1_63, %c0_64] : memref<4x128xf32, #tpu.memory_space<vmem>>, vector<1x128xf32>
    %92 = vector.broadcast %91 : vector<1x128xf32> to vector<48x128xf32>
    %93 = arith.addf %90, %92 : vector<48x128xf32>
    %c2 = arith.constant 2 : index
    %94 = memref.load %arg10[%c2] : memref<8xf32, #tpu.memory_space<smem>>
    %cst_65 = arith.constant 0.000000e+00 : f32
    %95 = vector.broadcast %cst_65 : f32 to vector<48x128xf32>
    %96 = arith.cmpf ogt, %93, %95 : vector<48x128xf32>
    %97 = vector.broadcast %94 : f32 to vector<48x128xf32>
    %98 = arith.mulf %97, %93 : vector<48x128xf32>
    %99 = arith.select %96, %93, %98 : vector<48x128xi1>, vector<48x128xf32>
    %cst_66 = arith.constant 0.000000e+00 : f32
    %100 = vector.shape_cast %30 : vector<48x1xi1> to vector<48x1xi1>
    %101 = vector.broadcast %100 : vector<48x1xi1> to vector<48x128xi1>
    %102 = vector.broadcast %cst_66 : f32 to vector<48x128xf32>
    %103 = arith.select %101, %99, %102 : vector<48x128xi1>, vector<48x128xf32>
    %c8_67 = arith.constant 8 : index
    %c0_68 = arith.constant 0 : index
    %104 = vector.load %arg13[%c8_67, %c0_68] : memref<64x128xf32, #tpu.memory_space<vmem>>, vector<48x128xf32>
    tpu.vector_store %arg13[%c8_67, %c0_68], %103 {strides = array<i32>} : memref<64x128xf32, #tpu.memory_space<vmem>>, vector<48x128xf32>,
    %c8_69 = arith.constant 8 : index
    %c0_70 = arith.constant 0 : index
    %105 = vector.load %arg12[%c8_69, %c0_70] : memref<64x128xf32, #tpu.memory_space<vmem>>, vector<48x128xf32>
    %c6_71 = arith.constant 6 : index
    %c0_72 = arith.constant 0 : index
    %106 = vector.load %arg13[%c6_71, %c0_72] : memref<64x128xf32, #tpu.memory_space<vmem>>, vector<48x128xf32>
    %c8_73 = arith.constant 8 : index
    %c0_74 = arith.constant 0 : index
    %107 = vector.load %arg13[%c8_73, %c0_74] : memref<64x128xf32, #tpu.memory_space<vmem>>, vector<48x128xf32>
    %c10_75 = arith.constant 10 : index
    %c0_76 = arith.constant 0 : index
    %108 = vector.load %arg13[%c10_75, %c0_76] : memref<64x128xf32, #tpu.memory_space<vmem>>, vector<48x128xf32>
    %109 = tpu.concatenate %106, %107, %108 in 1 : vector<48x128xf32>, vector<48x128xf32>, vector<48x128xf32> -> vector<48x384xf32>
    %110 = arith.truncf %109 : vector<48x384xf32> to vector<48x384xbf16>
    %c1_77 = arith.constant 1 : index
    %c0_78 = arith.constant 0 : index
    %c0_79 = arith.constant 0 : index
    %111 = vector.load %arg4[%c1_77, %c0_78, %c0_79] : memref<4x384x128xbf16, #tpu.memory_space<vmem>>, vector<1x384x128xbf16>
    %112 = vector.shape_cast %111 : vector<1x384x128xbf16> to vector<384x128xbf16>
    %cst_80 = arith.constant dense<0.000000e+00> : vector<48x128xf32>
    %113 = tpu.matmul %110, %112, %cst_80 {dimension_numbers = #tpu.dot_dimension_numbers<[1], [0], [0], [1], [0, 0, 1, 1], [], []>} : vector<48x384xbf16>, vector<384x128xbf16>, vector<48x128xf32> -> vector<48x128xf32>
    %c1_81 = arith.constant 1 : index
    %c0_82 = arith.constant 0 : index
    %114 = vector.load %arg5[%c1_81, %c0_82] : memref<4x128xf32, #tpu.memory_space<vmem>>, vector<1x128xf32>
    %115 = vector.broadcast %114 : vector<1x128xf32> to vector<48x128xf32>
    %116 = arith.addf %113, %115 : vector<48x128xf32>
    %c3 = arith.constant 3 : index
    %117 = memref.load %arg10[%c3] : memref<8xf32, #tpu.memory_space<smem>>
    %cst_83 = arith.constant 0.000000e+00 : f32
    %118 = vector.broadcast %cst_83 : f32 to vector<48x128xf32>
    %119 = arith.cmpf ogt, %116, %118 : vector<48x128xf32>
    %120 = vector.broadcast %117 : f32 to vector<48x128xf32>
    %121 = arith.mulf %120, %116 : vector<48x128xf32>
    %122 = arith.select %119, %116, %121 : vector<48x128xi1>, vector<48x128xf32>
    %123 = arith.addf %122, %105 : vector<48x128xf32>
    %cst_84 = arith.constant 0.000000e+00 : f32
    %124 = vector.shape_cast %30 : vector<48x1xi1> to vector<48x1xi1>
    %125 = vector.broadcast %124 : vector<48x1xi1> to vector<48x128xi1>
    %126 = vector.broadcast %cst_84 : f32 to vector<48x128xf32>
    %127 = arith.select %125, %123, %126 : vector<48x128xi1>, vector<48x128xf32>
    %c8_85 = arith.constant 8 : index
    %c0_86 = arith.constant 0 : index
    %128 = vector.load %arg12[%c8_85, %c0_86] : memref<64x128xf32, #tpu.memory_space<vmem>>, vector<48x128xf32>
    tpu.vector_store %arg12[%c8_85, %c0_86], %127 {strides = array<i32>} : memref<64x128xf32, #tpu.memory_space<vmem>>, vector<48x128xf32>,
    %c4 = arith.constant 4 : index
    %c0_87 = arith.constant 0 : index
    %129 = vector.load %arg12[%c4, %c0_87] : memref<64x128xf32, #tpu.memory_space<vmem>>, vector<48x128xf32>
    %c8_88 = arith.constant 8 : index
    %c0_89 = arith.constant 0 : index
    %130 = vector.load %arg12[%c8_88, %c0_89] : memref<64x128xf32, #tpu.memory_space<vmem>>, vector<48x128xf32>
    %c12 = arith.constant 12 : index
    %c0_90 = arith.constant 0 : index
    %131 = vector.load %arg12[%c12, %c0_90] : memref<64x128xf32, #tpu.memory_space<vmem>>, vector<48x128xf32>
    %132 = tpu.concatenate %129, %130, %131 in 1 : vector<48x128xf32>, vector<48x128xf32>, vector<48x128xf32> -> vector<48x384xf32>
    %133 = arith.truncf %132 : vector<48x384xf32> to vector<48x384xbf16>
    %c2_91 = arith.constant 2 : index
    %c0_92 = arith.constant 0 : index
    %c0_93 = arith.constant 0 : index
    %134 = vector.load %arg2[%c2_91, %c0_92, %c0_93] : memref<4x384x128xbf16, #tpu.memory_space<vmem>>, vector<1x384x128xbf16>
    %135 = vector.shape_cast %134 : vector<1x384x128xbf16> to vector<384x128xbf16>
    %cst_94 = arith.constant dense<0.000000e+00> : vector<48x128xf32>
    %136 = tpu.matmul %133, %135, %cst_94 {dimension_numbers = #tpu.dot_dimension_numbers<[1], [0], [0], [1], [0, 0, 1, 1], [], []>} : vector<48x384xbf16>, vector<384x128xbf16>, vector<48x128xf32> -> vector<48x128xf32>
    %c2_95 = arith.constant 2 : index
    %c0_96 = arith.constant 0 : index
    %137 = vector.load %arg3[%c2_95, %c0_96] : memref<4x128xf32, #tpu.memory_space<vmem>>, vector<1x128xf32>
    %138 = vector.broadcast %137 : vector<1x128xf32> to vector<48x128xf32>
    %139 = arith.addf %136, %138 : vector<48x128xf32>
    %c4_97 = arith.constant 4 : index
    %140 = memref.load %arg10[%c4_97] : memref<8xf32, #tpu.memory_space<smem>>
    %cst_98 = arith.constant 0.000000e+00 : f32
    %141 = vector.broadcast %cst_98 : f32 to vector<48x128xf32>
    %142 = arith.cmpf ogt, %139, %141 : vector<48x128xf32>
    %143 = vector.broadcast %140 : f32 to vector<48x128xf32>
    %144 = arith.mulf %143, %139 : vector<48x128xf32>
    %145 = arith.select %142, %139, %144 : vector<48x128xi1>, vector<48x128xf32>
    %cst_99 = arith.constant 0.000000e+00 : f32
    %146 = vector.shape_cast %30 : vector<48x1xi1> to vector<48x1xi1>
    %147 = vector.broadcast %146 : vector<48x1xi1> to vector<48x128xi1>
    %148 = vector.broadcast %cst_99 : f32 to vector<48x128xf32>
    %149 = arith.select %147, %145, %148 : vector<48x128xi1>, vector<48x128xf32>
    %c8_100 = arith.constant 8 : index
    %c0_101 = arith.constant 0 : index
    %150 = vector.load %arg13[%c8_100, %c0_101] : memref<64x128xf32, #tpu.memory_space<vmem>>, vector<48x128xf32>
    tpu.vector_store %arg13[%c8_100, %c0_101], %149 {strides = array<i32>} : memref<64x128xf32, #tpu.memory_space<vmem>>, vector<48x128xf32>,
    %c8_102 = arith.constant 8 : index
    %c0_103 = arith.constant 0 : index
    %151 = vector.load %arg12[%c8_102, %c0_103] : memref<64x128xf32, #tpu.memory_space<vmem>>, vector<48x128xf32>
    %c4_104 = arith.constant 4 : index
    %c0_105 = arith.constant 0 : index
    %152 = vector.load %arg13[%c4_104, %c0_105] : memref<64x128xf32, #tpu.memory_space<vmem>>, vector<48x128xf32>
    %c8_106 = arith.constant 8 : index
    %c0_107 = arith.constant 0 : index
    %153 = vector.load %arg13[%c8_106, %c0_107] : memref<64x128xf32, #tpu.memory_space<vmem>>, vector<48x128xf32>
    %c12_108 = arith.constant 12 : index
    %c0_109 = arith.constant 0 : index
    %154 = vector.load %arg13[%c12_108, %c0_109] : memref<64x128xf32, #tpu.memory_space<vmem>>, vector<48x128xf32>
    %155 = tpu.concatenate %152, %153, %154 in 1 : vector<48x128xf32>, vector<48x128xf32>, vector<48x128xf32> -> vector<48x384xf32>
    %156 = arith.truncf %155 : vector<48x384xf32> to vector<48x384xbf16>
    %c2_110 = arith.constant 2 : index
    %c0_111 = arith.constant 0 : index
    %c0_112 = arith.constant 0 : index
    %157 = vector.load %arg4[%c2_110, %c0_111, %c0_112] : memref<4x384x128xbf16, #tpu.memory_space<vmem>>, vector<1x384x128xbf16>
    %158 = vector.shape_cast %157 : vector<1x384x128xbf16> to vector<384x128xbf16>
    %cst_113 = arith.constant dense<0.000000e+00> : vector<48x128xf32>
    %159 = tpu.matmul %156, %158, %cst_113 {dimension_numbers = #tpu.dot_dimension_numbers<[1], [0], [0], [1], [0, 0, 1, 1], [], []>} : vector<48x384xbf16>, vector<384x128xbf16>, vector<48x128xf32> -> vector<48x128xf32>
    %c2_114 = arith.constant 2 : index
    %c0_115 = arith.constant 0 : index
    %160 = vector.load %arg5[%c2_114, %c0_115] : memref<4x128xf32, #tpu.memory_space<vmem>>, vector<1x128xf32>
    %161 = vector.broadcast %160 : vector<1x128xf32> to vector<48x128xf32>
    %162 = arith.addf %159, %161 : vector<48x128xf32>
    %c5 = arith.constant 5 : index
    %163 = memref.load %arg10[%c5] : memref<8xf32, #tpu.memory_space<smem>>
    %cst_116 = arith.constant 0.000000e+00 : f32
    %164 = vector.broadcast %cst_116 : f32 to vector<48x128xf32>
    %165 = arith.cmpf ogt, %162, %164 : vector<48x128xf32>
    %166 = vector.broadcast %163 : f32 to vector<48x128xf32>
    %167 = arith.mulf %166, %162 : vector<48x128xf32>
    %168 = arith.select %165, %162, %167 : vector<48x128xi1>, vector<48x128xf32>
    %169 = arith.addf %168, %151 : vector<48x128xf32>
    %cst_117 = arith.constant 0.000000e+00 : f32
    %170 = vector.shape_cast %30 : vector<48x1xi1> to vector<48x1xi1>
    %171 = vector.broadcast %170 : vector<48x1xi1> to vector<48x128xi1>
    %172 = vector.broadcast %cst_117 : f32 to vector<48x128xf32>
    %173 = arith.select %171, %169, %172 : vector<48x128xi1>, vector<48x128xf32>
    %c8_118 = arith.constant 8 : index
    %c0_119 = arith.constant 0 : index
    %174 = vector.load %arg12[%c8_118, %c0_119] : memref<64x128xf32, #tpu.memory_space<vmem>>, vector<48x128xf32>
    tpu.vector_store %arg12[%c8_118, %c0_119], %173 {strides = array<i32>} : memref<64x128xf32, #tpu.memory_space<vmem>>, vector<48x128xf32>,
    %c0_120 = arith.constant 0 : index
    %c0_121 = arith.constant 0 : index
    %175 = vector.load %arg12[%c0_120, %c0_121] : memref<64x128xf32, #tpu.memory_space<vmem>>, vector<48x128xf32>
    %c8_122 = arith.constant 8 : index
    %c0_123 = arith.constant 0 : index
    %176 = vector.load %arg12[%c8_122, %c0_123] : memref<64x128xf32, #tpu.memory_space<vmem>>, vector<48x128xf32>
    %c16 = arith.constant 16 : index
    %c0_124 = arith.constant 0 : index
    %177 = vector.load %arg12[%c16, %c0_124] : memref<64x128xf32, #tpu.memory_space<vmem>>, vector<48x128xf32>
    %178 = tpu.concatenate %175, %176, %177 in 1 : vector<48x128xf32>, vector<48x128xf32>, vector<48x128xf32> -> vector<48x384xf32>
    %179 = arith.truncf %178 : vector<48x384xf32> to vector<48x384xbf16>
    %c3_125 = arith.constant 3 : index
    %c0_126 = arith.constant 0 : index
    %c0_127 = arith.constant 0 : index
    %180 = vector.load %arg2[%c3_125, %c0_126, %c0_127] : memref<4x384x128xbf16, #tpu.memory_space<vmem>>, vector<1x384x128xbf16>
    %181 = vector.shape_cast %180 : vector<1x384x128xbf16> to vector<384x128xbf16>
    %cst_128 = arith.constant dense<0.000000e+00> : vector<48x128xf32>
    %182 = tpu.matmul %179, %181, %cst_128 {dimension_numbers = #tpu.dot_dimension_numbers<[1], [0], [0], [1], [0, 0, 1, 1], [], []>} : vector<48x384xbf16>, vector<384x128xbf16>, vector<48x128xf32> -> vector<48x128xf32>
    %c3_129 = arith.constant 3 : index
    %c0_130 = arith.constant 0 : index
    %183 = vector.load %arg3[%c3_129, %c0_130] : memref<4x128xf32, #tpu.memory_space<vmem>>, vector<1x128xf32>
    %184 = vector.broadcast %183 : vector<1x128xf32> to vector<48x128xf32>
    %185 = arith.addf %182, %184 : vector<48x128xf32>
    %c6_131 = arith.constant 6 : index
    %186 = memref.load %arg10[%c6_131] : memref<8xf32, #tpu.memory_space<smem>>
    %cst_132 = arith.constant 0.000000e+00 : f32
    %187 = vector.broadcast %cst_132 : f32 to vector<48x128xf32>
    %188 = arith.cmpf ogt, %185, %187 : vector<48x128xf32>
    %189 = vector.broadcast %186 : f32 to vector<48x128xf32>
    %190 = arith.mulf %189, %185 : vector<48x128xf32>
    %191 = arith.select %188, %185, %190 : vector<48x128xi1>, vector<48x128xf32>
    %cst_133 = arith.constant 0.000000e+00 : f32
    %192 = vector.shape_cast %30 : vector<48x1xi1> to vector<48x1xi1>
    %193 = vector.broadcast %192 : vector<48x1xi1> to vector<48x128xi1>
    %194 = vector.broadcast %cst_133 : f32 to vector<48x128xf32>
    %195 = arith.select %193, %191, %194 : vector<48x128xi1>, vector<48x128xf32>
    %c8_134 = arith.constant 8 : index
    %c0_135 = arith.constant 0 : index
    %196 = vector.load %arg13[%c8_134, %c0_135] : memref<64x128xf32, #tpu.memory_space<vmem>>, vector<48x128xf32>
    tpu.vector_store %arg13[%c8_134, %c0_135], %195 {strides = array<i32>} : memref<64x128xf32, #tpu.memory_space<vmem>>, vector<48x128xf32>,
    %c8_136 = arith.constant 8 : index
    %c0_137 = arith.constant 0 : index
    %197 = vector.load %arg12[%c8_136, %c0_137] : memref<64x128xf32, #tpu.memory_space<vmem>>, vector<48x128xf32>
    %c0_138 = arith.constant 0 : index
    %c0_139 = arith.constant 0 : index
    %198 = vector.load %arg13[%c0_138, %c0_139] : memref<64x128xf32, #tpu.memory_space<vmem>>, vector<48x128xf32>
    %c8_140 = arith.constant 8 : index
    %c0_141 = arith.constant 0 : index
    %199 = vector.load %arg13[%c8_140, %c0_141] : memref<64x128xf32, #tpu.memory_space<vmem>>, vector<48x128xf32>
    %c16_142 = arith.constant 16 : index
    %c0_143 = arith.constant 0 : index
    %200 = vector.load %arg13[%c16_142, %c0_143] : memref<64x128xf32, #tpu.memory_space<vmem>>, vector<48x128xf32>
    %201 = tpu.concatenate %198, %199, %200 in 1 : vector<48x128xf32>, vector<48x128xf32>, vector<48x128xf32> -> vector<48x384xf32>
    %202 = arith.truncf %201 : vector<48x384xf32> to vector<48x384xbf16>
    %c3_144 = arith.constant 3 : index
    %c0_145 = arith.constant 0 : index
    %c0_146 = arith.constant 0 : index
    %203 = vector.load %arg4[%c3_144, %c0_145, %c0_146] : memref<4x384x128xbf16, #tpu.memory_space<vmem>>, vector<1x384x128xbf16>
    %204 = vector.shape_cast %203 : vector<1x384x128xbf16> to vector<384x128xbf16>
    %cst_147 = arith.constant dense<0.000000e+00> : vector<48x128xf32>
    %205 = tpu.matmul %202, %204, %cst_147 {dimension_numbers = #tpu.dot_dimension_numbers<[1], [0], [0], [1], [0, 0, 1, 1], [], []>} : vector<48x384xbf16>, vector<384x128xbf16>, vector<48x128xf32> -> vector<48x128xf32>
    %c3_148 = arith.constant 3 : index
    %c0_149 = arith.constant 0 : index
    %206 = vector.load %arg5[%c3_148, %c0_149] : memref<4x128xf32, #tpu.memory_space<vmem>>, vector<1x128xf32>
    %207 = vector.broadcast %206 : vector<1x128xf32> to vector<48x128xf32>
    %208 = arith.addf %205, %207 : vector<48x128xf32>
    %c7_150 = arith.constant 7 : index
    %209 = memref.load %arg10[%c7_150] : memref<8xf32, #tpu.memory_space<smem>>
    %cst_151 = arith.constant 0.000000e+00 : f32
    %210 = vector.broadcast %cst_151 : f32 to vector<48x128xf32>
    %211 = arith.cmpf ogt, %208, %210 : vector<48x128xf32>
    %212 = vector.broadcast %209 : f32 to vector<48x128xf32>
    %213 = arith.mulf %212, %208 : vector<48x128xf32>
    %214 = arith.select %211, %208, %213 : vector<48x128xi1>, vector<48x128xf32>
    %215 = arith.addf %214, %197 : vector<48x128xf32>
    %cst_152 = arith.constant 0.000000e+00 : f32
    %216 = vector.shape_cast %30 : vector<48x1xi1> to vector<48x1xi1>
    %217 = vector.broadcast %216 : vector<48x1xi1> to vector<48x128xi1>
    %218 = vector.broadcast %cst_152 : f32 to vector<48x128xf32>
    %219 = arith.select %217, %215, %218 : vector<48x128xi1>, vector<48x128xf32>
    %c8_153 = arith.constant 8 : index
    %c0_154 = arith.constant 0 : index
    %220 = vector.load %arg12[%c8_153, %c0_154] : memref<64x128xf32, #tpu.memory_space<vmem>>, vector<48x128xf32>
    tpu.vector_store %arg12[%c8_153, %c0_154], %219 {strides = array<i32>} : memref<64x128xf32, #tpu.memory_space<vmem>>, vector<48x128xf32>,
    %c8_155 = arith.constant 8 : index
    %c0_156 = arith.constant 0 : index
    %221 = vector.load %arg12[%c8_155, %c0_156] : memref<64x128xf32, #tpu.memory_space<vmem>>, vector<48x128xf32>
    %222 = arith.truncf %221 : vector<48x128xf32> to vector<48x128xbf16>
    %c0_157 = arith.constant 0 : index
    %c0_158 = arith.constant 0 : index
    %223 = vector.load %arg8[%c0_157, %c0_158] : memref<128x128xbf16, #tpu.memory_space<vmem>>, vector<128x128xbf16>
    %cst_159 = arith.constant dense<0.000000e+00> : vector<48x128xf32>
    %224 = tpu.matmul %222, %223, %cst_159 {dimension_numbers = #tpu.dot_dimension_numbers<[1], [0], [0], [1], [0, 0, 1, 1], [], []>} : vector<48x128xbf16>, vector<128x128xbf16>, vector<48x128xf32> -> vector<48x128xf32>
    %c0_160 = arith.constant 0 : index
    %c0_161 = arith.constant 0 : index
    %225 = vector.load %arg9[%c0_160, %c0_161] : memref<1x128xf32, #tpu.memory_space<vmem>>, vector<1x128xf32>
    %226 = vector.broadcast %225 : vector<1x128xf32> to vector<48x128xf32>
    %227 = arith.addf %224, %226 : vector<48x128xf32>
    %228 = arith.negf %227 : vector<48x128xf32>
    %229 = math.exp %228 : vector<48x128xf32>
    %cst_162 = arith.constant 1.000000e+00 : f32
    %230 = vector.broadcast %cst_162 : f32 to vector<48x128xf32>
    %231 = arith.addf %230, %229 : vector<48x128xf32>
    %232 = arith.divf %230, %231 : vector<48x128xf32>
    %233 = vector.extract_strided_slice %232 {offsets = [0, 0], sizes = [16, 128], strides = [1, 1]} : vector<48x128xf32> to vector<16x128xf32>
    %c0_163 = arith.constant 0 : index
    %c0_164 = arith.constant 0 : index
    %c0_165 = arith.constant 0 : index
    %234 = vector.load %arg11[%c0_163, %c0_164, %c0_165] : memref<2x16x128xf32, #tpu.memory_space<vmem>>, vector<1x16x128xf32>
    %235 = vector.shape_cast %234 : vector<1x16x128xf32> to vector<16x128xf32>
    %236 = vector.shape_cast %233 : vector<16x128xf32> to vector<1x16x128xf32>
    tpu.vector_store %arg11[%c0_163, %c0_164, %c0_165], %236 {strides = array<i32>} : memref<2x16x128xf32, #tpu.memory_space<vmem>>, vector<1x16x128xf32>,
    %237 = vector.extract_strided_slice %232 {offsets = [24, 0], sizes = [16, 128], strides = [1, 1]} : vector<48x128xf32> to vector<16x128xf32>
    %c1_166 = arith.constant 1 : index
    %c0_167 = arith.constant 0 : index
    %c0_168 = arith.constant 0 : index
    %238 = vector.load %arg11[%c1_166, %c0_167, %c0_168] : memref<2x16x128xf32, #tpu.memory_space<vmem>>, vector<1x16x128xf32>
    %239 = vector.shape_cast %238 : vector<1x16x128xf32> to vector<16x128xf32>
    %240 = vector.shape_cast %237 : vector<16x128xf32> to vector<1x16x128xf32>
    tpu.vector_store %arg11[%c1_166, %c0_167, %c0_168], %240 {strides = array<i32>} : memref<2x16x128xf32, #tpu.memory_space<vmem>>, vector<1x16x128xf32>,
    return
  }
  func.func @transform_0(%arg0: i32) -> (i32, i32, i32) {
    %c0_i32 = arith.constant 0 : i32
    %c0_i32_0 = arith.constant 0 : i32
    %c0_i32_1 = arith.constant 0 : i32
    return %arg0, %c0_i32, %c0_i32_0 : i32, i32, i32
  }
  func.func @transform_1(%arg0: i32) -> (i32, i32, i32) {
    %c0_i32 = arith.constant 0 : i32
    %c0_i32_0 = arith.constant 0 : i32
    %c0_i32_1 = arith.constant 0 : i32
    %c0_i32_2 = arith.constant 0 : i32
    return %c0_i32, %c0_i32_0, %c0_i32_1 : i32, i32, i32
  }
  func.func @transform_2(%arg0: i32) -> (i32, i32) {
    %c0_i32 = arith.constant 0 : i32
    %c0_i32_0 = arith.constant 0 : i32
    %c0_i32_1 = arith.constant 0 : i32
    return %c0_i32, %c0_i32_0 : i32, i32
  }
  func.func @transform_3(%arg0: i32) -> (i32, i32, i32) {
    %c0_i32 = arith.constant 0 : i32
    %c0_i32_0 = arith.constant 0 : i32
    %c0_i32_1 = arith.constant 0 : i32
    %c0_i32_2 = arith.constant 0 : i32
    return %c0_i32, %c0_i32_0, %c0_i32_1 : i32, i32, i32
  }
  func.func @transform_4(%arg0: i32) -> (i32, i32) {
    %c0_i32 = arith.constant 0 : i32
    %c0_i32_0 = arith.constant 0 : i32
    %c0_i32_1 = arith.constant 0 : i32
    return %c0_i32, %c0_i32_0 : i32, i32
  }
  func.func @transform_5(%arg0: i32) -> (i32, i32) {
    %c0_i32 = arith.constant 0 : i32
    %c0_i32_0 = arith.constant 0 : i32
    %c0_i32_1 = arith.constant 0 : i32
    return %c0_i32, %c0_i32_0 : i32, i32
  }
  func.func @transform_6(%arg0: i32) -> (i32, i32) {
    %c0_i32 = arith.constant 0 : i32
    %c0_i32_0 = arith.constant 0 : i32
    %c0_i32_1 = arith.constant 0 : i32
    return %c0_i32, %c0_i32_0 : i32, i32
  }
  func.func @transform_7(%arg0: i32) -> (i32, i32) {
    %c0_i32 = arith.constant 0 : i32
    %c0_i32_0 = arith.constant 0 : i32
    %c0_i32_1 = arith.constant 0 : i32
    return %c0_i32, %c0_i32_0 : i32, i32
  }
  func.func @transform_8(%arg0: i32) -> (i32, i32) {
    %c0_i32 = arith.constant 0 : i32
    %c0_i32_0 = arith.constant 0 : i32
    %c0_i32_1 = arith.constant 0 : i32
    return %c0_i32, %c0_i32_0 : i32, i32
  }
  func.func @transform_9(%arg0: i32) -> i32 {
    %c0_i32 = arith.constant 0 : i32
    %c0_i32_0 = arith.constant 0 : i32
    return %c0_i32 : i32
  }
  func.func @transform_10(%arg0: i32) -> (i32, i32, i32) {
    %c0_i32 = arith.constant 0 : i32
    %c0_i32_0 = arith.constant 0 : i32
    %c0_i32_1 = arith.constant 0 : i32
    return %arg0, %c0_i32, %c0_i32_0 : i32, i32, i32
  }
}

</mosaic_0001>

<bundles_post_ra>
// kernel: tpu_custom_call.1
= control target key start
LH: loop header
LB: loop body
LE: loop exit
PB: predicated region body
PF: predicated region fallthrough
CT: control target
= control target key end

     0   :  { %15 = vsyncpa [#allocation5], 0  ;;  %s6056_s0 = inlined_call_operand.hbm [shape: f32[2,16,4], index: 0, kind: input, shape index: {}]   ;;  %s6057_s1 = inlined_call_operand.hbm [shape: bf16[4,384,128], index: 1, kind: input, shape index: {}]   ;;  %s6058_s2 = inlined_call_operand.hbm [shape: f32[4,128], index: 2, kind: input, shape index: {}]   ;;  %s6059_s3 = inlined_call_operand.hbm [shape: bf16[4,384,128], index: 3, kind: input, shape index: {}]   ;;  %s6060_s4 = inlined_call_operand.hbm [shape: f32[4,128], index: 4, kind: input, shape index: {}]   ;;  %s6061_s5 = inlined_call_operand.hbm [shape: bf16[128,128], index: 5, kind: input, shape index: {}]   ;;  %s6062_s6 = inlined_call_operand.hbm [shape: f32[1,128], index: 6, kind: input, shape index: {}]   ;;  %s6063_s7 = inlined_call_operand.hbm [shape: bf16[128,128], index: 7, kind: input, shape index: {}]   ;;  %s6064_s8 = inlined_call_operand.hbm [shape: f32[1,128], index: 8, kind: input, shape index: {}]   ;;  %s6065_s9 = inlined_call_operand.hbm [shape: f32[8], index: 9, kind: input, shape index: {}]   ;;  %s6066_s10 = inlined_call_operand.hbm [shape: f32[2,16,128], index: 10, kind: output, shape index: {}]  }
   0x1   :  { %16 = vsyncpa [#allocation9], 0 }
   0x2   :  { %17 = vsyncpa [#allocation12], 0 }
   0x3   :  { %18 = vsyncpa [#allocation15], 0 }
   0x4   :  { %19 = vsyncpa [#allocation18], 0 }
   0x5   :  { %20 = vsyncpa [#allocation7], 0 }
   0x6   :  { %21 = vsyncpa [#allocation6], 0  ;;  %s5113_s13 = smov [#allocation8]   ;;  %s4869_s17 = scalar_lea.hbm %s6057_s1, 12288 }
   0x7   :  { %s39_s14 = sshll.u32 %s5113_s13, 4  ;;  %p4870_p0 = scmp.ne.s32.totalorder %s6057_s1, %s4869_s17  ;;  %s40_s14 = int_to_ptr.vmem [resolvable:$true] %s39_s14 }
   0x8   :  { %p4873_p1 = scmp.lt.u32.totalorder %s4869_s17, %s6057_s1 }
   0xa   :  { %p4875_p2 = pnand %p4873_p1, %p4870_p0 }
   0xc   :  { %4878 = shalt.err (!%p4875_p2)
}
   0xd   :  { %s4879_s22 = scalar_lea.vmem %s40_s14, 12288  ;;  %p4884_p4 = scmp.lt.s32.totalorder %s40_s14, %s40_s14 }
   0xe   :  { %p4880_p3 = scmp.ne.s32.totalorder %s40_s14, %s4879_s22  ;;  %p4885_p5 = scmp.lt.s32.totalorder %s4879_s22, %s4879_s22 }
  0x10   :  { %p4886_p6 = por %p4885_p5, %p4884_p4 }
  0x12   :  { %p4887_p7 = pnand %p4886_p6, %p4880_p3 }
  0x14   :  { %4890 = shalt.err (!%p4887_p7)
}
  0x15   :  { %s5114_s23 = smov 64   ;;  %s5115_s24 = smov 4  }
  0x16   :  { %45 = dma.hbm_to_vmem [thread:$0]  %s6057_s1, 12288, %s40_s14, [#allocation9], %s5114_s23, %s5114_s23, %s5115_s24  }
  0x17   :  { %s5116_s27 = smov [#allocation11]   ;;  %s5117_s29 = smov [#allocation14]  }
  0x18   :  { %s61_s28 = sshll.u32 %s5116_s27, 4  ;;  %s83_s30 = sshll.u32 %s5117_s29, 4  ;;  %s62_s28 = int_to_ptr.vmem [resolvable:$true] %s61_s28  ;;  %s84_s30 = int_to_ptr.vmem [resolvable:$true] %s83_s30 }
  0x19   :  { %s4891_s13 = scalar_lea.hbm %s6059_s3, 12288 }
  0x1a   :  { %p4892_p8 = scmp.ne.s32.totalorder %s6059_s3, %s4891_s13  ;;  %p4895_p9 = scmp.lt.u32.totalorder %s4891_s13, %s6059_s3 }
  0x1c   :  { %p4897_p10 = pnand %p4895_p9, %p4892_p8 }
  0x1e   :  { %4900 = shalt.err (!%p4897_p10)
}
  0x1f   :  { %s4901_s1 = scalar_lea.vmem %s62_s28, 12288  ;;  %p4906_p12 = scmp.lt.s32.totalorder %s62_s28, %s62_s28 }
  0x20   :  { %p4902_p11 = scmp.ne.s32.totalorder %s62_s28, %s4901_s1  ;;  %p4907_p13 = scmp.lt.s32.totalorder %s4901_s1, %s4901_s1 }
  0x22   :  { %p4908_p0 = por %p4907_p13, %p4906_p12 }
  0x24   :  { %p4909_p1 = pnand %p4908_p0, %p4902_p11 }
  0x26   :  { %4912 = shalt.err (!%p4909_p1)
}
  0x27   :  { %67 = dma.hbm_to_vmem [thread:$0]  %s6059_s3, 12288, %s62_s28, [#allocation12], %s5114_s23, %s5114_s23, %s5115_s24  }
  0x28   :  { %s4913_s22 = scalar_lea.hbm %s6061_s5, 1024 }
  0x29   :  { %p4914_p2 = scmp.ne.s32.totalorder %s6061_s5, %s4913_s22  ;;  %p4917_p3 = scmp.lt.u32.totalorder %s4913_s22, %s6061_s5 }
  0x2b   :  { %p4919_p4 = pnand %p4917_p3, %p4914_p2 }
  0x2d   :  { %4922 = shalt.err (!%p4919_p4)
}
  0x2e   :  { %s4923_s11 = scalar_lea.vmem %s84_s30, 1024  ;;  %p4928_p6 = scmp.lt.s32.totalorder %s84_s30, %s84_s30 }
  0x2f   :  { %p4924_p5 = scmp.ne.s32.totalorder %s84_s30, %s4923_s11  ;;  %p4929_p7 = scmp.lt.s32.totalorder %s4923_s11, %s4923_s11 }
  0x31   :  { %p4930_p8 = por %p4929_p7, %p4928_p6 }
  0x33   :  { %p4931_p9 = pnand %p4930_p8, %p4924_p5 }
  0x35   :  { %4934 = shalt.err (!%p4931_p9)
}
  0x36   :  { %89 = dma.hbm_to_vmem [thread:$0]  %s6061_s5, 1024, %s84_s30, [#allocation15], %s5114_s23, %s5114_s23, %s5115_s24  }
  0x37   :  { %s5118_s12 = smov [#allocation17]   ;;  %s5119_s15 = smov [#allocation4]  }
  0x38   :  { %s105_s13 = sshll.u32 %s5118_s12, 4  ;;  %s27_s16 = sshll.u32 %s5119_s15, 4  ;;  %s106_s13 = int_to_ptr.vmem [resolvable:$true] %s105_s13  ;;  %s28_s16 = int_to_ptr.vmem [resolvable:$true] %s27_s16 }
  0x39   :  { %s4935_s1 = scalar_lea.hbm %s6063_s7, 1024 }
  0x3a   :  { %p4936_p10 = scmp.ne.s32.totalorder %s6063_s7, %s4935_s1  ;;  %p4939_p11 = scmp.lt.u32.totalorder %s4935_s1, %s6063_s7 }
  0x3c   :  { %p4941_p12 = pnand %p4939_p11, %p4936_p10 }
  0x3e   :  { %4944 = shalt.err (!%p4941_p12)
}
  0x3f   :  { %s4945_s5 = scalar_lea.vmem %s106_s13, 1024  ;;  %p4950_p0 = scmp.lt.s32.totalorder %s106_s13, %s106_s13 }
  0x40   :  { %p4946_p13 = scmp.ne.s32.totalorder %s106_s13, %s4945_s5  ;;  %p4951_p1 = scmp.lt.s32.totalorder %s4945_s5, %s4945_s5 }
  0x42   :  { %p4952_p2 = por %p4951_p1, %p4950_p0 }
  0x44   :  { %p4953_p3 = pnand %p4952_p2, %p4946_p13 }
  0x46   :  { %4956 = shalt.err (!%p4953_p3)
}
  0x47   :  { %111 = dma.hbm_to_vmem [thread:$0]  %s6063_s7, 1024, %s106_s13, [#allocation18], %s5114_s23, %s5114_s23, %s5115_s24  }
  0x48   :  { %s4957_s27 = scalar_lea.hbm %s6056_s0, 512 }
  0x49   :  { %p4958_p4 = scmp.ne.s32.totalorder %s6056_s0, %s4957_s27  ;;  %p4961_p5 = scmp.lt.u32.totalorder %s4957_s27, %s6056_s0 }
  0x4b   :  { %p4963_p6 = pnand %p4961_p5, %p4958_p4 }
  0x4d   :  { %4966 = shalt.err (!%p4963_p6)
}
  0x4e   :  { %s4967_s12 = scalar_lea.vmem %s28_s16, 512  ;;  %p4972_p8 = scmp.lt.s32.totalorder %s28_s16, %s28_s16 }
  0x4f   :  { %p4968_p7 = scmp.ne.s32.totalorder %s28_s16, %s4967_s12  ;;  %p4973_p9 = scmp.lt.s32.totalorder %s4967_s12, %s4967_s12 }
  0x51   :  { %p4974_p10 = por %p4973_p9, %p4972_p8 }
  0x53   :  { %p4975_p11 = pnand %p4974_p10, %p4968_p7 }
  0x55   :  { %4978 = shalt.err (!%p4975_p11)
}
  0x56   :  { %s5120_s7 = smov 128   ;;  %s5121_s23 = smov 8  }
  0x57   :  { %33 = dma.hbm_to_vmem [thread:$0]  %s6056_s0, 512, %s28_s16, [#allocation5], %s5120_s7, %s5120_s7, %s5121_s23  }
  0x58   :  { %s5122_s15 = smov [#allocation10]   ;;  %s5123_s18 = smov [#allocation13]  }
  0x59   :  { %s52_s17 = sshll.u32 %s5122_s15, 4  ;;  %s74_s1 = sshll.u32 %s5123_s18, 4  ;;  %s53_s17 = int_to_ptr.vmem [resolvable:$true] %s52_s17  ;;  %s75_s1 = int_to_ptr.vmem [resolvable:$true] %s74_s1 }
  0x5a   :  { %s4979_s20 = scalar_lea.hbm %s6058_s2, 64 }
  0x5b   :  { %p4980_p12 = scmp.ne.s32.totalorder %s6058_s2, %s4979_s20  ;;  %p4983_p13 = scmp.lt.u32.totalorder %s4979_s20, %s6058_s2 }
  0x5d   :  { %p4985_p0 = pnand %p4983_p13, %p4980_p12 }
  0x5f   :  { %4988 = shalt.err (!%p4985_p0)
}
  0x60   :  { %s4989_s0 = scalar_lea.vmem %s53_s17, 64  ;;  %p4994_p2 = scmp.lt.s32.totalorder %s53_s17, %s53_s17 }
  0x61   :  { %p4990_p1 = scmp.ne.s32.totalorder %s53_s17, %s4989_s0  ;;  %p4995_p3 = scmp.lt.s32.totalorder %s4989_s0, %s4989_s0 }
  0x63   :  { %p4996_p4 = por %p4995_p3, %p4994_p2 }
  0x65   :  { %p4997_p5 = pnand %p4996_p4, %p4990_p1 }
  0x67   :  { %5000 = shalt.err (!%p4997_p5)
}
  0x68   :  { %55 = dma.hbm_to_vmem [thread:$0]  %s6058_s2, 64, %s53_s17, [#allocation9]  }
  0x69   :  { %s5001_s29 = scalar_lea.hbm %s6060_s4, 64 }
  0x6a   :  { %p5002_p6 = scmp.ne.s32.totalorder %s6060_s4, %s5001_s29  ;;  %p5005_p7 = scmp.lt.u32.totalorder %s5001_s29, %s6060_s4 }
  0x6c   :  { %p5007_p8 = pnand %p5005_p7, %p5002_p6 }
  0x6e   :  { %5010 = shalt.err (!%p5007_p8)
}
  0x6f   :  { %s5011_s24 = scalar_lea.vmem %s75_s1, 64  ;;  %p5016_p10 = scmp.lt.s32.totalorder %s75_s1, %s75_s1 }
  0x70   :  { %p5012_p9 = scmp.ne.s32.totalorder %s75_s1, %s5011_s24  ;;  %p5017_p11 = scmp.lt.s32.totalorder %s5011_s24, %s5011_s24 }
  0x72   :  { %p5018_p12 = por %p5017_p11, %p5016_p10 }
  0x74   :  { %p5019_p13 = pnand %p5018_p12, %p5012_p9 }
  0x76   :  { %5022 = shalt.err (!%p5019_p13)
}
  0x77   :  { %77 = dma.hbm_to_vmem [thread:$0]  %s6060_s4, 64, %s75_s1, [#allocation12]  }
  0x78   :  { %s5124_s15 = smov [#allocation16]   ;;  %s5125_s18 = smov [#allocation19]  }
  0x79   :  { %s96_s17 = sshll.u32 %s5124_s15, 4  ;;  %s118_s14 = sshll.u32 %s5125_s18, 4  ;;  %s97_s17 = int_to_ptr.vmem [resolvable:$true] %s96_s17  ;;  %s119_s14 = int_to_ptr.vmem [resolvable:$true] %s118_s14 }
  0x7a   :  { %s5023_s21 = scalar_lea.hbm %s6062_s6, 16 }
  0x7b   :  { %p5024_p0 = scmp.ne.s32.totalorder %s6062_s6, %s5023_s21  ;;  %p5027_p1 = scmp.lt.u32.totalorder %s5023_s21, %s6062_s6 }
  0x7d   :  { %p5029_p2 = pnand %p5027_p1, %p5024_p0 }
  0x7f   :  { %5032 = shalt.err (!%p5029_p2)
}
  0x80   :  { %s5033_s4 = scalar_lea.vmem %s97_s17, 16  ;;  %s5037_s1 = scalar_lea.vmem %s97_s17, 32 }
  0x81   :  { %p5034_p3 = scmp.ne.s32.totalorder %s97_s17, %s5033_s4  ;;  %p5038_p4 = scmp.lt.s32.totalorder %s97_s17, %s97_s17 }
  0x82   :  { %p5039_p5 = scmp.lt.s32.totalorder %s5037_s1, %s5033_s4 }
  0x84   :  { %p5040_p6 = por %p5039_p5, %p5038_p4 }
  0x86   :  { %p5041_p7 = pnand %p5040_p6, %p5034_p3 }
  0x88   :  { %5044 = shalt.err (!%p5041_p7)
}
  0x89   :  { %99 = dma.hbm_to_vmem [thread:$0]  %s6062_s6, 16, %s97_s17, [#allocation15]  }
  0x8a   :  { %s5045_s29 = scalar_lea.hbm %s6064_s8, 16 }
  0x8b   :  { %p5046_p8 = scmp.ne.s32.totalorder %s6064_s8, %s5045_s29  ;;  %p5049_p9 = scmp.lt.u32.totalorder %s5045_s29, %s6064_s8 }
  0x8d   :  { %p5051_p10 = pnand %p5049_p9, %p5046_p8 }
  0x8f   :  { %5054 = shalt.err (!%p5051_p10)
}
  0x90   :  { %s5055_s24 = scalar_lea.vmem %s119_s14, 16  ;;  %s5059_s2 = scalar_lea.vmem %s119_s14, 32 }
  0x91   :  { %p5056_p11 = scmp.ne.s32.totalorder %s119_s14, %s5055_s24  ;;  %p5060_p12 = scmp.lt.s32.totalorder %s119_s14, %s119_s14 }
  0x92   :  { %p5061_p13 = scmp.lt.s32.totalorder %s5059_s2, %s5055_s24 }
  0x94   :  { %p5062_p0 = por %p5061_p13, %p5060_p12 }
  0x96   :  { %p5063_p1 = pnand %p5062_p0, %p5056_p11 }
  0x98   :  { %5066 = shalt.err (!%p5063_p1)
}
  0x99   :  { %121 = dma.hbm_to_vmem [thread:$0]  %s6064_s8, 16, %s119_s14, [#allocation18]  }
  0x9a   :  { %s5067_s18 = scalar_lea.hbm %s6065_s9, 16 }
  0x9b   :  { %p5068_p2 = scmp.ne.s32.totalorder %s6065_s9, %s5067_s18  ;;  %p5071_p3 = scmp.lt.u32.totalorder %s5067_s18, %s6065_s9 }
  0x9d   :  { %p5073_p4 = pnand %p5071_p3, %p5068_p2 }
  0x9f   :  { %5076 = shalt.err (!%p5073_p4)
}
  0xa0   :  { %s5126_s30 = smov [#allocation20]  }
  0xa1   :  { %129 = dma.hbm_to_smem %s6065_s9, 16, %s5126_s30, [#allocation7]  }
  0xa2   :  { %5099 = dma.done.wait [#allocation5], 512  }
  0xa3   :  { %5100 = vsyncadd [#allocation5], 4294966784 }
  0xa4   :  { %5101 = dma.done.wait [#allocation9], 12352  }
  0xa5   :  { %5102 = vsyncadd [#allocation9], 4294954944 }
  0xa6   :  { %5103 = dma.done.wait [#allocation12], 12352  }
  0xa7   :  { %5104 = vsyncadd [#allocation12], 4294954944 }
  0xa8   :  { %5105 = dma.done.wait [#allocation15], 1040  }
  0xa9   :  { %5106 = vsyncadd [#allocation15], 4294966256 }
  0xaa   :  { %5107 = dma.done.wait [#allocation18], 1040  }
  0xab   :  { %5108 = vsyncadd [#allocation18], 4294966256 }
  0xac   :  { %5109 = dma.done.wait [#allocation7], 16  }
  0xad   :  { %5110 = vsyncadd [#allocation7], 4294967280 }
  0xae   :  { %160 = sfence }
  0xaf   :  { %v4534_v0 = vld [vmem:[#allocation8 + $0x40] sm:$0xff]   ;;  %v5127_v2 = vmov 0.0   ;;  %v4537_v4 = vld [vmem:[#allocation8 + $0x48] sm:$0xff]   ;;  %vm5128_vm0 = vmmov 0   ;;  %v4540_v7 = vld [vmem:[#allocation8 + $0x50] sm:$0xff]   ;;  %vm174_vm1 = vcmask 31744  }
  0xb0   :  { %v4535_v1 = vld [vmem:[#allocation8] sm:$0xff]   ;;  %4225 = vmatprep.subr.bf16.mxu1 %v5127_v2  ;;  %162 = vst [vmem:[#allocation2] sm:$0xff] %v5127_v2  ;;  %163 = vst [vmem:[#allocation2 + $0x8] sm:$0xff] %v5127_v2  ;;  %3843 = vmatprep.subr.bf16.mxu0 %v4534_v0  ;;  %v4538_v5 = vld [vmem:[#allocation8 + $0x8] sm:$0xff]   ;;  %s629_s8 = sld [smem:[#allocation20]]  ;;  %s3673_s9 = sld [smem:[#allocation20 + $0x1]] }
  0xb1   :  { %164 = vst [vmem:[#allocation2 + $0x10] sm:$0xff] %v5127_v2  ;;  %165 = vst [vmem:[#allocation2 + $0x18] sm:$0xff] %v5127_v2  ;;  %v4536_v3 = vld [vmem:[#allocation8 + $0x80] sm:$0xff]   ;;  %3844 = vmatpush3.bf16.msra.mxu0 %v4535_v1  ;;  %4241 = vmatprep.mubr.msk.bf16.mxu1 %vm5128_vm0, %v5127_v2  ;;  %v4539_v6 = vld [vmem:[#allocation8 + $0x88] sm:$0xff]   ;;  %s3699_s14 = sld [smem:[#allocation20 + $0x2]]  ;;  %s3725_s4 = sld [smem:[#allocation20 + $0x3]] }
  0xb2   :  { %166 = vst [vmem:[#allocation2 + $0x20] sm:$0xff] %v5127_v2  ;;  %167 = vst [vmem:[#allocation2 + $0x28] sm:$0xff] %v5127_v2  ;;  %4226 = vmatpush3.bf16.msra.mxu1 %v4536_v3  ;;  %3845 = vmatprep.subr.bf16.mxu0 %v4537_v4  ;;  %v4541_v8 = vld [vmem:[#allocation8 + $0x10] sm:$0xff]   ;;  %v4543_v10 = vld [vmem:[#allocation8 + $0x58] sm:$0xff]   ;;  %s3751_s1 = sld [smem:[#allocation20 + $0x4]]  ;;  %s3777_s16 = sld [smem:[#allocation20 + $0x5]] }
  0xb3   :  { %168 = vst [vmem:[#allocation2 + $0x30] sm:$0xff] %v5127_v2  ;;  %169 = vst [vmem:[#allocation2 + $0x38] sm:$0xff] %v5127_v2  ;;  %4227 = vmatprep.subr.bf16.mxu1 %v5127_v2  ;;  %v4542_v9 = vld [vmem:[#allocation8 + $0x90] sm:$0xff]   ;;  %v4544_v11 = vld [vmem:[#allocation8 + $0x18] sm:$0xff]   ;;  %s3803_s25 = sld [smem:[#allocation20 + $0x6]]  ;;  %s3829_s26 = sld [smem:[#allocation20 + $0x7]] }
  0xb4   :  { %170 = vst [vmem:[#allocation3] sm:$0xff] %v5127_v2  ;;  %171 = vst [vmem:[#allocation3 + $0x38] sm:$0xff] %v5127_v2  ;;  %v4545_v12 = vld [vmem:[#allocation8 + $0x98] sm:$0xff]   ;;  %v4546_v13 = vld [vmem:[#allocation8 + $0x60] sm:$0xff]   ;;  %s5130_s27 = smov [#allocation21]  }
  0xb5   :  { %3846 = vmatpush3.bf16.msra.mxu0 %v4538_v5  ;;  %v4547_v14 = vld [vmem:[#allocation8 + $0x20] sm:$0xff]   ;;  %v4549_v16 = vld [vmem:[#allocation8 + $0x68] sm:$0xff]   ;;  %v4552_v19 = vld [vmem:[#allocation8 + $0x70] sm:$0xff]   ;;  %s3597_s29 = sshll.u32 %s5130_s27, 4  ;;  %s3598_s29 = int_to_ptr.vmem [resolvable:$true] %s3597_s29 }
  0xb6   :  { %4228 = vmatpush3.bf16.msra.mxu1 %v4539_v6  ;;  %3847 = vmatprep.subr.bf16.mxu0 %v4540_v7  ;;  %v4548_v15 = vld [vmem:[#allocation8 + $0xa0] sm:$0xff]   ;;  %v4550_v17 = vld [vmem:[#allocation8 + $0x28] sm:$0xff]   ;;  %v4553_v20 = vld [vmem:[#allocation8 + $0x30] sm:$0xff]   ;;  %s5077_s11 = scalar_lea.vmem %s3598_s29, 512  ;;  %p5082_p6 = scmp.lt.s32.totalorder %s3598_s29, %s3598_s29 }
  0xb7   :  { %4229 = vmatprep.subr.bf16.mxu1 %v5127_v2  ;;  %v4551_v18 = vld [vmem:[#allocation8 + $0xa8] sm:$0xff]   ;;  %v4554_v21 = vld [vmem:[#allocation8 + $0xb0] sm:$0xff]   ;;  %v172_v22 = vld [vmem:[#allocation4] sm:$0xff]  ;;  %p5078_p5 = scmp.ne.s32.totalorder %s3598_s29, %s5077_s11  ;;  %p5083_p7 = scmp.lt.s32.totalorder %s5077_s11, %s5077_s11 }
  0xb8   :  { %v173_v23 = vld [vmem:[#allocation4 + $0x8] sm:$0xff]  ;;  %v179_v24 = vld [vmem:[#allocation4 + $0x18] sm:$0xff]  ;;  %175 = vst.msk [vmem:[#allocation2 + $0x8] sm:$0xff] %vm174_vm1, %v172_v22  ;;  %v178_v26 = vld [vmem:[#allocation4 + $0x10] sm:$0xff] }
  0xb9   :  { %3848 = vmatpush3.bf16.msra.mxu0 %v4541_v8  ;;  %v4555_v25 = vld [vmem:[#allocation8 + $0x78] sm:$0xff]   ;;  %176 = vst.msk [vmem:[#allocation2 + $0x10] sm:$0xff] %vm174_vm1, %v173_v23  ;;  %181 = vst.msk [vmem:[#allocation2 + $0x28] sm:$0xff] %vm174_vm1, %v179_v24  ;;  %v4558_v39 = vld [vmem:[#allocation14] sm:$0xff]   ;;  %p5084_p8 = por %p5083_p7, %p5082_p6 }
  0xba   :  { %4230 = vmatpush3.bf16.msra.mxu1 %v4542_v9  ;;  %3849 = vmatprep.subr.bf16.mxu0 %v4543_v10  ;;  %180 = vst.msk [vmem:[#allocation2 + $0x20] sm:$0xff] %vm174_vm1, %v178_v26  ;;  %v4556_v27 = vld [vmem:[#allocation8 + $0x38] sm:$0xff]   ;;  %v4559_v44 = vld [vmem:[#allocation14 + $0x8] sm:$0xff]   ;;  %v4566_v50 = vld [vmem:[#allocation11 + $0x40] sm:$0xff]  }
  0xbb   :  { %4231 = vmatprep.subr.bf16.mxu1 %v5127_v2  ;;  %v4557_v28 = vld [vmem:[#allocation8 + $0xb8] sm:$0xff]   ;;  %v4567_v52 = vld [vmem:[#allocation11] sm:$0xff]   ;;  %v4568_v53 = vld [vmem:[#allocation11 + $0x48] sm:$0xff]   ;;  %p5085_p9 = pnand %p5084_p8, %p5078_p5 }
  0xbc   :  { %v4560_v49 = vld [vmem:[#allocation14 + $0x10] sm:$0xff]   ;;  %v4569_v57 = vld [vmem:[#allocation11 + $0x8] sm:$0xff]   ;;  %v4561_v59 = vld [vmem:[#allocation14 + $0x18] sm:$0xff]  }
  0xbd   :  { %3850 = vmatpush3.bf16.msra.mxu0 %v4544_v11  ;;  %v308_v56 = vld [vmem:[#allocation2 + $0x31] sm:$0xff]  ;;  %v4562_v62 = vld [vmem:[#allocation14 + $0x20] sm:$0xff]   ;;  %v4565_v1 = vld [vmem:[#allocation14 + $0x38] sm:$0xff]  }
  0xbe   :  { %4232 = vmatpush3.bf16.msra.mxu1 %v4545_v12  ;;  %3851 = vmatprep.subr.bf16.mxu0 %v4546_v13  ;;  %v4563_v63 = vld [vmem:[#allocation14 + $0x28] sm:$0xff]   ;;  %v4564_v0 = vld [vmem:[#allocation14 + $0x30] sm:$0xff]   ;;  %v4570_v3 = vld [vmem:[#allocation11 + $0x80] sm:$0xff]  }
  0xbf   :  { %4233 = vmatprep.subr.bf16.mxu1 %v5127_v2  ;;  %v297_v29 = vld [vmem:[#allocation2 + $0x8] sm:$0xff]  ;;  %v4571_v4 = vld [vmem:[#allocation11 + $0x50] sm:$0xff]   ;;  %v4574_v7 = vld [vmem:[#allocation11 + $0x58] sm:$0xff]  }
  0xc0   :  { %v298_v30 = vld [vmem:[#allocation2 + $0x10] sm:$0xff]  ;;  %v291_v31 = vld [vmem:[#allocation2 + $0x7] sm:$0xff]  ;;  %v4575_v8 = vld [vmem:[#allocation11 + $0x18] sm:$0xff]  }
  0xc1   :  { %3852 = vmatpush3.bf16.msra.mxu0 %v4547_v14  ;;  %v5341_v32 = vpack.c.bf16 %v298_v30, %v297_v29  ;;  %v292_v33 = vld [vmem:[#allocation2 + $0xf] sm:$0xff]  ;;  %v300_v38 = vld [vmem:[#allocation2 + $0x20] sm:$0xff]  ;;  %v293_v41 = vld [vmem:[#allocation2 + $0x17] sm:$0xff] }
  0xc2   :  { %4234 = vmatpush3.bf16.msra.mxu1 %v4548_v15  ;;  %3853 = vmatprep.subr.bf16.mxu0 %v4549_v16  ;;  %v303_v34 = vld [vmem:[#allocation2 + $0x9] sm:$0xff]  ;;  %v304_v35 = vld [vmem:[#allocation2 + $0x11] sm:$0xff]  ;;  %v309_v36 = vpack.c.bf16 %v292_v33, %v291_v31  ;;  %v313_v40 = vpack.c.bf16 %v300_v38, %v5127_v2  ;;  %v294_v42 = vld [vmem:[#allocation2 + $0x1f] sm:$0xff] }
  0xc3   :  { %4235 = vmatprep.subr.bf16.mxu1 %v5127_v2  ;;  %v311_v37 = vpack.c.bf16 %v304_v35, %v303_v34  ;;  %547 = vmatprep.mubr.bf16.mxu0 %v5341_v32  ;;  %v305_v43 = vld [vmem:[#allocation2 + $0x19] sm:$0xff]  ;;  %v306_v45 = vld [vmem:[#allocation2 + $0x21] sm:$0xff]  ;;  %v312_v47 = vpack.c.bf16 %v294_v42, %v293_v41  ;;  %v296_v55 = vld [vmem:[#allocation2 + $0x2f] sm:$0xff] }
  0xc4   :  { %v301_v46 = vld [vmem:[#allocation2 + $0x28] sm:$0xff]  ;;  %v314_v48 = vpack.c.bf16 %v306_v45, %v305_v43  ;;  %v4572_v5 = vld [vmem:[#allocation11 + $0x10] sm:$0xff]   ;;  %v4579_v12 = vld [vmem:[#allocation11 + $0x98] sm:$0xff]  }
  0xc5   :  { %3854 = vmatpush3.bf16.msra.mxu0 %v4550_v17  ;;  %v316_v51 = vpack.c.bf16 %v5127_v2, %v301_v46  ;;  %v295_v54 = vld [vmem:[#allocation2 + $0x27] sm:$0xff]  ;;  %v4576_v9 = vld [vmem:[#allocation11 + $0x90] sm:$0xff]   ;;  %v4589_v23 = vld [vmem:[#allocation11 + $0xb8] sm:$0xff]  }
  0xc6   :  { %4236 = vmatpush3.bf16.msra.mxu1 %v4551_v18  ;;  %3855 = vmatprep.subr.bf16.mxu0 %v4552_v19  ;;  %v307_v58 = vld [vmem:[#allocation2 + $0x29] sm:$0xff]  ;;  %v315_v60 = vpack.c.bf16 %v296_v55, %v295_v54  ;;  %v4583_v16 = vld [vmem:[#allocation11 + $0x70] sm:$0xff]   ;;  %v4586_v19 = vld [vmem:[#allocation11 + $0x78] sm:$0xff]  }
  0xc7   :  { %4237 = vmatprep.subr.bf16.mxu1 %v5127_v2  ;;  %v317_v61 = vpack.c.bf16 %v308_v56, %v307_v58  ;;  %v4573_v6 = vld [vmem:[#allocation11 + $0x88] sm:$0xff]   ;;  %v4577_v10 = vld [vmem:[#allocation11 + $0x60] sm:$0xff]   ;;  %v4584_v17 = vld [vmem:[#allocation11 + $0x30] sm:$0xff]  }
  0xc8   :  { %v4578_v11 = vld [vmem:[#allocation11 + $0x20] sm:$0xff]   ;;  %v4580_v13 = vld [vmem:[#allocation11 + $0x68] sm:$0xff]   ;;  %v5410_v58 = vld [vmem:[#allocation10] ss:$0 sm:$0xff] }
  0xc9   :  { %3856 = vmatpush3.bf16.msra.mxu0 %v4553_v20  ;;  %v4581_v14 = vld [vmem:[#allocation11 + $0x28] sm:$0xff]   ;;  %v4582_v15 = vld [vmem:[#allocation11 + $0xa0] sm:$0xff]   ;;  %v4587_v20 = vld [vmem:[#allocation11 + $0x38] sm:$0xff]  }
  0xca   :  { %4238 = vmatpush3.bf16.msra.mxu1 %v4554_v21  ;;  %3857 = vmatprep.subr.bf16.mxu0 %v4555_v25  ;;  %v4585_v18 = vld [vmem:[#allocation11 + $0xa8] sm:$0xff]   ;;  %v4588_v21 = vld [vmem:[#allocation11 + $0xb0] sm:$0xff]   ;;  %v5374_v22 = vld [vmem:[#allocation2] sm:$0xff]  ;;  %v182_v25 = vlaneseq }
  0xcb   :  { %4239 = vmatprep.subr.bf16.mxu1 %v5127_v2  ;;  %v4590_v24 = vld [vmem:[#allocation8 + $0x100] sm:$0xff]  }
  0xcc   :  { %v183_v26 = vshrl.u32 %v182_v25, 7 }
  0xcd   :  { %3858 = vmatpush3.bf16.msra.mxu0 %v4556_v27 }
  0xce   :  { %4240 = vmatpush3.bf16.msra.mxu1 %v4557_v28  ;;  %4253 = vmatprep.subr.bf16.mxu0 %v5127_v2  ;;  %v184_v27 = vadd.s32 8, %v183_v26  ;;  %v5378_v28 = vmul.u32.u64.low 2863311531, %v183_v26  ;;  %v5379_v29 = vmul.u32.u64.high 2863311531, %v183_v26, %v5378_v28  ;;  %v185_v31 = vadd.s32 16, %v183_v26 }
  0xcf   :  { %3899 = vmatprep.subr.bf16.mxu1 %v4566_v50  ;;  %v5394_v43 = vadd.s32 40, %v183_v26 }
  0xd0   :  { %548 = vmatmul.mubr.bf16.vlgmr.msra.gmra.mrb[0].mxu0 %v309_v36  ;;  %v195_v33 = vshrl.u32 %v5379_v29, 4  ;;  %v5385_v34 = vmul.u32.u64.low 2863311531, %v185_v31  ;;  %v5386_v35 = vmul.u32.u64.high 2863311531, %v185_v31, %v5385_v34 }
  0xd1   :  { %4242 = vmatmul.mubr.bf16.vlgmr.msra.gmra.mrb[0].mxu1 %v311_v37  ;;  %555 = vmatprep.mubr.bf16.mxu0 %v313_v40 }
  0xd2   :  { %4245 = vmatprep.mubr.msk.bf16.mxu1 %vm5128_vm0, %v5127_v2  ;;  %4254 = vmatpush3.bf16.msra.mxu0 %v4558_v39  ;;  %v196_v39 = vmul.u32 24, %v195_v33 }
  0xd3   :  { %4255 = vmatprep.subr.bf16.mxu0 %v5127_v2  ;;  %3900 = vmatpush3.bf16.msra.mxu1 %v4567_v52 }
  0xd4   :  { %3901 = vmatprep.subr.bf16.mxu1 %v4568_v53  ;;  %v197_v42 = vsub.s32 %v183_v26, %v196_v39 }
  0xd6   :  { %4256 = vmatpush3.bf16.msra.mxu0 %v4559_v44  ;;  %v217_v44 = vshrl.u32 %v5386_v35, 4  ;;  %vm255_vm2 = vcmp.ne.s32.totalorder %v197_v42, 0  ;;  %vm261_vm3 = vcmp.lt.s32.totalorder %v197_v42, 0 }
  0xd7   :  { %4257 = vmatprep.subr.bf16.mxu0 %v5127_v2  ;;  %3902 = vmatpush3.bf16.msra.mxu1 %v4569_v57  ;;  %vm5406_vm4 = vmand %vm261_vm3, %vm255_vm2 }
  0xd8   :  { %556 = vmatmul.mubr.bf16.gmra.mrb[4].mxu0 %v312_v47  ;;  %3903 = vmatprep.subr.bf16.mxu1 %v4571_v4  ;;  %v218_v52 = vmul.u32 24, %v217_v44 }
  0xd9   :  { %4246 = vmatmul.mubr.bf16.gmra.mrb[4].mxu1 %v314_v48  ;;  %563 = vmatprep.mubr.bf16.mxu0 %v316_v51 }
  0xda   :  { %4249 = vmatprep.mubr.msk.bf16.mxu1 %vm5128_vm0, %v5127_v2  ;;  %4258 = vmatpush3.bf16.msra.mxu0 %v4560_v49  ;;  %v5403_v49 = vmul.u32.u64.low 2863311531, %v5394_v43  ;;  %v5404_v50 = vmul.u32.u64.high 2863311531, %v5394_v43, %v5403_v49 }
  0xdb   :  { %4259 = vmatprep.subr.bf16.mxu0 %v5127_v2  ;;  %3904 = vmatpush3.bf16.msra.mxu1 %v4572_v5  ;;  %v219_v5 = vsub.s32 %v185_v31, %v218_v52 }
  0xdc   :  { %3905 = vmatprep.subr.bf16.mxu1 %v4574_v7 }
  0xdd   :  { %vm257_vm9 = vcmp.ne.s32.totalorder %v219_v5, 0  ;;  %vm263_vm10 = vcmp.lt.s32.totalorder %v219_v5, 0 }
  0xde   :  { %4260 = vmatpush3.bf16.msra.mxu0 %v4561_v59  ;;  %vm5438_vm1 = vmand %vm263_vm10, %vm257_vm9 }
  0xdf   :  { %4261 = vmatprep.subr.bf16.mxu0 %v5127_v2  ;;  %3906 = vmatpush3.bf16.msra.mxu1 %v4575_v8 }
  0xe0   :  { %564 = vmatmul.mubr.bf16.gmra.mrb[8].mxu0 %v315_v60  ;;  %3907 = vmatprep.subr.bf16.mxu1 %v4577_v10  ;;  %v5420_v10 = vstv %s629_s8 }
  0xe1   :  { %4250 = vmatmul.mubr.bf16.gmra.mrb[8].mxu1 %v317_v61  ;;  %4269 = vmatprep.mubr.msk.bf16.mxu0 %vm5128_vm0, %v5127_v2 }
  0xe2   :  { %4262 = vmatpush3.bf16.msra.mxu0 %v4562_v62 }
  0xe3   :  { %4263 = vmatprep.subr.bf16.mxu0 %v5127_v2  ;;  %3908 = vmatpush3.bf16.msra.mxu1 %v4578_v11  ;;  %v250_v11 = vshrl.u32 %v5404_v50, 4 }
  0xe4   :  { %3909 = vmatprep.subr.bf16.mxu1 %v4580_v13 }
  0xe6   :  { %4264 = vmatpush3.bf16.msra.mxu0 %v4563_v63 }
  0xe7   :  { %4265 = vmatprep.subr.bf16.mxu0 %v5127_v2  ;;  %3910 = vmatpush3.bf16.msra.mxu1 %v4581_v14 }
  0xe8   :  { %3911 = vmatprep.subr.bf16.mxu1 %v4583_v16 }
  0xea   :  { %4266 = vmatpush3.bf16.msra.mxu0 %v4564_v0 }
  0xeb   :  { %4267 = vmatprep.subr.bf16.mxu0 %v5127_v2  ;;  %3912 = vmatpush3.bf16.msra.mxu1 %v4584_v17 }
  0xec   :  { %3913 = vmatprep.subr.bf16.mxu1 %v4586_v19 }
  0xee   :  { %4268 = vmatpush3.bf16.msra.mxu0 %v4565_v1 }
  0xef   :  { %4281 = vmatprep.subr.bf16.mxu0 %v5127_v2  ;;  %3914 = vmatpush3.bf16.msra.mxu1 %v4587_v20 }
  0xf0   :  { %3944 = vmatprep.subr.bf16.mxu1 %v4590_v24  ;;  %v275_v24 = vadd.s32 24, %v219_v5 }
  0xf1   :  { %4270 = vmatmul.mubr.bf16.vlgmr.msra.gmra.mrb[12].mxu0 %v5341_v32  ;;  %v186_v32 = vadd.s32 24, %v183_v26 }
  0xf2   :  { %4282 = vmatpush3.bf16.msra.mxu0 %v4570_v3  ;;  %4273 = vmatprep.mubr.msk.bf16.mxu0 %vm5128_vm0, %v5127_v2  ;;  %v281_v44 = vsel %vm5438_vm1, %v275_v24, %v219_v5 }
  0xf3   :  { %4283 = vmatprep.subr.bf16.mxu0 %v5127_v2  ;;  %v5388_v36 = vmul.u32.u64.low 2863311531, %v186_v32  ;;  %v5389_v37 = vmul.u32.u64.high 2863311531, %v186_v32, %v5388_v36 }
  0xf5   :  { %v228_v45 = vshrl.u32 %v5389_v37, 4 }
  0xf6   :  { %4284 = vmatpush3.bf16.msra.mxu0 %v4573_v6 }
  0xf7   :  { %4285 = vmatprep.subr.bf16.mxu0 %v5127_v2  ;;  %v229_v53 = vmul.u32 24, %v228_v45 }
  0xf9   :  { %4274 = vmatmul.mubr.bf16.gmra.mrb[16].mxu0 %v313_v40  ;;  %v5392_v40 = vadd.s32 32, %v183_v26  ;;  %v230_v6 = vsub.s32 %v186_v32, %v229_v53 }
  0xfa   :  { %4277 = vmatprep.mubr.msk.bf16.mxu0 %vm5128_vm0, %v5127_v2  ;;  %4286 = vmatpush3.bf16.msra.mxu0 %v4576_v9 }
  0xfb   :  { %4287 = vmatprep.subr.bf16.mxu0 %v5127_v2  ;;  %v5399_v46 = vmul.u32.u64.low 2863311531, %v5392_v40  ;;  %v5400_v47 = vmul.u32.u64.high 2863311531, %v5392_v40, %v5399_v46  ;;  %vm258_vm11 = vcmp.ne.s32.totalorder %v230_v6, 0  ;;  %vm264_vm13 = vcmp.lt.s32.totalorder %v230_v6, 0 }
  0xfc   :  { %v276_v26 = vadd.s32 24, %v230_v6  ;;  %vm5446_vm2 = vmand %vm264_vm13, %vm258_vm11 }
  0xfd   :  { %v239_v7 = vshrl.u32 %v5400_v47, 4 }
  0xfe   :  { %4288 = vmatpush3.bf16.msra.mxu0 %v4579_v12  ;;  %v282_v47 = vsel %vm5446_vm2, %v276_v26, %v230_v6 }
  0xff   :  { %4289 = vmatprep.subr.bf16.mxu0 %v5127_v2  ;;  %v240_v16 = vmul.u32 24, %v239_v7  ;;  %vm5475_vm9 = vcmp.lt.s32.totalorder %v282_v47, 16 }
 0x101   :  { %4278 = vmatmul.mubr.bf16.gmra.mrb[20].mxu0 %v316_v51  ;;  %v273_v51 = vadd.s32 24, %v197_v42  ;;  %v241_v37 = vsub.s32 %v5392_v40, %v240_v16  ;;  %v4591_v16 = vld [vmem:[#allocation8 + $0xc0] sm:$0xff]  }
 0x102   :  { %4297 = vmatprep.mubr.msk.bf16.mxu0 %vm5128_vm0, %v5127_v2  ;;  %4290 = vmatpush3.bf16.msra.mxu0 %v4582_v15 }
 0x103   :  { %4291 = vmatprep.subr.bf16.mxu0 %v5127_v2  ;;  %v279_v0 = vsel %vm5406_vm4, %v273_v51, %v197_v42  ;;  %vm259_vm3 = vcmp.ne.s32.totalorder %v241_v37, 0  ;;  %vm265_vm4 = vcmp.lt.s32.totalorder %v241_v37, 0 }
 0x104   :  { %vm5423_vm8 = vcmp.lt.s32.totalorder %v279_v0, 16  ;;  %vm5482_vm13 = vmand %vm265_vm4, %vm259_vm3 }
 0x106   :  { %4292 = vmatpush3.bf16.msra.mxu0 %v4585_v18 }
 0x107   :  { %4293 = vmatprep.subr.bf16.mxu0 %v5127_v2  ;;  %v5381_v2 = vmul.u32.u64.low 2863311531, %v184_v27  ;;  %v5382_v30 = vmul.u32.u64.high 2863311531, %v184_v27, %v5381_v2 }
 0x109   :  { %v206_v38 = vshrl.u32 %v5382_v30, 4 }
 0x10a   :  { %4294 = vmatpush3.bf16.msra.mxu0 %v4588_v21 }
 0x10b   :  { %4295 = vmatprep.subr.bf16.mxu0 %v5374_v22  ;;  %v207_v41 = vmul.u32 24, %v206_v38 }
 0x10d   :  { %v208_v48 = vsub.s32 %v184_v27, %v207_v41  ;;  %v251_v27 = vmul.u32 24, %v250_v11 }
 0x10e   :  { %4296 = vmatpush3.bf16.msra.mxu0 %v4589_v23 }
 0x10f   :  { %4309 = vmatprep.subr.bf16.mxu0 %v5374_v22  ;;  %vm256_vm5 = vcmp.ne.s32.totalorder %v208_v48, 0  ;;  %vm262_vm6 = vcmp.lt.s32.totalorder %v208_v48, 0  ;;  %v274_v62 = vadd.s32 24, %v208_v48  ;;  %v252_v45 = vsub.s32 %v5394_v43, %v251_v27 }
 0x110   :  { %vm5414_vm7 = vmand %vm262_vm6, %vm256_vm5  ;;  %vm5460_vm5 = vcmp.lt.s32.totalorder %v281_v44, 16 }
 0x111   :  { %v280_v14 = vsel %vm5414_vm7, %v274_v62, %v208_v48  ;;  %vm260_vm10 = vcmp.ne.s32.totalorder %v252_v45, 0  ;;  %vm266_vm11 = vcmp.lt.s32.totalorder %v252_v45, 0  ;;  %vm5511_vm3 = vmpackc.low %vm5475_vm9, %vm5460_vm5 }
 0x112   :  { %vm5431_vm14 = vcmp.lt.s32.totalorder %v280_v14, 16 }
 0x113   :  { %vm5469_vm7 = vmpackc.low %vm5431_vm14, %vm5423_vm8 }
 0x1a3   :  { %v3859_v54 = vpop.f32.mrb[0].mxu0 }
 0x1a4   :  { %v606_v56 = vpop.f32.mrb[0].mxu1  ;;  %v3860_v57 = vpop.f32.mrb[1].mxu0 }
 0x1a5   :  { %v4243_v59 = vpop.f32.mrb[1].mxu1  ;;  %v3861_v60 = vadd.f32 %v3860_v57, %v3859_v54  ;;  %v3862_v61 = vpop.f32.mrb[2].mxu0 }
 0x1a6   :  { %v609_v63 = vpop.f32.mrb[2].mxu1  ;;  %v3863_v1 = vpop.f32.mrb[3].mxu0 }
 0x1a7   :  { %v4244_v4 = vpop.f32.mrb[3].mxu1  ;;  %v550_v8 = vadd.f32 %v3861_v60, %v5410_v58  ;;  %v3864_v9 = vadd.f32 %v3863_v1, %v3862_v61 }
 0x1a8   :  { %v278_v4 = vadd.s32 24, %v252_v45 }
 0x1a9   :  { %v607_v13 = vadd.f32 %v606_v56, %v550_v8  ;;  %v553_v15 = vadd.f32 %v3864_v9, %v5410_v58  ;;  %v277_v56 = vadd.s32 24, %v241_v37  ;;  %v4600_v9 = vld [vmem:[#allocation8 + $0x150] sm:$0xff]  }
 0x1ab   :  { %vm630_vm12 = vcmp.gt.f32.partialorder %v607_v13, 0.0  ;;  %v637_v17 = vmul.f32 %v5420_v10, %v607_v13  ;;  %v610_v18 = vadd.f32 %v609_v63, %v553_v15  ;;  %v3865_v19 = vpop.f32.mrb[4].mxu0 }
 0x1ac   :  { %v614_v20 = vpop.f32.mrb[4].mxu1  ;;  %v3866_v23 = vpop.f32.mrb[5].mxu0 }
 0x1ad   :  { %v4247_v25 = vpop.f32.mrb[5].mxu1  ;;  %v643_v28 = vsel %vm630_vm12, %v607_v13, %v637_v17  ;;  %vm631_vm15 = vcmp.gt.f32.partialorder %v610_v18, 0.0  ;;  %v638_v29 = vmul.f32 %v5420_v10, %v610_v18  ;;  %v3867_v2 = vadd.f32 %v3866_v23, %v3865_v19  ;;  %v3868_v30 = vpop.f32.mrb[6].mxu0 }
 0x1ae   :  { %v617_v32 = vpop.f32.mrb[6].mxu1  ;;  %v661_v33 = vsel %vm5423_vm8, %v643_v28, 0.0  ;;  %v3869_v34 = vpop.f32.mrb[7].mxu0  ;;  %v283_v13 = vsel %vm5482_vm13, %v277_v56, %v241_v37 }
 0x1af   :  { %v4248_v36 = vpop.f32.mrb[7].mxu1  ;;  %667 = vst [vmem:[#allocation3 + $0x8] sm:$0xff] %v661_v33  ;;  %v644_v38 = vsel %vm631_vm15, %v610_v18, %v638_v29  ;;  %v558_v39 = vadd.f32 %v3867_v2, %v5410_v58  ;;  %v3870_v41 = vadd.f32 %v3869_v34, %v3868_v30  ;;  %vm5491_vm15 = vmand %vm266_vm11, %vm260_vm10  ;;  %vm5502_vm1 = vcmp.lt.s32.totalorder %v283_v13, 16  ;;  %v4602_v13 = vld [vmem:[#allocation8 + $0xe0] sm:$0xff]  }
 0x1b0   :  { %v662_v42 = vsel %vm5431_vm14, %v644_v38, 0.0  ;;  %v4762_v53 = vpack.c.bf16 %v644_v38, %v643_v28  ;;  %v284_v23 = vsel %vm5491_vm15, %v278_v4, %v252_v45  ;;  %v4595_v4 = vld [vmem:[#allocation8 + $0x110] sm:$0xff]  }
 0x1b1   :  { %668 = vst [vmem:[#allocation3 + $0x10] sm:$0xff] %v662_v42  ;;  %v615_v46 = vadd.f32 %v614_v20, %v558_v39  ;;  %v561_v40 = vadd.f32 %v3870_v41, %v5410_v58  ;;  %v4592_v20 = vld [vmem:[#allocation8 + $0x108] sm:$0xff]   ;;  %vm5517_vm4 = vcmp.lt.s32.totalorder %v284_v23, 16  ;;  %v4610_v23 = vld [vmem:[#allocation8 + $0x138] sm:$0xff]  }
 0x1b2   :  { %4763 = vmatprep.mubr.msk.bf16.mxu1 %vm5469_vm7, %v4762_v53  ;;  %vm5532_vm10 = vmpackc.low %vm5517_vm4, %vm5502_vm1 }
 0x1b3   :  { %vm632_vm6 = vcmp.gt.f32.partialorder %v615_v46, 0.0  ;;  %v639_v49 = vmul.f32 %v5420_v10, %v615_v46  ;;  %v618_v50 = vadd.f32 %v617_v32, %v561_v40  ;;  %v3871_v51 = vpop.f32.mrb[8].mxu0 }
 0x1b4   :  { %v622_v52 = vpop.f32.mrb[8].mxu1  ;;  %v3872_v55 = vpop.f32.mrb[9].mxu0 }
 0x1b5   :  { %v4251_v57 = vpop.f32.mrb[9].mxu1  ;;  %v645_v59 = vsel %vm632_vm6, %v615_v46, %v639_v49  ;;  %vm633_vm12 = vcmp.gt.f32.partialorder %v618_v50, 0.0  ;;  %v640_v60 = vmul.f32 %v5420_v10, %v618_v50  ;;  %v3873_v61 = vadd.f32 %v3872_v55, %v3871_v51  ;;  %v3874_v62 = vpop.f32.mrb[10].mxu0 }
 0x1b6   :  { %v625_v0 = vpop.f32.mrb[10].mxu1  ;;  %v663_v1 = vsel %vm5460_vm5, %v645_v59, 0.0  ;;  %v3875_v3 = vpop.f32.mrb[11].mxu0  ;;  %v810_v14 = vld [vmem:[#allocation3 + $0x7] sm:$0xff] }
 0x1b7   :  { %v4252_v5 = vpop.f32.mrb[11].mxu1  ;;  %669 = vst [vmem:[#allocation3 + $0x18] sm:$0xff] %v663_v1  ;;  %v646_v6 = vsel %vm633_vm12, %v618_v50, %v640_v60  ;;  %v566_v7 = vadd.f32 %v3873_v61, %v5410_v58  ;;  %v3876_v8 = vadd.f32 %v3875_v3, %v3874_v62  ;;  %v4593_v1 = vld [vmem:[#allocation8 + $0xc8] sm:$0xff]   ;;  %v4594_v3 = vld [vmem:[#allocation8 + $0x140] sm:$0xff]  }
 0x1b8   :  { %v664_v11 = vsel %vm5475_vm9, %v646_v6, 0.0  ;;  %v811_v15 = vld [vmem:[#allocation3 + $0xf] sm:$0xff]  ;;  %v4765_v27 = vpack.c.bf16 %v646_v6, %v645_v59 }
 0x1b9   :  { %670 = vst [vmem:[#allocation3 + $0x20] sm:$0xff] %v664_v11  ;;  %v623_v17 = vadd.f32 %v622_v52, %v566_v7  ;;  %v569_v18 = vadd.f32 %v3876_v8, %v5410_v58  ;;  %v828_v19 = vpack.c.bf16 %v811_v15, %v810_v14  ;;  %v822_v31 = vld [vmem:[#allocation3 + $0x9] sm:$0xff]  ;;  %v4598_v7 = vld [vmem:[#allocation8 + $0x118] sm:$0xff]   ;;  %v4601_v11 = vld [vmem:[#allocation8 + $0x120] sm:$0xff]  }
 0x1ba   :  { %v4596_v5 = vld [vmem:[#allocation8 + $0xd0] sm:$0xff]   ;;  %v4597_v6 = vld [vmem:[#allocation8 + $0x148] sm:$0xff]   ;;  %v4599_v8 = vld [vmem:[#allocation8 + $0xd8] sm:$0xff]  }
 0x1bb   :  { %vm634_vm2 = vcmp.gt.f32.partialorder %v623_v17, 0.0  ;;  %v641_v25 = vmul.f32 %v5420_v10, %v623_v17  ;;  %v626_v26 = vadd.f32 %v625_v0, %v569_v18  ;;  %1067 = vmatmul.mubr.bf16.vlgmr.msra.gmra.mrb[12].mxu1 %v828_v19  ;;  %v4603_v14 = vld [vmem:[#allocation8 + $0x158] sm:$0xff]   ;;  %v4604_v15 = vld [vmem:[#allocation8 + $0x128] sm:$0xff]   ;;  %v4607_v18 = vld [vmem:[#allocation8 + $0x130] sm:$0xff]  }
 0x1bc   :  { %4766 = vmatprep.mubr.msk.bf16.mxu1 %vm5511_vm3, %v4765_v27  ;;  %3945 = vmatpush3.bf16.msra.mxu1 %v4591_v16  ;;  %v4605_v16 = vld [vmem:[#allocation8 + $0xe8] sm:$0xff]   ;;  %v4608_v19 = vld [vmem:[#allocation8 + $0xf0] sm:$0xff]   ;;  %v4613_v27 = vld [vmem:[#allocation8 + $0x178] sm:$0xff]  }
 0x1bd   :  { %v647_v28 = vsel %vm634_vm2, %v623_v17, %v641_v25  ;;  %vm635_vm6 = vcmp.gt.f32.partialorder %v626_v26, 0.0  ;;  %v642_v2 = vmul.f32 %v5420_v10, %v626_v26  ;;  %3946 = vmatprep.subr.bf16.mxu1 %v4592_v20  ;;  %v4606_v17 = vld [vmem:[#allocation8 + $0x160] sm:$0xff]   ;;  %v4609_v20 = vld [vmem:[#allocation8 + $0x168] sm:$0xff]   ;;  %v4611_v25 = vld [vmem:[#allocation8 + $0xf8] sm:$0xff]  }
 0x1be   :  { %v665_v30 = vsel %vm5502_vm1, %v647_v28, 0.0  ;;  %v823_v32 = vld [vmem:[#allocation3 + $0x11] sm:$0xff] }
 0x1bf   :  { %671 = vst [vmem:[#allocation3 + $0x28] sm:$0xff] %v665_v30  ;;  %v648_v33 = vsel %vm635_vm6, %v626_v26, %v642_v2  ;;  %v830_v34 = vpack.c.bf16 %v823_v32, %v822_v31  ;;  %v812_v36 = vld [vmem:[#allocation3 + $0x17] sm:$0xff]  ;;  %v5562_v31 = vld [vmem:[#allocation13] ss:$0 sm:$0xff] }
 0x1c0   :  { %v666_v35 = vsel %vm5517_vm4, %v648_v33, 0.0  ;;  %v813_v37 = vld [vmem:[#allocation3 + $0x1f] sm:$0xff]  ;;  %v4768_v39 = vpack.c.bf16 %v648_v33, %v647_v28  ;;  %3947 = vmatpush3.bf16.msra.mxu1 %v4593_v1  ;;  %v4612_v26 = vld [vmem:[#allocation8 + $0x170] sm:$0xff]  }
 0x1c1   :  { %672 = vst [vmem:[#allocation3 + $0x30] sm:$0xff] %v666_v35  ;;  %4298 = vmatmul.mubr.bf16.vlgmr.msra.gmra.mrb[24].mxu0 %v830_v34  ;;  %v831_v38 = vpack.c.bf16 %v813_v37, %v812_v36  ;;  %v824_v44 = vld [vmem:[#allocation3 + $0x19] sm:$0xff]  ;;  %3948 = vmatprep.subr.bf16.mxu1 %v4595_v4  ;;  %v4614_v28 = vld [vmem:[#allocation11 + $0x100] sm:$0xff]  }
 0x1c2   :  { %4301 = vmatprep.mubr.msk.bf16.mxu0 %vm5128_vm0, %v5374_v22  ;;  %4310 = vmatpush3.bf16.msra.mxu0 %v4594_v3 }
 0x1c3   :  { %1075 = vmatmul.mubr.bf16.gmra.mrb[16].mxu1 %v831_v38  ;;  %4311 = vmatprep.subr.bf16.mxu0 %v5374_v22  ;;  %v5565_v38 = vstv %s3673_s9 }
 0x1c4   :  { %4769 = vmatprep.mubr.msk.bf16.mxu1 %vm5532_vm10, %v4768_v39  ;;  %v5538_v41 = vpop.f32.mrb[12].mxu0  ;;  %3949 = vmatpush3.bf16.msra.mxu1 %v4596_v5 }
 0x1c5   :  { %v4271_v42 = vpop.f32.mrb[13].mxu0  ;;  %3950 = vmatprep.subr.bf16.mxu1 %v4598_v7 }
 0x1c6   :  { %v825_v45 = vld [vmem:[#allocation3 + $0x21] sm:$0xff]  ;;  %v5540_v46 = vpop.f32.mrb[14].mxu0  ;;  %4312 = vmatpush3.bf16.msra.mxu0 %v4597_v6 }
 0x1c7   :  { %v833_v47 = vpack.c.bf16 %v825_v45, %v824_v44  ;;  %v4272_v40 = vpop.f32.mrb[15].mxu0  ;;  %v814_v49 = vld [vmem:[#allocation3 + $0x27] sm:$0xff]  ;;  %4313 = vmatprep.subr.bf16.mxu0 %v5374_v22 }
 0x1c8   :  { %v815_v50 = vld [vmem:[#allocation3 + $0x2f] sm:$0xff]  ;;  %3951 = vmatpush3.bf16.msra.mxu1 %v4599_v8  ;;  %v5568_v42 = vld [vmem:[#allocation16] ss:$0 sm:$0xff] }
 0x1c9   :  { %4302 = vmatmul.mubr.bf16.gmra.mrb[28].mxu0 %v833_v47  ;;  %v834_v51 = vpack.c.bf16 %v815_v50, %v814_v49  ;;  %v826_v52 = vld [vmem:[#allocation3 + $0x29] sm:$0xff]  ;;  %v827_v53 = vld [vmem:[#allocation3 + $0x31] sm:$0xff]  ;;  %3952 = vmatprep.subr.bf16.mxu1 %v4601_v11  ;;  %v791_v1 = vadd.f32 %v5568_v42, %v5540_v46 }
 0x1ca   :  { %4305 = vmatprep.mubr.msk.bf16.mxu0 %vm5128_vm0, %v5374_v22  ;;  %v836_v59 = vpack.c.bf16 %v827_v53, %v826_v52  ;;  %4314 = vmatpush3.bf16.msra.mxu0 %v4600_v9  ;;  %v788_v53 = vadd.f32 %v5568_v42, %v5538_v41 }
 0x1cb   :  { %1083 = vmatmul.mubr.bf16.gmra.mrb[20].mxu1 %v834_v51  ;;  %4315 = vmatprep.subr.bf16.mxu0 %v5374_v22 }
 0x1cc   :  { %v5544_v55 = vpop.f32.mrb[16].mxu0  ;;  %3953 = vmatpush3.bf16.msra.mxu1 %v4602_v13 }
 0x1cd   :  { %v4275_v56 = vpop.f32.mrb[17].mxu0  ;;  %3954 = vmatprep.subr.bf16.mxu1 %v4604_v15 }
 0x1ce   :  { %v5546_v57 = vpop.f32.mrb[18].mxu0  ;;  %4316 = vmatpush3.bf16.msra.mxu0 %v4603_v14 }
 0x1cf   :  { %v4276_v60 = vpop.f32.mrb[19].mxu0  ;;  %4317 = vmatprep.subr.bf16.mxu0 %v5374_v22 }
 0x1d0   :  { %3955 = vmatpush3.bf16.msra.mxu1 %v4605_v16 }
 0x1d1   :  { %4306 = vmatmul.mubr.bf16.gmra.mrb[32].mxu0 %v836_v59  ;;  %3956 = vmatprep.subr.bf16.mxu1 %v4607_v18 }
 0x1d2   :  { %4325 = vmatprep.mubr.msk.bf16.mxu0 %vm5128_vm0, %v5374_v22  ;;  %4318 = vmatpush3.bf16.msra.mxu0 %v4606_v17 }
 0x1d3   :  { %4319 = vmatprep.subr.bf16.mxu0 %v5374_v22 }
 0x1d4   :  { %v5550_v61 = vpop.f32.mrb[20].mxu0  ;;  %3957 = vmatpush3.bf16.msra.mxu1 %v4608_v19 }
 0x1d5   :  { %v4279_v62 = vpop.f32.mrb[21].mxu0  ;;  %3958 = vmatprep.subr.bf16.mxu1 %v4610_v23 }
 0x1d6   :  { %v5552_v63 = vpop.f32.mrb[22].mxu0  ;;  %4320 = vmatpush3.bf16.msra.mxu0 %v4609_v20  ;;  %v796_v20 = vadd.f32 %v5568_v42, %v5544_v55 }
 0x1d7   :  { %v4280_v0 = vpop.f32.mrb[23].mxu0  ;;  %4321 = vmatprep.subr.bf16.mxu0 %v5374_v22 }
 0x1d8   :  { %3959 = vmatpush3.bf16.msra.mxu1 %v4611_v25 }
 0x1d9   :  { %3989 = vmatprep.subr.bf16.mxu1 %v4614_v28 }
 0x1da   :  { %4322 = vmatpush3.bf16.msra.mxu0 %v4612_v26 }
 0x1db   :  { %4323 = vmatprep.subr.bf16.mxu0 %v5374_v22 }
 0x1de   :  { %4324 = vmatpush3.bf16.msra.mxu0 %v4613_v27 }
 0x1df   :  { %4337 = vmatprep.subr.bf16.mxu0 %v5374_v22 }
 0x28e   :  { %v3915_v2 = vpop.f32.mrb[12].mxu1 }
 0x28f   :  { %v3916_v30 = vpop.f32.mrb[13].mxu1 }
 0x290   :  { %v3917_v32 = vadd.f32 %v3916_v30, %v3915_v2  ;;  %v3918_v33 = vpop.f32.mrb[14].mxu1  ;;  %v799_v30 = vadd.f32 %v5568_v42, %v5546_v57 }
 0x291   :  { %v3919_v34 = vpop.f32.mrb[15].mxu1 }
 0x292   :  { %v3920_v35 = vadd.f32 %v3919_v34, %v3918_v33  ;;  %v1069_v36 = vadd.f32 %v3917_v32, %v5562_v31 }
 0x294   :  { %v1125_v37 = vpop.f32.mrb[24].mxu0  ;;  %v1072_v39 = vadd.f32 %v3920_v35, %v5562_v31 }
 0x295   :  { %v1126_v44 = vadd.f32 %v1125_v37, %v1069_v36  ;;  %v4299_v45 = vpop.f32.mrb[25].mxu0 }
 0x296   :  { %v1128_v47 = vpop.f32.mrb[26].mxu0  ;;  %v3921_v40 = vpop.f32.mrb[16].mxu1 }
 0x297   :  { %vm1149_vm11 = vcmp.gt.f32.partialorder %v1126_v44, 0.0  ;;  %v1156_v49 = vmul.f32 %v5565_v38, %v1126_v44  ;;  %v1129_v50 = vadd.f32 %v1128_v47, %v1072_v39  ;;  %v4300_v51 = vpop.f32.mrb[27].mxu0  ;;  %v3922_v52 = vpop.f32.mrb[17].mxu1 }
 0x298   :  { %v3923_v56 = vadd.f32 %v3922_v52, %v3921_v40  ;;  %v3924_v59 = vpop.f32.mrb[18].mxu1 }
 0x299   :  { %v1162_v60 = vsel %vm1149_vm11, %v1126_v44, %v1156_v49  ;;  %vm1150_vm12 = vcmp.gt.f32.partialorder %v1129_v50, 0.0  ;;  %v1157_v62 = vmul.f32 %v5565_v38, %v1129_v50  ;;  %v3925_v0 = vpop.f32.mrb[19].mxu1 }
 0x29a   :  { %v1168_v3 = vadd.f32 %v1162_v60, %v788_v53  ;;  %v3926_v4 = vadd.f32 %v3925_v0, %v3924_v59  ;;  %v1077_v5 = vadd.f32 %v3923_v56, %v5562_v31  ;;  %v4616_v56 = vld [vmem:[#allocation11 + $0x108] sm:$0xff]   ;;  %v804_v59 = vadd.f32 %v5568_v42, %v5550_v61 }
 0x29b   :  { %v1163_v6 = vsel %vm1150_vm12, %v1129_v50, %v1157_v62  ;;  %v4615_v50 = vld [vmem:[#allocation11 + $0xc0] sm:$0xff]   ;;  %v807_v0 = vadd.f32 %v5568_v42, %v5552_v63 }
 0x29c   :  { %v5579_v7 = vsel %vm5423_vm8, %v1168_v3, 0.0  ;;  %v1169_v41 = vadd.f32 %v1163_v6, %v791_v1  ;;  %v1133_v8 = vpop.f32.mrb[28].mxu0  ;;  %v1080_v9 = vadd.f32 %v3926_v4, %v5562_v31  ;;  %v4617_v4 = vld [vmem:[#allocation11 + $0xc8] sm:$0xff]  }
 0x29d   :  { %1180 = vst [vmem:[#allocation2 + $0x8] sm:$0xff] %v5579_v7  ;;  %v1134_v11 = vadd.f32 %v1133_v8, %v1077_v5  ;;  %v4303_v13 = vpop.f32.mrb[29].mxu0  ;;  %v4618_v8 = vld [vmem:[#allocation11 + $0x140] sm:$0xff]  }
 0x29e   :  { %v5585_v46 = vsel %vm5431_vm14, %v1169_v41, 0.0  ;;  %v1136_v14 = vpop.f32.mrb[30].mxu0  ;;  %v3927_v15 = vpop.f32.mrb[20].mxu1  ;;  %v4771_v2 = vpack.c.bf16 %v1169_v41, %v1168_v3 }
 0x29f   :  { %1181 = vst [vmem:[#allocation2 + $0x10] sm:$0xff] %v5585_v46  ;;  %vm1151_vm13 = vcmp.gt.f32.partialorder %v1134_v11, 0.0  ;;  %v1158_v16 = vmul.f32 %v5565_v38, %v1134_v11  ;;  %v1137_v17 = vadd.f32 %v1136_v14, %v1080_v9  ;;  %v4304_v18 = vpop.f32.mrb[31].mxu0  ;;  %v3928_v19 = vpop.f32.mrb[21].mxu1 }
 0x2a0   :  { %v3929_v23 = vadd.f32 %v3928_v19, %v3927_v15  ;;  %v3930_v25 = vpop.f32.mrb[22].mxu1  ;;  %4772 = vmatprep.mubr.msk.bf16.mxu1 %vm5469_vm7, %v4771_v2  ;;  %v4621_v2 = vld [vmem:[#allocation11 + $0x148] sm:$0xff]  }
 0x2a1   :  { %v1164_v26 = vsel %vm1151_vm13, %v1134_v11, %v1158_v16  ;;  %vm1152_vm15 = vcmp.gt.f32.partialorder %v1137_v17, 0.0  ;;  %v1159_v27 = vmul.f32 %v5565_v38, %v1137_v17  ;;  %v3931_v28 = vpop.f32.mrb[23].mxu1 }
 0x2a2   :  { %v1170_v32 = vadd.f32 %v1164_v26, %v796_v20  ;;  %v3932_v33 = vadd.f32 %v3931_v28, %v3930_v25  ;;  %v1085_v34 = vadd.f32 %v3929_v23, %v5562_v31  ;;  %v4620_v28 = vld [vmem:[#allocation11 + $0xd0] sm:$0xff]  }
 0x2a3   :  { %v1165_v35 = vsel %vm1152_vm15, %v1137_v17, %v1159_v27  ;;  %v4619_v27 = vld [vmem:[#allocation11 + $0x110] sm:$0xff]  }
 0x2a4   :  { %v5599_v55 = vsel %vm5460_vm5, %v1170_v32, 0.0  ;;  %v1171_v36 = vadd.f32 %v1165_v35, %v799_v30  ;;  %v1141_v37 = vpop.f32.mrb[32].mxu0  ;;  %v1088_v39 = vadd.f32 %v3932_v33, %v5562_v31  ;;  %v1186_v40 = vld [vmem:[#allocation2 + $0x6] sm:$0xff]  ;;  %v4622_v30 = vld [vmem:[#allocation11 + $0x118] sm:$0xff]   ;;  %v4624_v33 = vld [vmem:[#allocation11 + $0x150] sm:$0xff]  }
 0x2a5   :  { %1182 = vst [vmem:[#allocation2 + $0x18] sm:$0xff] %v5599_v55  ;;  %v1142_v44 = vadd.f32 %v1141_v37, %v1085_v34  ;;  %v4307_v45 = vpop.f32.mrb[33].mxu0  ;;  %v4625_v34 = vld [vmem:[#allocation11 + $0x120] sm:$0xff]   ;;  %v4628_v37 = vld [vmem:[#allocation11 + $0x128] sm:$0xff]  }
 0x2a6   :  { %v5605_v57 = vsel %vm5475_vm9, %v1171_v36, 0.0  ;;  %v1144_v47 = vpop.f32.mrb[34].mxu0  ;;  %v1187_v49 = vld [vmem:[#allocation2 + $0xe] sm:$0xff]  ;;  %v4774_v3 = vpack.c.bf16 %v1171_v36, %v1170_v32  ;;  %v4623_v32 = vld [vmem:[#allocation11 + $0xd8] sm:$0xff]   ;;  %v4626_v35 = vld [vmem:[#allocation11 + $0xe0] sm:$0xff]  }
 0x2a7   :  { %1183 = vst [vmem:[#allocation2 + $0x20] sm:$0xff] %v5605_v57  ;;  %vm1153_vm2 = vcmp.gt.f32.partialorder %v1142_v44, 0.0  ;;  %v1160_v51 = vmul.f32 %v5565_v38, %v1142_v44  ;;  %v1145_v52 = vadd.f32 %v1144_v47, %v1088_v39  ;;  %v4308_v53 = vpop.f32.mrb[35].mxu0  ;;  %v1204_v31 = vpack.c.bf16 %v1187_v49, %v1186_v40  ;;  %v1198_v41 = vld [vmem:[#allocation2 + $0xa] sm:$0xff]  ;;  %v4627_v36 = vld [vmem:[#allocation11 + $0x158] sm:$0xff]   ;;  %v4631_v45 = vld [vmem:[#allocation11 + $0x130] sm:$0xff]  }
 0x2a8   :  { %v4629_v39 = vld [vmem:[#allocation11 + $0xe8] sm:$0xff]   ;;  %v4632_v47 = vld [vmem:[#allocation11 + $0xf0] sm:$0xff]   ;;  %v4634_v49 = vld [vmem:[#allocation11 + $0x138] sm:$0xff]  }
 0x2a9   :  { %v1166_v60 = vsel %vm1153_vm2, %v1142_v44, %v1160_v51  ;;  %vm1154_vm6 = vcmp.gt.f32.partialorder %v1145_v52, 0.0  ;;  %v1161_v62 = vmul.f32 %v5565_v38, %v1145_v52  ;;  %1444 = vmatmul.mubr.bf16.vlgmr.msra.gmra.mrb[24].mxu1 %v1204_v31  ;;  %v4630_v44 = vld [vmem:[#allocation11 + $0x160] sm:$0xff]   ;;  %v4633_v40 = vld [vmem:[#allocation11 + $0x168] sm:$0xff]   ;;  %v4637_v53 = vld [vmem:[#allocation11 + $0x178] sm:$0xff]  }
 0x2aa   :  { %v1172_v1 = vadd.f32 %v1166_v60, %v804_v59  ;;  %4775 = vmatprep.mubr.msk.bf16.mxu1 %vm5511_vm3, %v4774_v3  ;;  %3990 = vmatpush3.bf16.msra.mxu1 %v4615_v50  ;;  %v4635_v50 = vld [vmem:[#allocation11 + $0xf8] sm:$0xff]  }
 0x2ab   :  { %v1167_v5 = vsel %vm1154_vm6, %v1145_v52, %v1161_v62  ;;  %3991 = vmatprep.subr.bf16.mxu1 %v4616_v56  ;;  %v5639_v51 = vld [vmem:[#allocation2] sm:$0xff]  ;;  %v4636_v52 = vld [vmem:[#allocation11 + $0x170] sm:$0xff]  }
 0x2ac   :  { %v5618_v61 = vsel %vm5502_vm1, %v1172_v1, 0.0  ;;  %v1173_v6 = vadd.f32 %v1167_v5, %v807_v0  ;;  %v1199_v38 = vld [vmem:[#allocation2 + $0x12] sm:$0xff]  ;;  %v3674_v59 = vld [vmem:[#allocation10 + $0x1] ss:$0 sm:$0xff]  ;;  %v5644_v5 = vstv %s3699_s14 }
 0x2ad   :  { %1184 = vst [vmem:[#allocation2 + $0x28] sm:$0xff] %v5618_v61  ;;  %v1206_v63 = vpack.c.bf16 %v1199_v38, %v1198_v41  ;;  %v1188_v9 = vld [vmem:[#allocation2 + $0x16] sm:$0xff] }
 0x2ae   :  { %v5623_v42 = vsel %vm5517_vm4, %v1173_v6, 0.0  ;;  %v1189_v11 = vld [vmem:[#allocation2 + $0x1e] sm:$0xff]  ;;  %3992 = vmatpush3.bf16.msra.mxu1 %v4617_v4  ;;  %v4777_v14 = vpack.c.bf16 %v1173_v6, %v1172_v1 }
 0x2af   :  { %1185 = vst [vmem:[#allocation2 + $0x30] sm:$0xff] %v5623_v42  ;;  %4326 = vmatmul.mubr.bf16.vlgmr.msra.gmra.mrb[36].mxu0 %v1206_v63  ;;  %v1207_v13 = vpack.c.bf16 %v1189_v11, %v1188_v9  ;;  %v1200_v15 = vld [vmem:[#allocation2 + $0x1a] sm:$0xff]  ;;  %3993 = vmatprep.subr.bf16.mxu1 %v4619_v27 }
 0x2b0   :  { %4329 = vmatprep.mubr.msk.bf16.mxu0 %vm5128_vm0, %v5374_v22  ;;  %4338 = vmatpush3.bf16.msra.mxu0 %v4618_v8 }
 0x2b1   :  { %1452 = vmatmul.mubr.bf16.gmra.mrb[28].mxu1 %v1207_v13  ;;  %4339 = vmatprep.subr.bf16.mxu0 %v5374_v22 }
 0x2b2   :  { %4778 = vmatprep.mubr.msk.bf16.mxu1 %vm5532_vm10, %v4777_v14  ;;  %3994 = vmatpush3.bf16.msra.mxu1 %v4620_v28 }
 0x2b3   :  { %3995 = vmatprep.subr.bf16.mxu1 %v4622_v30 }
 0x2b4   :  { %v1201_v16 = vld [vmem:[#allocation2 + $0x22] sm:$0xff]  ;;  %4340 = vmatpush3.bf16.msra.mxu0 %v4621_v2 }
 0x2b5   :  { %v1209_v17 = vpack.c.bf16 %v1201_v16, %v1200_v15  ;;  %v1190_v18 = vld [vmem:[#allocation2 + $0x26] sm:$0xff]  ;;  %4341 = vmatprep.subr.bf16.mxu0 %v5374_v22 }
 0x2b6   :  { %v1191_v19 = vld [vmem:[#allocation2 + $0x2e] sm:$0xff]  ;;  %3996 = vmatpush3.bf16.msra.mxu1 %v4623_v32 }
 0x2b7   :  { %4330 = vmatmul.mubr.bf16.gmra.mrb[40].mxu0 %v1209_v17  ;;  %v1210_v20 = vpack.c.bf16 %v1191_v19, %v1190_v18  ;;  %v1202_v23 = vld [vmem:[#allocation2 + $0x2a] sm:$0xff]  ;;  %v1203_v25 = vld [vmem:[#allocation2 + $0x32] sm:$0xff]  ;;  %3997 = vmatprep.subr.bf16.mxu1 %v4625_v34 }
 0x2b8   :  { %4333 = vmatprep.mubr.msk.bf16.mxu0 %vm5128_vm0, %v5374_v22  ;;  %v1212_v26 = vpack.c.bf16 %v1203_v25, %v1202_v23  ;;  %4342 = vmatpush3.bf16.msra.mxu0 %v4624_v33 }
 0x2b9   :  { %1460 = vmatmul.mubr.bf16.gmra.mrb[32].mxu1 %v1210_v20  ;;  %4343 = vmatprep.subr.bf16.mxu0 %v5374_v22 }
 0x2ba   :  { %3998 = vmatpush3.bf16.msra.mxu1 %v4626_v35 }
 0x2bb   :  { %3999 = vmatprep.subr.bf16.mxu1 %v4628_v37 }
 0x2bc   :  { %4344 = vmatpush3.bf16.msra.mxu0 %v4627_v36 }
 0x2bd   :  { %4345 = vmatprep.subr.bf16.mxu0 %v5374_v22 }
 0x2be   :  { %4000 = vmatpush3.bf16.msra.mxu1 %v4629_v39 }
 0x2bf   :  { %4334 = vmatmul.mubr.bf16.gmra.mrb[44].mxu0 %v1212_v26  ;;  %4001 = vmatprep.subr.bf16.mxu1 %v4631_v45 }
 0x2c0   :  { %4353 = vmatprep.mubr.msk.bf16.mxu0 %vm5128_vm0, %v5374_v22  ;;  %4346 = vmatpush3.bf16.msra.mxu0 %v4630_v44 }
 0x2c1   :  { %4347 = vmatprep.subr.bf16.mxu0 %v5374_v22  ;;  %v4638_v22 = vld [vmem:[#allocation8 + $0x1c0] sm:$0xff]  }
 0x2c2   :  { %4002 = vmatpush3.bf16.msra.mxu1 %v4632_v47 }
 0x2c3   :  { %4003 = vmatprep.subr.bf16.mxu1 %v4634_v49 }
 0x2c4   :  { %4348 = vmatpush3.bf16.msra.mxu0 %v4633_v40 }
 0x2c5   :  { %4349 = vmatprep.subr.bf16.mxu0 %v5639_v51 }
 0x2c6   :  { %4004 = vmatpush3.bf16.msra.mxu1 %v4635_v50 }
 0x2c7   :  { %4034 = vmatprep.subr.bf16.mxu1 %v4638_v22 }
 0x2c8   :  { %4350 = vmatpush3.bf16.msra.mxu0 %v4636_v52 }
 0x2c9   :  { %4351 = vmatprep.subr.bf16.mxu0 %v5639_v51 }
 0x2cc   :  { %4352 = vmatpush3.bf16.msra.mxu0 %v4637_v53 }
 0x2cd   :  { %4365 = vmatprep.subr.bf16.mxu0 %v5639_v51 }
 0x37c   :  { %v3960_v31 = vpop.f32.mrb[24].mxu1 }
 0x37d   :  { %v3961_v56 = vpop.f32.mrb[25].mxu1 }
 0x37e   :  { %v3962_v60 = vadd.f32 %v3961_v56, %v3960_v31  ;;  %v3963_v62 = vpop.f32.mrb[26].mxu1 }
 0x37f   :  { %v3964_v0 = vpop.f32.mrb[27].mxu1 }
 0x380   :  { %v3965_v1 = vadd.f32 %v3964_v0, %v3963_v62  ;;  %v1446_v3 = vadd.f32 %v3962_v60, %v3674_v59 }
 0x382   :  { %v1502_v4 = vpop.f32.mrb[36].mxu0  ;;  %v1449_v6 = vadd.f32 %v3965_v1, %v3674_v59 }
 0x383   :  { %v1503_v41 = vadd.f32 %v1502_v4, %v1446_v3  ;;  %v4327_v38 = vpop.f32.mrb[37].mxu0  ;;  %v4639_v3 = vld [vmem:[#allocation8 + $0x180] sm:$0xff]  }
 0x384   :  { %v1505_v8 = vpop.f32.mrb[38].mxu0  ;;  %v3966_v63 = vpop.f32.mrb[28].mxu1  ;;  %v4640_v38 = vld [vmem:[#allocation8 + $0x1c8] sm:$0xff]  }
 0x385   :  { %vm1526_vm11 = vcmp.gt.f32.partialorder %v1503_v41, 0.0  ;;  %v1533_v9 = vmul.f32 %v5644_v5, %v1503_v41  ;;  %v1506_v11 = vadd.f32 %v1505_v8, %v1449_v6  ;;  %v4328_v13 = vpop.f32.mrb[39].mxu0  ;;  %v3967_v14 = vpop.f32.mrb[29].mxu1 }
 0x386   :  { %v3968_v15 = vadd.f32 %v3967_v14, %v3966_v63  ;;  %v3969_v16 = vpop.f32.mrb[30].mxu1 }
 0x387   :  { %v1539_v17 = vsel %vm1526_vm11, %v1503_v41, %v1533_v9  ;;  %vm1527_vm12 = vcmp.gt.f32.partialorder %v1506_v11, 0.0  ;;  %v1534_v18 = vmul.f32 %v5644_v5, %v1506_v11  ;;  %v3970_v19 = vpop.f32.mrb[31].mxu1 }
 0x388   :  { %v1545_v20 = vsel %vm5423_vm8, %v1539_v17, 0.0  ;;  %v3971_v23 = vadd.f32 %v3970_v19, %v3969_v16  ;;  %v1454_v25 = vadd.f32 %v3968_v15, %v3674_v59 }
 0x389   :  { %1551 = vst [vmem:[#allocation3 + $0x8] sm:$0xff] %v1545_v20  ;;  %v1540_v26 = vsel %vm1527_vm12, %v1506_v11, %v1534_v18 }
 0x38a   :  { %v1546_v27 = vsel %vm5431_vm14, %v1540_v26, 0.0  ;;  %v1510_v28 = vpop.f32.mrb[40].mxu0  ;;  %v1457_v2 = vadd.f32 %v3971_v23, %v3674_v59  ;;  %v4780_v44 = vpack.c.bf16 %v1540_v26, %v1539_v17 }
 0x38b   :  { %1552 = vst [vmem:[#allocation3 + $0x10] sm:$0xff] %v1546_v27  ;;  %v1511_v30 = vadd.f32 %v1510_v28, %v1454_v25  ;;  %v4331_v32 = vpop.f32.mrb[41].mxu0 }
 0x38c   :  { %v1513_v33 = vpop.f32.mrb[42].mxu0  ;;  %v3972_v34 = vpop.f32.mrb[32].mxu1  ;;  %4781 = vmatprep.mubr.msk.bf16.mxu1 %vm5469_vm7, %v4780_v44  ;;  %v4643_v44 = vld [vmem:[#allocation8 + $0x1d0] sm:$0xff]  }
 0x38d   :  { %vm1528_vm13 = vcmp.gt.f32.partialorder %v1511_v30, 0.0  ;;  %v1535_v35 = vmul.f32 %v5644_v5, %v1511_v30  ;;  %v1514_v36 = vadd.f32 %v1513_v33, %v1457_v2  ;;  %v4332_v37 = vpop.f32.mrb[43].mxu0  ;;  %v3973_v39 = vpop.f32.mrb[33].mxu1 }
 0x38e   :  { %v3974_v45 = vadd.f32 %v3973_v39, %v3972_v34  ;;  %v3975_v47 = vpop.f32.mrb[34].mxu1  ;;  %v4641_v37 = vld [vmem:[#allocation8 + $0x188] sm:$0xff]   ;;  %v4642_v39 = vld [vmem:[#allocation8 + $0x200] sm:$0xff]  }
 0x38f   :  { %v1541_v40 = vsel %vm1528_vm13, %v1511_v30, %v1535_v35  ;;  %vm1529_vm15 = vcmp.gt.f32.partialorder %v1514_v36, 0.0  ;;  %v1536_v49 = vmul.f32 %v5644_v5, %v1514_v36  ;;  %v3976_v50 = vpop.f32.mrb[35].mxu1 }
 0x390   :  { %v1547_v52 = vsel %vm5460_vm5, %v1541_v40, 0.0  ;;  %v3977_v53 = vadd.f32 %v3976_v50, %v3975_v47  ;;  %v1462_v22 = vadd.f32 %v3974_v45, %v3674_v59  ;;  %v1563_v0 = vld [vmem:[#allocation3 + $0x6] sm:$0xff]  ;;  %v4644_v45 = vld [vmem:[#allocation8 + $0x190] sm:$0xff]  }
 0x391   :  { %1553 = vst [vmem:[#allocation3 + $0x18] sm:$0xff] %v1547_v52  ;;  %v1542_v31 = vsel %vm1529_vm15, %v1514_v36, %v1536_v49  ;;  %v4645_v47 = vld [vmem:[#allocation8 + $0x208] sm:$0xff]   ;;  %v4647_v49 = vld [vmem:[#allocation8 + $0x198] sm:$0xff]   ;;  %v4648_v50 = vld [vmem:[#allocation8 + $0x210] sm:$0xff]  }
 0x392   :  { %v1548_v56 = vsel %vm5475_vm9, %v1542_v31, 0.0  ;;  %v1518_v60 = vpop.f32.mrb[44].mxu0  ;;  %v1465_v62 = vadd.f32 %v3977_v53, %v3674_v59  ;;  %v1564_v1 = vld [vmem:[#allocation3 + $0xe] sm:$0xff]  ;;  %v4783_v13 = vpack.c.bf16 %v1542_v31, %v1541_v40  ;;  %v4646_v40 = vld [vmem:[#allocation8 + $0x1d8] sm:$0xff]   ;;  %v4649_v52 = vld [vmem:[#allocation8 + $0x1e0] sm:$0xff]  }
 0x393   :  { %1554 = vst [vmem:[#allocation3 + $0x20] sm:$0xff] %v1548_v56  ;;  %v1519_v4 = vadd.f32 %v1518_v60, %v1462_v22  ;;  %v4335_v6 = vpop.f32.mrb[45].mxu0  ;;  %v1581_v41 = vpack.c.bf16 %v1564_v1, %v1563_v0  ;;  %v1575_v16 = vld [vmem:[#allocation3 + $0xa] sm:$0xff]  ;;  %v4650_v53 = vld [vmem:[#allocation8 + $0x1a0] sm:$0xff]   ;;  %v4651_v22 = vld [vmem:[#allocation8 + $0x218] sm:$0xff]  }
 0x394   :  { %v1521_v8 = vpop.f32.mrb[46].mxu0  ;;  %v4652_v31 = vld [vmem:[#allocation8 + $0x1e8] sm:$0xff]   ;;  %v4654_v60 = vld [vmem:[#allocation8 + $0x220] sm:$0xff]   ;;  %v4656_v0 = vld [vmem:[#allocation8 + $0x1b0] sm:$0xff]  }
 0x395   :  { %vm1530_vm2 = vcmp.gt.f32.partialorder %v1519_v4, 0.0  ;;  %v1537_v63 = vmul.f32 %v5644_v5, %v1519_v4  ;;  %v1522_v9 = vadd.f32 %v1521_v8, %v1465_v62  ;;  %v4336_v11 = vpop.f32.mrb[47].mxu0  ;;  %1821 = vmatmul.mubr.bf16.vlgmr.msra.gmra.mrb[36].mxu1 %v1581_v41  ;;  %v4653_v56 = vld [vmem:[#allocation8 + $0x1a8] sm:$0xff]   ;;  %v4655_v62 = vld [vmem:[#allocation8 + $0x1f0] sm:$0xff]   ;;  %v4661_v41 = vld [vmem:[#allocation8 + $0x238] sm:$0xff]  }
 0x396   :  { %4784 = vmatprep.mubr.msk.bf16.mxu1 %vm5511_vm3, %v4783_v13  ;;  %4035 = vmatpush3.bf16.msra.mxu1 %v4639_v3  ;;  %v4657_v1 = vld [vmem:[#allocation8 + $0x228] sm:$0xff]   ;;  %v4658_v3 = vld [vmem:[#allocation8 + $0x1f8] sm:$0xff]   ;;  %v4660_v6 = vld [vmem:[#allocation8 + $0x230] sm:$0xff]  }
 0x397   :  { %v1543_v59 = vsel %vm1530_vm2, %v1519_v4, %v1537_v63  ;;  %vm1531_vm6 = vcmp.gt.f32.partialorder %v1522_v9, 0.0  ;;  %v1538_v14 = vmul.f32 %v5644_v5, %v1522_v9  ;;  %4036 = vmatprep.subr.bf16.mxu1 %v4640_v38  ;;  %v4659_v4 = vld [vmem:[#allocation8 + $0x1b8] sm:$0xff]   ;;  %v4662_v38 = vld [vmem:[#allocation11 + $0x1c0] sm:$0xff]  }
 0x398   :  { %v1549_v15 = vsel %vm5502_vm1, %v1543_v59, 0.0  ;;  %v1576_v17 = vld [vmem:[#allocation3 + $0x12] sm:$0xff] }
 0x399   :  { %1555 = vst [vmem:[#allocation3 + $0x28] sm:$0xff] %v1549_v15  ;;  %v1544_v18 = vsel %vm1531_vm6, %v1522_v9, %v1538_v14  ;;  %v1583_v19 = vpack.c.bf16 %v1576_v17, %v1575_v16  ;;  %v1565_v23 = vld [vmem:[#allocation3 + $0x16] sm:$0xff]  ;;  %v3700_v9 = vld [vmem:[#allocation13 + $0x1] ss:$0 sm:$0xff]  ;;  %v5684_v17 = vstv %s3725_s4 }
 0x39a   :  { %v1550_v20 = vsel %vm5517_vm4, %v1544_v18, 0.0  ;;  %v1566_v25 = vld [vmem:[#allocation3 + $0x1e] sm:$0xff]  ;;  %v4786_v5 = vpack.c.bf16 %v1544_v18, %v1543_v59  ;;  %4037 = vmatpush3.bf16.msra.mxu1 %v4641_v37 }
 0x39b   :  { %1556 = vst [vmem:[#allocation3 + $0x30] sm:$0xff] %v1550_v20  ;;  %4354 = vmatmul.mubr.bf16.vlgmr.msra.gmra.mrb[48].mxu0 %v1583_v19  ;;  %v1584_v26 = vpack.c.bf16 %v1566_v25, %v1565_v23  ;;  %v1577_v27 = vld [vmem:[#allocation3 + $0x1a] sm:$0xff]  ;;  %4038 = vmatprep.subr.bf16.mxu1 %v4643_v44 }
 0x39c   :  { %4357 = vmatprep.mubr.msk.bf16.mxu0 %vm5128_vm0, %v5639_v51  ;;  %4366 = vmatpush3.bf16.msra.mxu0 %v4642_v39 }
 0x39d   :  { %1829 = vmatmul.mubr.bf16.gmra.mrb[40].mxu1 %v1584_v26  ;;  %4367 = vmatprep.subr.bf16.mxu0 %v5639_v51 }
 0x39e   :  { %4787 = vmatprep.mubr.msk.bf16.mxu1 %vm5532_vm10, %v4786_v5  ;;  %4039 = vmatpush3.bf16.msra.mxu1 %v4644_v45 }
 0x39f   :  { %4040 = vmatprep.subr.bf16.mxu1 %v4646_v40 }
 0x3a0   :  { %v1578_v28 = vld [vmem:[#allocation3 + $0x22] sm:$0xff]  ;;  %4368 = vmatpush3.bf16.msra.mxu0 %v4645_v47 }
 0x3a1   :  { %v1586_v2 = vpack.c.bf16 %v1578_v28, %v1577_v27  ;;  %v1567_v30 = vld [vmem:[#allocation3 + $0x26] sm:$0xff]  ;;  %4369 = vmatprep.subr.bf16.mxu0 %v5639_v51 }
 0x3a2   :  { %v1568_v32 = vld [vmem:[#allocation3 + $0x2e] sm:$0xff]  ;;  %4041 = vmatpush3.bf16.msra.mxu1 %v4647_v49 }
 0x3a3   :  { %4358 = vmatmul.mubr.bf16.gmra.mrb[52].mxu0 %v1586_v2  ;;  %v1587_v33 = vpack.c.bf16 %v1568_v32, %v1567_v30  ;;  %v1579_v34 = vld [vmem:[#allocation3 + $0x2a] sm:$0xff]  ;;  %v1580_v35 = vld [vmem:[#allocation3 + $0x32] sm:$0xff]  ;;  %4042 = vmatprep.subr.bf16.mxu1 %v4649_v52 }
 0x3a4   :  { %4361 = vmatprep.mubr.msk.bf16.mxu0 %vm5128_vm0, %v5639_v51  ;;  %v1589_v36 = vpack.c.bf16 %v1580_v35, %v1579_v34  ;;  %4370 = vmatpush3.bf16.msra.mxu0 %v4648_v50 }
 0x3a5   :  { %1837 = vmatmul.mubr.bf16.gmra.mrb[44].mxu1 %v1587_v33  ;;  %4371 = vmatprep.subr.bf16.mxu0 %v5639_v51 }
 0x3a6   :  { %4043 = vmatpush3.bf16.msra.mxu1 %v4650_v53 }
 0x3a7   :  { %4044 = vmatprep.subr.bf16.mxu1 %v4652_v31 }
 0x3a8   :  { %4372 = vmatpush3.bf16.msra.mxu0 %v4651_v22 }
 0x3a9   :  { %4373 = vmatprep.subr.bf16.mxu0 %v5639_v51 }
 0x3aa   :  { %4045 = vmatpush3.bf16.msra.mxu1 %v4653_v56 }
 0x3ab   :  { %4362 = vmatmul.mubr.bf16.gmra.mrb[56].mxu0 %v1589_v36  ;;  %4046 = vmatprep.subr.bf16.mxu1 %v4655_v62 }
 0x3ac   :  { %4381 = vmatprep.mubr.msk.bf16.mxu0 %vm5128_vm0, %v5639_v51  ;;  %4374 = vmatpush3.bf16.msra.mxu0 %v4654_v60 }
 0x3ad   :  { %4375 = vmatprep.subr.bf16.mxu0 %v5639_v51 }
 0x3ae   :  { %4047 = vmatpush3.bf16.msra.mxu1 %v4656_v0 }
 0x3af   :  { %4048 = vmatprep.subr.bf16.mxu1 %v4658_v3 }
 0x3b0   :  { %4376 = vmatpush3.bf16.msra.mxu0 %v4657_v1 }
 0x3b1   :  { %4377 = vmatprep.subr.bf16.mxu0 %v5639_v51 }
 0x3b2   :  { %4049 = vmatpush3.bf16.msra.mxu1 %v4659_v4 }
 0x3b3   :  { %4079 = vmatprep.subr.bf16.mxu1 %v4662_v38 }
 0x3b4   :  { %4378 = vmatpush3.bf16.msra.mxu0 %v4660_v6 }
 0x3b5   :  { %4379 = vmatprep.subr.bf16.mxu0 %v5639_v51 }
 0x3b8   :  { %4380 = vmatpush3.bf16.msra.mxu0 %v4661_v41 }
 0x3b9   :  { %4393 = vmatprep.subr.bf16.mxu0 %v5639_v51 }
 0x468   :  { %v4005_v8 = vpop.f32.mrb[36].mxu1 }
 0x469   :  { %v4006_v63 = vpop.f32.mrb[37].mxu1 }
 0x46a   :  { %v4007_v11 = vadd.f32 %v4006_v63, %v4005_v8  ;;  %v4008_v13 = vpop.f32.mrb[38].mxu1 }
 0x46b   :  { %v4009_v59 = vpop.f32.mrb[39].mxu1 }
 0x46c   :  { %v4010_v14 = vadd.f32 %v4009_v59, %v4008_v13  ;;  %v1823_v15 = vadd.f32 %v4007_v11, %v3700_v9 }
 0x46e   :  { %v1879_v16 = vpop.f32.mrb[48].mxu0  ;;  %v1826_v18 = vadd.f32 %v4010_v14, %v3700_v9 }
 0x46f   :  { %v1880_v19 = vadd.f32 %v1879_v16, %v1823_v15  ;;  %v4355_v20 = vpop.f32.mrb[49].mxu0 }
 0x470   :  { %v1882_v23 = vpop.f32.mrb[50].mxu0  ;;  %v4011_v25 = vpop.f32.mrb[40].mxu1  ;;  %v4663_v20 = vld [vmem:[#allocation11 + $0x180] sm:$0xff]  }
 0x471   :  { %vm1903_vm11 = vcmp.gt.f32.partialorder %v1880_v19, 0.0  ;;  %v1910_v26 = vmul.f32 %v5684_v17, %v1880_v19  ;;  %v1883_v5 = vadd.f32 %v1882_v23, %v1826_v18  ;;  %v4356_v27 = vpop.f32.mrb[51].mxu0  ;;  %v4012_v28 = vpop.f32.mrb[41].mxu1 }
 0x472   :  { %v4013_v2 = vadd.f32 %v4012_v28, %v4011_v25  ;;  %v4014_v30 = vpop.f32.mrb[42].mxu1 }
 0x473   :  { %v1916_v32 = vsel %vm1903_vm11, %v1880_v19, %v1910_v26  ;;  %vm1904_vm12 = vcmp.gt.f32.partialorder %v1883_v5, 0.0  ;;  %v1911_v33 = vmul.f32 %v5684_v17, %v1883_v5  ;;  %v4015_v34 = vpop.f32.mrb[43].mxu1  ;;  %v4664_v26 = vld [vmem:[#allocation11 + $0x1c8] sm:$0xff]  }
 0x474   :  { %v1922_v35 = vadd.f32 %v1916_v32, %v5579_v7  ;;  %v4016_v36 = vadd.f32 %v4015_v34, %v4014_v30  ;;  %v1831_v37 = vadd.f32 %v4013_v2, %v3700_v9  ;;  %v4665_v30 = vld [vmem:[#allocation11 + $0x188] sm:$0xff]  }
 0x475   :  { %v1917_v39 = vsel %vm1904_vm12, %v1883_v5, %v1911_v33 }
 0x476   :  { %v5691_v44 = vsel %vm5423_vm8, %v1922_v35, 0.0  ;;  %v1923_v45 = vadd.f32 %v1917_v39, %v5585_v46  ;;  %v1887_v47 = vpop.f32.mrb[52].mxu0  ;;  %v1834_v40 = vadd.f32 %v4016_v36, %v3700_v9  ;;  %v4666_v36 = vld [vmem:[#allocation11 + $0x200] sm:$0xff]  }
 0x477   :  { %1934 = vst [vmem:[#allocation2 + $0x8] sm:$0xff] %v5691_v44  ;;  %v1888_v49 = vadd.f32 %v1887_v47, %v1831_v37  ;;  %v4359_v50 = vpop.f32.mrb[53].mxu0 }
 0x478   :  { %v5697_v52 = vsel %vm5431_vm14, %v1923_v45, 0.0  ;;  %v1890_v7 = vpop.f32.mrb[54].mxu0  ;;  %v4017_v53 = vpop.f32.mrb[44].mxu1  ;;  %v4789_v4 = vpack.c.bf16 %v1923_v45, %v1922_v35 }
 0x479   :  { %1935 = vst [vmem:[#allocation2 + $0x10] sm:$0xff] %v5697_v52  ;;  %vm1905_vm13 = vcmp.gt.f32.partialorder %v1888_v49, 0.0  ;;  %v1912_v22 = vmul.f32 %v5684_v17, %v1888_v49  ;;  %v1891_v31 = vadd.f32 %v1890_v7, %v1834_v40  ;;  %v4360_v56 = vpop.f32.mrb[55].mxu0  ;;  %v4018_v46 = vpop.f32.mrb[45].mxu1 }
 0x47a   :  { %v4019_v60 = vadd.f32 %v4018_v46, %v4017_v53  ;;  %v4020_v62 = vpop.f32.mrb[46].mxu1  ;;  %4790 = vmatprep.mubr.msk.bf16.mxu1 %vm5469_vm7, %v4789_v4  ;;  %v4667_v53 = vld [vmem:[#allocation11 + $0x1d0] sm:$0xff]   ;;  %v4670_v56 = vld [vmem:[#allocation11 + $0x1d8] sm:$0xff]   ;;  %v4677_v4 = vld [vmem:[#allocation11 + $0x1a8] sm:$0xff]  }
 0x47b   :  { %v1918_v0 = vsel %vm1905_vm13, %v1888_v49, %v1912_v22  ;;  %vm1906_vm15 = vcmp.gt.f32.partialorder %v1891_v31, 0.0  ;;  %v1913_v1 = vmul.f32 %v5684_v17, %v1891_v31  ;;  %v4021_v3 = vpop.f32.mrb[47].mxu1  ;;  %v4668_v22 = vld [vmem:[#allocation11 + $0x190] sm:$0xff]   ;;  %v4671_v46 = vld [vmem:[#allocation11 + $0x198] sm:$0xff]  }
 0x47c   :  { %v1924_v6 = vadd.f32 %v1918_v0, %v5599_v55  ;;  %v4022_v41 = vadd.f32 %v4021_v3, %v4020_v62  ;;  %v1839_v38 = vadd.f32 %v4019_v60, %v3700_v9  ;;  %v4672_v60 = vld [vmem:[#allocation11 + $0x210] sm:$0xff]   ;;  %v4673_v62 = vld [vmem:[#allocation11 + $0x1e0] sm:$0xff]   ;;  %v4676_v3 = vld [vmem:[#allocation11 + $0x1e8] sm:$0xff]  }
 0x47d   :  { %v1919_v8 = vsel %vm1906_vm15, %v1891_v31, %v1913_v1  ;;  %v4669_v31 = vld [vmem:[#allocation11 + $0x208] sm:$0xff]   ;;  %v4674_v0 = vld [vmem:[#allocation11 + $0x1a0] sm:$0xff]   ;;  %v4675_v1 = vld [vmem:[#allocation11 + $0x218] sm:$0xff]  }
 0x47e   :  { %v5707_v63 = vsel %vm5460_vm5, %v1924_v6, 0.0  ;;  %v1925_v11 = vadd.f32 %v1919_v8, %v5605_v57  ;;  %v1895_v13 = vpop.f32.mrb[56].mxu0  ;;  %v1842_v59 = vadd.f32 %v4022_v41, %v3700_v9  ;;  %v1940_v18 = vld [vmem:[#allocation2 + $0x4] sm:$0xff]  ;;  %v4679_v41 = vld [vmem:[#allocation11 + $0x1f0] sm:$0xff]   ;;  %v4681_v8 = vld [vmem:[#allocation11 + $0x228] sm:$0xff]  }
 0x47f   :  { %1936 = vst [vmem:[#allocation2 + $0x18] sm:$0xff] %v5707_v63  ;;  %v1896_v14 = vadd.f32 %v1895_v13, %v1839_v38  ;;  %v4363_v15 = vpop.f32.mrb[57].mxu0  ;;  %v4680_v38 = vld [vmem:[#allocation11 + $0x1b0] sm:$0xff]   ;;  %v4683_v13 = vld [vmem:[#allocation11 + $0x1b8] sm:$0xff]  }
 0x480   :  { %v5713_v16 = vsel %vm5475_vm9, %v1925_v11, 0.0  ;;  %v1898_v55 = vpop.f32.mrb[58].mxu0  ;;  %v1941_v19 = vld [vmem:[#allocation2 + $0xc] sm:$0xff]  ;;  %v4792_v2 = vpack.c.bf16 %v1925_v11, %v1924_v6  ;;  %v4678_v6 = vld [vmem:[#allocation11 + $0x220] sm:$0xff]   ;;  %v4682_v11 = vld [vmem:[#allocation11 + $0x1f8] sm:$0xff]  }
 0x481   :  { %1937 = vst [vmem:[#allocation2 + $0x20] sm:$0xff] %v5713_v16  ;;  %vm1907_vm2 = vcmp.gt.f32.partialorder %v1896_v14, 0.0  ;;  %v1914_v23 = vmul.f32 %v5684_v17, %v1896_v14  ;;  %v1899_v57 = vadd.f32 %v1898_v55, %v1842_v59  ;;  %v4364_v25 = vpop.f32.mrb[59].mxu0  ;;  %v1953_v9 = vpack.c.bf16 %v1941_v19, %v1940_v18  ;;  %v4684_v59 = vld [vmem:[#allocation11 + $0x230] sm:$0xff]   ;;  %v4686_v15 = vld [vmem:[#allocation8 + $0x280] sm:$0xff]  }
 0x483   :  { %v1920_v5 = vsel %vm1907_vm2, %v1896_v14, %v1914_v23  ;;  %vm1908_vm6 = vcmp.gt.f32.partialorder %v1899_v57, 0.0  ;;  %v1915_v27 = vmul.f32 %v5684_v17, %v1899_v57  ;;  %2193 = vmatmul.mubr.bf16.vlgmr.msra.gmra.mrb[48].mxu1 %v1953_v9  ;;  %v4685_v14 = vld [vmem:[#allocation11 + $0x238] sm:$0xff]  }
 0x484   :  { %v1926_v28 = vadd.f32 %v1920_v5, %v5618_v61  ;;  %4793 = vmatprep.mubr.msk.bf16.mxu1 %vm5511_vm3, %v4792_v2  ;;  %4080 = vmatpush3.bf16.msra.mxu1 %v4663_v20  ;;  %v5748_v5 = vstv %s3751_s1 }
 0x485   :  { %v1921_v32 = vsel %vm1908_vm6, %v1899_v57, %v1915_v27  ;;  %4081 = vmatprep.subr.bf16.mxu1 %v4664_v26 }
 0x486   :  { %v5723_v33 = vsel %vm5502_vm1, %v1926_v28, 0.0  ;;  %v1927_v34 = vadd.f32 %v1921_v32, %v5623_v42  ;;  %v1942_v35 = vld [vmem:[#allocation2 + $0x14] sm:$0xff] }
 0x487   :  { %1938 = vst [vmem:[#allocation2 + $0x28] sm:$0xff] %v5723_v33  ;;  %v1955_v17 = vpack.c.bf16 %v1942_v35, %v1941_v19  ;;  %v3726_v19 = vld [vmem:[#allocation10 + $0x2] ss:$0 sm:$0xff] }
 0x488   :  { %v5729_v61 = vsel %vm5517_vm4, %v1927_v34, 0.0  ;;  %v1943_v37 = vld [vmem:[#allocation2 + $0x1c] sm:$0xff]  ;;  %4082 = vmatpush3.bf16.msra.mxu1 %v4665_v30  ;;  %v4795_v42 = vpack.c.bf16 %v1927_v34, %v1926_v28 }
 0x489   :  { %1939 = vst [vmem:[#allocation2 + $0x30] sm:$0xff] %v5729_v61  ;;  %4382 = vmatmul.mubr.bf16.vlgmr.msra.gmra.mrb[60].mxu0 %v1955_v17  ;;  %v1956_v39 = vpack.c.bf16 %v1943_v37, %v1942_v35  ;;  %4083 = vmatprep.subr.bf16.mxu1 %v4667_v53 }
 0x48a   :  { %4385 = vmatprep.mubr.msk.bf16.mxu0 %vm5128_vm0, %v5639_v51  ;;  %4394 = vmatpush3.bf16.msra.mxu0 %v4666_v36 }
 0x48b   :  { %2201 = vmatmul.mubr.bf16.gmra.mrb[52].mxu1 %v1956_v39  ;;  %4395 = vmatprep.subr.bf16.mxu0 %v5639_v51 }
 0x48c   :  { %4796 = vmatprep.mubr.msk.bf16.mxu1 %vm5532_vm10, %v4795_v42  ;;  %4084 = vmatpush3.bf16.msra.mxu1 %v4668_v22 }
 0x48d   :  { %4085 = vmatprep.subr.bf16.mxu1 %v4670_v56 }
 0x48e   :  { %v1944_v45 = vld [vmem:[#allocation2 + $0x24] sm:$0xff]  ;;  %4396 = vmatpush3.bf16.msra.mxu0 %v4669_v31 }
 0x48f   :  { %v1958_v47 = vpack.c.bf16 %v1944_v45, %v1943_v37  ;;  %4397 = vmatprep.subr.bf16.mxu0 %v5639_v51 }
 0x490   :  { %v1945_v40 = vld [vmem:[#allocation2 + $0x2c] sm:$0xff]  ;;  %v1952_v50 = vld [vmem:[#allocation2 + $0x34] sm:$0xff]  ;;  %4086 = vmatpush3.bf16.msra.mxu1 %v4671_v46 }
 0x491   :  { %4386 = vmatmul.mubr.bf16.gmra.mrb[64].mxu0 %v1958_v47  ;;  %v1959_v49 = vpack.c.bf16 %v1945_v40, %v1944_v45  ;;  %v1961_v7 = vpack.c.bf16 %v1952_v50, %v1945_v40  ;;  %4087 = vmatprep.subr.bf16.mxu1 %v4673_v62 }
 0x492   :  { %4389 = vmatprep.mubr.msk.bf16.mxu0 %vm5128_vm0, %v5639_v51  ;;  %4398 = vmatpush3.bf16.msra.mxu0 %v4672_v60 }
 0x493   :  { %2209 = vmatmul.mubr.bf16.gmra.mrb[56].mxu1 %v1959_v49  ;;  %4399 = vmatprep.subr.bf16.mxu0 %v5639_v51 }
 0x494   :  { %4088 = vmatpush3.bf16.msra.mxu1 %v4674_v0 }
 0x495   :  { %4089 = vmatprep.subr.bf16.mxu1 %v4676_v3 }
 0x496   :  { %4400 = vmatpush3.bf16.msra.mxu0 %v4675_v1 }
 0x497   :  { %4401 = vmatprep.subr.bf16.mxu0 %v5639_v51 }
 0x498   :  { %4090 = vmatpush3.bf16.msra.mxu1 %v4677_v4 }
 0x499   :  { %4390 = vmatmul.mubr.bf16.gmra.mrb[68].mxu0 %v1961_v7  ;;  %4091 = vmatprep.subr.bf16.mxu1 %v4679_v41 }
 0x49a   :  { %4409 = vmatprep.mubr.msk.bf16.mxu0 %vm5128_vm0, %v5639_v51  ;;  %4402 = vmatpush3.bf16.msra.mxu0 %v4678_v6 }
 0x49b   :  { %4403 = vmatprep.subr.bf16.mxu0 %v5639_v51 }
 0x49c   :  { %4092 = vmatpush3.bf16.msra.mxu1 %v4680_v38 }
 0x49d   :  { %4093 = vmatprep.subr.bf16.mxu1 %v4682_v11 }
 0x49e   :  { %4404 = vmatpush3.bf16.msra.mxu0 %v4681_v8 }
 0x49f   :  { %4405 = vmatprep.subr.bf16.mxu0 %v5639_v51 }
 0x4a0   :  { %4094 = vmatpush3.bf16.msra.mxu1 %v4683_v13 }
 0x4a1   :  { %4124 = vmatprep.subr.bf16.mxu1 %v4686_v15 }
 0x4a2   :  { %4406 = vmatpush3.bf16.msra.mxu0 %v4684_v59 }
 0x4a3   :  { %4407 = vmatprep.subr.bf16.mxu0 %v5639_v51 }
 0x4a6   :  { %4408 = vmatpush3.bf16.msra.mxu0 %v4685_v14 }
 0x4a7   :  { %4421 = vmatprep.subr.bf16.mxu0 %v5639_v51 }
 0x556   :  { %v4050_v55 = vpop.f32.mrb[48].mxu1 }
 0x557   :  { %v4051_v18 = vpop.f32.mrb[49].mxu1 }
 0x558   :  { %v4052_v20 = vadd.f32 %v4051_v18, %v4050_v55  ;;  %v4053_v23 = vpop.f32.mrb[50].mxu1 }
 0x559   :  { %v4054_v57 = vpop.f32.mrb[51].mxu1 }
 0x55a   :  { %v4055_v25 = vadd.f32 %v4054_v57, %v4053_v23  ;;  %v2195_v9 = vadd.f32 %v4052_v20, %v3726_v19 }
 0x55c   :  { %v2251_v26 = vpop.f32.mrb[60].mxu0  ;;  %v2198_v27 = vadd.f32 %v4055_v25, %v3726_v19 }
 0x55d   :  { %v2252_v28 = vadd.f32 %v2251_v26, %v2195_v9  ;;  %v4383_v2 = vpop.f32.mrb[61].mxu0  ;;  %v4687_v9 = vld [vmem:[#allocation8 + $0x240] sm:$0xff]  }
 0x55e   :  { %v2254_v30 = vpop.f32.mrb[62].mxu0  ;;  %v4056_v32 = vpop.f32.mrb[52].mxu1  ;;  %v4688_v2 = vld [vmem:[#allocation8 + $0x288] sm:$0xff]  }
 0x55f   :  { %vm2275_vm11 = vcmp.gt.f32.partialorder %v2252_v28, 0.0  ;;  %v2282_v34 = vmul.f32 %v5748_v5, %v2252_v28  ;;  %v2255_v35 = vadd.f32 %v2254_v30, %v2198_v27  ;;  %v4384_v36 = vpop.f32.mrb[63].mxu0  ;;  %v4057_v17 = vpop.f32.mrb[53].mxu1 }
 0x560   :  { %v4058_v37 = vadd.f32 %v4057_v17, %v4056_v32  ;;  %v4059_v39 = vpop.f32.mrb[54].mxu1 }
 0x561   :  { %v2288_v42 = vsel %vm2275_vm11, %v2252_v28, %v2282_v34  ;;  %vm2276_vm12 = vcmp.gt.f32.partialorder %v2255_v35, 0.0  ;;  %v2283_v45 = vmul.f32 %v5748_v5, %v2255_v35  ;;  %v4060_v47 = vpop.f32.mrb[55].mxu1 }
 0x562   :  { %v2294_v40 = vsel %vm5423_vm8, %v2288_v42, 0.0  ;;  %v4061_v49 = vadd.f32 %v4060_v47, %v4059_v39  ;;  %v2203_v50 = vadd.f32 %v4058_v37, %v3726_v19 }
 0x563   :  { %2300 = vst [vmem:[#allocation3 + $0x8] sm:$0xff] %v2294_v40  ;;  %v2289_v7 = vsel %vm2276_vm12, %v2255_v35, %v2283_v45 }
 0x564   :  { %v2295_v53 = vsel %vm5431_vm14, %v2289_v7, 0.0  ;;  %v2259_v22 = vpop.f32.mrb[64].mxu0  ;;  %v2206_v31 = vadd.f32 %v4061_v49, %v3726_v19  ;;  %v4798_v6 = vpack.c.bf16 %v2289_v7, %v2288_v42 }
 0x565   :  { %2301 = vst [vmem:[#allocation3 + $0x10] sm:$0xff] %v2295_v53  ;;  %v2260_v56 = vadd.f32 %v2259_v22, %v2203_v50  ;;  %v4387_v46 = vpop.f32.mrb[65].mxu0 }
 0x566   :  { %v2262_v60 = vpop.f32.mrb[66].mxu0  ;;  %v4062_v62 = vpop.f32.mrb[56].mxu1  ;;  %4799 = vmatprep.mubr.msk.bf16.mxu1 %vm5469_vm7, %v4798_v6  ;;  %v4689_v46 = vld [vmem:[#allocation8 + $0x248] sm:$0xff]   ;;  %v4696_v6 = vld [vmem:[#allocation8 + $0x2d0] sm:$0xff]  }
 0x567   :  { %vm2277_vm13 = vcmp.gt.f32.partialorder %v2260_v56, 0.0  ;;  %v2284_v0 = vmul.f32 %v5748_v5, %v2260_v56  ;;  %v2263_v1 = vadd.f32 %v2262_v60, %v2206_v31  ;;  %v4388_v3 = vpop.f32.mrb[67].mxu0  ;;  %v4063_v4 = vpop.f32.mrb[57].mxu1  ;;  %v4690_v60 = vld [vmem:[#allocation8 + $0x2c0] sm:$0xff]  }
 0x568   :  { %v4064_v41 = vadd.f32 %v4063_v4, %v4062_v62  ;;  %v4065_v38 = vpop.f32.mrb[58].mxu1  ;;  %v4691_v62 = vld [vmem:[#allocation8 + $0x290] sm:$0xff]   ;;  %v4694_v3 = vld [vmem:[#allocation8 + $0x298] sm:$0xff]  }
 0x569   :  { %v2290_v8 = vsel %vm2277_vm13, %v2260_v56, %v2284_v0  ;;  %vm2278_vm15 = vcmp.gt.f32.partialorder %v2263_v1, 0.0  ;;  %v2285_v11 = vmul.f32 %v5748_v5, %v2263_v1  ;;  %v4066_v13 = vpop.f32.mrb[59].mxu1  ;;  %v4692_v0 = vld [vmem:[#allocation8 + $0x250] sm:$0xff]   ;;  %v4695_v4 = vld [vmem:[#allocation8 + $0x258] sm:$0xff]  }
 0x56a   :  { %v2296_v59 = vsel %vm5460_vm5, %v2290_v8, 0.0  ;;  %v4067_v14 = vadd.f32 %v4066_v13, %v4065_v38  ;;  %v2211_v15 = vadd.f32 %v4064_v41, %v3726_v19  ;;  %v2312_v57 = vld [vmem:[#allocation3 + $0x4] sm:$0xff] }
 0x56b   :  { %2302 = vst [vmem:[#allocation3 + $0x18] sm:$0xff] %v2296_v59  ;;  %v2291_v55 = vsel %vm2278_vm15, %v2263_v1, %v2285_v11  ;;  %v4693_v1 = vld [vmem:[#allocation8 + $0x2c8] sm:$0xff]   ;;  %v4697_v41 = vld [vmem:[#allocation8 + $0x2a0] sm:$0xff]  }
 0x56c   :  { %v2297_v18 = vsel %vm5475_vm9, %v2291_v55, 0.0  ;;  %v2267_v20 = vpop.f32.mrb[68].mxu0  ;;  %v2214_v23 = vadd.f32 %v4067_v14, %v3726_v19  ;;  %v2313_v25 = vld [vmem:[#allocation3 + $0xc] sm:$0xff]  ;;  %v4801_v36 = vpack.c.bf16 %v2291_v55, %v2290_v8  ;;  %v4698_v38 = vld [vmem:[#allocation8 + $0x260] sm:$0xff]   ;;  %v4699_v8 = vld [vmem:[#allocation8 + $0x2d8] sm:$0xff]  }
 0x56d   :  { %2303 = vst [vmem:[#allocation3 + $0x20] sm:$0xff] %v2297_v18  ;;  %v2268_v26 = vadd.f32 %v2267_v20, %v2211_v15  ;;  %v4391_v27 = vpop.f32.mrb[69].mxu0  ;;  %v2325_v28 = vpack.c.bf16 %v2313_v25, %v2312_v57  ;;  %v4700_v11 = vld [vmem:[#allocation8 + $0x2a8] sm:$0xff]   ;;  %v4702_v59 = vld [vmem:[#allocation8 + $0x2e0] sm:$0xff]   ;;  %v4703_v14 = vld [vmem:[#allocation8 + $0x2b0] sm:$0xff]  }
 0x56e   :  { %v2270_v30 = vpop.f32.mrb[70].mxu0  ;;  %v4701_v13 = vld [vmem:[#allocation8 + $0x268] sm:$0xff]   ;;  %v4704_v15 = vld [vmem:[#allocation8 + $0x270] sm:$0xff]   ;;  %v4706_v18 = vld [vmem:[#allocation8 + $0x2b8] sm:$0xff]  }
 0x56f   :  { %vm2279_vm2 = vcmp.gt.f32.partialorder %v2268_v26, 0.0  ;;  %v2286_v32 = vmul.f32 %v5748_v5, %v2268_v26  ;;  %v2271_v34 = vadd.f32 %v2270_v30, %v2214_v23  ;;  %v4392_v35 = vpop.f32.mrb[71].mxu0  ;;  %2565 = vmatmul.mubr.bf16.vlgmr.msra.gmra.mrb[60].mxu1 %v2325_v28  ;;  %v4705_v55 = vld [vmem:[#allocation8 + $0x2e8] sm:$0xff]   ;;  %v4707_v20 = vld [vmem:[#allocation8 + $0x278] sm:$0xff]   ;;  %v4708_v23 = vld [vmem:[#allocation8 + $0x2f0] sm:$0xff]  }
 0x570   :  { %4802 = vmatprep.mubr.msk.bf16.mxu1 %vm5511_vm3, %v4801_v36  ;;  %4125 = vmatpush3.bf16.msra.mxu1 %v4687_v9  ;;  %v4709_v57 = vld [vmem:[#allocation8 + $0x2f8] sm:$0xff]   ;;  %v5788_v27 = vld [vmem:[#allocation13 + $0x2] ss:$0 sm:$0xff]  ;;  %v5791_v36 = vstv %s3777_s16 }
 0x571   :  { %v2292_v19 = vsel %vm2279_vm2, %v2268_v26, %v2286_v32  ;;  %vm2280_vm6 = vcmp.gt.f32.partialorder %v2271_v34, 0.0  ;;  %v2287_v17 = vmul.f32 %v5748_v5, %v2271_v34  ;;  %4126 = vmatprep.subr.bf16.mxu1 %v4688_v2  ;;  %vm5129_vm2 = vmmov 1  }
 0x572   :  { %v2298_v37 = vsel %vm5502_vm1, %v2292_v19, 0.0  ;;  %v2314_v39 = vld [vmem:[#allocation3 + $0x14] sm:$0xff] }
 0x573   :  { %2304 = vst [vmem:[#allocation3 + $0x28] sm:$0xff] %v2298_v37  ;;  %v2293_v42 = vsel %vm2280_vm6, %v2271_v34, %v2287_v17  ;;  %v2327_v45 = vpack.c.bf16 %v2314_v39, %v2313_v25  ;;  %v4710_v25 = vld [vmem:[#allocation11 + $0x280] sm:$0xff]   ;;  %vm5825_vm6 = vmpackc.low %vm5423_vm8, %vm5129_vm2 }
 0x574   :  { %v2299_v47 = vsel %vm5517_vm4, %v2293_v42, 0.0  ;;  %v2315_v40 = vld [vmem:[#allocation3 + $0x1c] sm:$0xff]  ;;  %v4804_v5 = vpack.c.bf16 %v2293_v42, %v2292_v19  ;;  %4127 = vmatpush3.bf16.msra.mxu1 %v4689_v46 }
 0x575   :  { %2305 = vst [vmem:[#allocation3 + $0x30] sm:$0xff] %v2299_v47  ;;  %4410 = vmatmul.mubr.bf16.vlgmr.msra.gmra.mrb[72].mxu0 %v2327_v45  ;;  %v2328_v49 = vpack.c.bf16 %v2315_v40, %v2314_v39  ;;  %4128 = vmatprep.subr.bf16.mxu1 %v4691_v62 }
 0x576   :  { %4413 = vmatprep.mubr.msk.bf16.mxu0 %vm5128_vm0, %v5639_v51  ;;  %4422 = vmatpush3.bf16.msra.mxu0 %v4690_v60 }
 0x577   :  { %2573 = vmatmul.mubr.bf16.gmra.mrb[64].mxu1 %v2328_v49  ;;  %4423 = vmatprep.subr.bf16.mxu0 %v5639_v51 }
 0x578   :  { %4805 = vmatprep.mubr.msk.bf16.mxu1 %vm5532_vm10, %v4804_v5  ;;  %4129 = vmatpush3.bf16.msra.mxu1 %v4692_v0 }
 0x579   :  { %4130 = vmatprep.subr.bf16.mxu1 %v4694_v3 }
 0x57a   :  { %v2316_v50 = vld [vmem:[#allocation3 + $0x24] sm:$0xff]  ;;  %4424 = vmatpush3.bf16.msra.mxu0 %v4693_v1 }
 0x57b   :  { %v2330_v7 = vpack.c.bf16 %v2316_v50, %v2315_v40  ;;  %4425 = vmatprep.subr.bf16.mxu0 %v5639_v51 }
 0x57c   :  { %v2317_v53 = vld [vmem:[#allocation3 + $0x2c] sm:$0xff]  ;;  %v2324_v31 = vld [vmem:[#allocation3 + $0x34] sm:$0xff]  ;;  %4131 = vmatpush3.bf16.msra.mxu1 %v4695_v4 }
 0x57d   :  { %4414 = vmatmul.mubr.bf16.gmra.mrb[76].mxu0 %v2330_v7  ;;  %v2331_v22 = vpack.c.bf16 %v2317_v53, %v2316_v50  ;;  %v2333_v56 = vpack.c.bf16 %v2324_v31, %v2317_v53  ;;  %4132 = vmatprep.subr.bf16.mxu1 %v4697_v41 }
 0x57e   :  { %4417 = vmatprep.mubr.msk.bf16.mxu0 %vm5128_vm0, %v5639_v51  ;;  %4426 = vmatpush3.bf16.msra.mxu0 %v4696_v6 }
 0x57f   :  { %2581 = vmatmul.mubr.bf16.gmra.mrb[68].mxu1 %v2331_v22  ;;  %4427 = vmatprep.subr.bf16.mxu0 %v5639_v51 }
 0x580   :  { %4133 = vmatpush3.bf16.msra.mxu1 %v4698_v38 }
 0x581   :  { %4134 = vmatprep.subr.bf16.mxu1 %v4700_v11 }
 0x582   :  { %4428 = vmatpush3.bf16.msra.mxu0 %v4699_v8 }
 0x583   :  { %4429 = vmatprep.subr.bf16.mxu0 %v5639_v51 }
 0x584   :  { %4135 = vmatpush3.bf16.msra.mxu1 %v4701_v13  ;;  %v4711_v13 = vld [vmem:[#allocation11 + $0x240] sm:$0xff]  }
 0x585   :  { %4418 = vmatmul.mubr.bf16.gmra.mrb[80].mxu0 %v2333_v56  ;;  %4136 = vmatprep.subr.bf16.mxu1 %v4703_v14 }
 0x586   :  { %4437 = vmatprep.mubr.msk.bf16.mxu0 %vm5128_vm0, %v5639_v51  ;;  %4430 = vmatpush3.bf16.msra.mxu0 %v4702_v59 }
 0x587   :  { %4431 = vmatprep.subr.bf16.mxu0 %v5639_v51 }
 0x588   :  { %4137 = vmatpush3.bf16.msra.mxu1 %v4704_v15  ;;  %v5811_v15 = vld [vmem:[#allocation2] sm:$0xff] }
 0x589   :  { %4138 = vmatprep.subr.bf16.mxu1 %v4706_v18 }
 0x58a   :  { %4432 = vmatpush3.bf16.msra.mxu0 %v4705_v55  ;;  %v4712_v55 = vld [vmem:[#allocation11 + $0x288] sm:$0xff]  }
 0x58b   :  { %4433 = vmatprep.subr.bf16.mxu0 %v5639_v51 }
 0x58c   :  { %4139 = vmatpush3.bf16.msra.mxu1 %v4707_v20 }
 0x58d   :  { %4169 = vmatprep.subr.bf16.mxu1 %v4710_v25 }
 0x58e   :  { %4434 = vmatpush3.bf16.msra.mxu0 %v4708_v23 }
 0x58f   :  { %4435 = vmatprep.subr.bf16.mxu0 %v5639_v51 }
 0x592   :  { %4436 = vmatpush3.bf16.msra.mxu0 %v4709_v57 }
 0x593   :  { %4449 = vmatprep.subr.bf16.mxu0 %v5639_v51 }
 0x642   :  { %v4095_v9 = vpop.f32.mrb[60].mxu1 }
 0x643   :  { %v4096_v26 = vpop.f32.mrb[61].mxu1 }
 0x644   :  { %v4097_v28 = vadd.f32 %v4096_v26, %v4095_v9  ;;  %v4098_v2 = vpop.f32.mrb[62].mxu1 }
 0x645   :  { %v4099_v30 = vpop.f32.mrb[63].mxu1 }
 0x646   :  { %v4100_v32 = vadd.f32 %v4099_v30, %v4098_v2  ;;  %v2567_v34 = vadd.f32 %v4097_v28, %v5788_v27 }
 0x648   :  { %v2623_v35 = vpop.f32.mrb[72].mxu0  ;;  %v2570_v19 = vadd.f32 %v4100_v32, %v5788_v27 }
 0x649   :  { %v2624_v17 = vadd.f32 %v2623_v35, %v2567_v34  ;;  %v4411_v51 = vpop.f32.mrb[73].mxu0 }
 0x64a   :  { %v2626_v37 = vpop.f32.mrb[74].mxu0  ;;  %v4101_v39 = vpop.f32.mrb[64].mxu1 }
 0x64b   :  { %vm2647_vm11 = vcmp.gt.f32.partialorder %v2624_v17, 0.0  ;;  %v2654_v42 = vmul.f32 %v5791_v36, %v2624_v17  ;;  %v2627_v45 = vadd.f32 %v2626_v37, %v2570_v19  ;;  %v4412_v47 = vpop.f32.mrb[75].mxu0  ;;  %v4102_v40 = vpop.f32.mrb[65].mxu1 }
 0x64c   :  { %v4103_v49 = vadd.f32 %v4102_v40, %v4101_v39  ;;  %v4104_v5 = vpop.f32.mrb[66].mxu1 }
 0x64d   :  { %v2660_v50 = vsel %vm2647_vm11, %v2624_v17, %v2654_v42  ;;  %vm2648_vm12 = vcmp.gt.f32.partialorder %v2627_v45, 0.0  ;;  %v2655_v7 = vmul.f32 %v5791_v36, %v2627_v45  ;;  %v4105_v53 = vpop.f32.mrb[67].mxu1  ;;  %v4714_v17 = vld [vmem:[#allocation11 + $0x2c0] sm:$0xff]  }
 0x64e   :  { %v5797_v22 = vadd.f32 %v2660_v50, %v5691_v44  ;;  %v4106_v31 = vadd.f32 %v4105_v53, %v4104_v5  ;;  %v2575_v56 = vadd.f32 %v4103_v49, %v5788_v27 }
 0x64f   :  { %v2661_v46 = vsel %vm2648_vm12, %v2627_v45, %v2655_v7  ;;  %vm5848_vm12 = vmpackc.low %vm5460_vm5, %vm5431_vm14 }
 0x650   :  { %v5801_v60 = vadd.f32 %v2661_v46, %v5697_v52  ;;  %v2631_v62 = vpop.f32.mrb[76].mxu0  ;;  %v2578_v0 = vadd.f32 %v4106_v31, %v5788_v27  ;;  %v2672_v1 = vsel %vm5423_vm8, %v5797_v22, 0.0  ;;  %v4810_v2 = vpack.c.bf16 %v5797_v22, %v5811_v15 }
 0x651   :  { %v2632_v3 = vadd.f32 %v2631_v62, %v2575_v56  ;;  %v4415_v4 = vpop.f32.mrb[77].mxu0  ;;  %v4741_v62 = vld [vmem:[#allocation17 + $0x38] sm:$0xff]  }
 0x652   :  { %v2673_v44 = vsel %vm5431_vm14, %v5801_v60, 0.0  ;;  %v2634_v6 = vpop.f32.mrb[78].mxu0  ;;  %v4107_v41 = vpop.f32.mrb[68].mxu1  ;;  %v4807_v57 = vpack.c.bf16 %v5801_v60, %v5797_v22  ;;  %v4716_v4 = vld [vmem:[#allocation11 + $0x250] sm:$0xff]  }
 0x653   :  { %vm2649_vm13 = vcmp.gt.f32.partialorder %v2632_v3, 0.0  ;;  %v2656_v38 = vmul.f32 %v5791_v36, %v2632_v3  ;;  %v2635_v52 = vadd.f32 %v2634_v6, %v2578_v0  ;;  %v4416_v8 = vpop.f32.mrb[79].mxu0  ;;  %v4108_v11 = vpop.f32.mrb[69].mxu1  ;;  %v4717_v6 = vld [vmem:[#allocation11 + $0x2c8] sm:$0xff]  }
 0x654   :  { %v4109_v59 = vadd.f32 %v4108_v11, %v4107_v41  ;;  %v4110_v14 = vpop.f32.mrb[70].mxu1  ;;  %4808 = vmatprep.mubr.msk.bf16.mxu1 %vm5469_vm7, %v4807_v57  ;;  %v4718_v41 = vld [vmem:[#allocation11 + $0x298] sm:$0xff]   ;;  %v4721_v8 = vld [vmem:[#allocation11 + $0x2a0] sm:$0xff]  }
 0x655   :  { %v2662_v18 = vsel %vm2649_vm13, %v2632_v3, %v2656_v38  ;;  %vm2650_vm15 = vcmp.gt.f32.partialorder %v2635_v52, 0.0  ;;  %v2657_v20 = vmul.f32 %v5791_v36, %v2635_v52  ;;  %v4111_v23 = vpop.f32.mrb[71].mxu1  ;;  %4811 = vmatmul.mubr.msk.bf16.vlgmr.msra.gmra.mrb[72].mxu1 %vm5825_vm6, %v4810_v2  ;;  %v4715_v3 = vld [vmem:[#allocation11 + $0x290] sm:$0xff]   ;;  %v4719_v38 = vld [vmem:[#allocation11 + $0x258] sm:$0xff]   ;;  %v4722_v11 = vld [vmem:[#allocation11 + $0x260] sm:$0xff]  }
 0x656   :  { %v5819_v25 = vadd.f32 %v2662_v18, %v5707_v63  ;;  %v4112_v9 = vadd.f32 %v4111_v23, %v4110_v14  ;;  %v2583_v26 = vadd.f32 %v4109_v59, %v5788_v27  ;;  %4170 = vmatpush3.bf16.msra.mxu1 %v4711_v13  ;;  %v4713_v63 = vld [vmem:[#allocation11 + $0x248] sm:$0xff]   ;;  %v4723_v13 = vld [vmem:[#allocation11 + $0x2d8] sm:$0xff]   ;;  %v4727_v18 = vld [vmem:[#allocation11 + $0x2b0] sm:$0xff]  }
 0x657   :  { %v2663_v30 = vsel %vm2650_vm15, %v2635_v52, %v2657_v20  ;;  %4171 = vmatprep.subr.bf16.mxu1 %v4712_v55  ;;  %vm5882_vm15 = vmpackc.low %vm5502_vm1, %vm5475_vm9  ;;  %v4720_v52 = vld [vmem:[#allocation11 + $0x2d0] sm:$0xff]   ;;  %v4724_v59 = vld [vmem:[#allocation11 + $0x2a8] sm:$0xff]  }
 0x658   :  { %v2674_v32 = vsel %vm5460_vm5, %v5819_v25, 0.0  ;;  %v5837_v34 = vadd.f32 %v2663_v30, %v5713_v16  ;;  %v2639_v35 = vpop.f32.mrb[80].mxu0  ;;  %v2586_v19 = vadd.f32 %v4112_v9, %v5788_v27  ;;  %v4813_v27 = vpack.c.bf16 %v5819_v25, %v5801_v60  ;;  %v4725_v14 = vld [vmem:[#allocation11 + $0x268] sm:$0xff]   ;;  %v4726_v55 = vld [vmem:[#allocation11 + $0x2e0] sm:$0xff]   ;;  %v4728_v20 = vld [vmem:[#allocation11 + $0x270] sm:$0xff]  }
 0x659   :  { %v2640_v51 = vadd.f32 %v2639_v35, %v2583_v26  ;;  %v4419_v37 = vpop.f32.mrb[81].mxu0  ;;  %v4729_v23 = vld [vmem:[#allocation11 + $0x2e8] sm:$0xff]   ;;  %v4730_v57 = vld [vmem:[#allocation11 + $0x2b8] sm:$0xff]   ;;  %v4732_v26 = vld [vmem:[#allocation11 + $0x2f0] sm:$0xff]  }
 0x65a   :  { %v2675_v39 = vsel %vm5475_vm9, %v5837_v34, 0.0  ;;  %v2642_v42 = vpop.f32.mrb[82].mxu0  ;;  %4814 = vmatmul.mubr.msk.bf16.vlgmr.msra.gmra.mrb[84].mxu0 %vm5848_vm12, %v4813_v27  ;;  %4172 = vmatpush3.bf16.msra.mxu1 %v4713_v63  ;;  %v4816_v50 = vpack.c.bf16 %v5837_v34, %v5819_v25  ;;  %v4731_v9 = vld [vmem:[#allocation11 + $0x278] sm:$0xff]  }
 0x65b   :  { %vm2651_vm11 = vcmp.gt.f32.partialorder %v2640_v51, 0.0  ;;  %v2658_v45 = vmul.f32 %v5791_v36, %v2640_v51  ;;  %v2643_v47 = vadd.f32 %v2642_v42, %v2586_v19  ;;  %v4420_v40 = vpop.f32.mrb[83].mxu0  ;;  %4441 = vmatprep.mubr.msk.bf16.mxu0 %vm5128_vm0, %v5811_v15  ;;  %4450 = vmatpush3.bf16.msra.mxu0 %v4714_v17  ;;  %v4733_v2 = vld [vmem:[#allocation11 + $0x2f8] sm:$0xff]  }
 0x65c   :  { %4817 = vmatprep.mubr.msk.bf16.mxu1 %vm5511_vm3, %v4816_v50  ;;  %4451 = vmatprep.subr.bf16.mxu0 %v5811_v15  ;;  %v5918_v35 = vld [vmem:[#allocation10 + $0x3] ss:$0 sm:$0xff] }
 0x65d   :  { %v2664_v49 = vsel %vm2651_vm11, %v2640_v51, %v2658_v45  ;;  %vm2652_vm13 = vcmp.gt.f32.partialorder %v2643_v47, 0.0  ;;  %v2659_v5 = vmul.f32 %v5791_v36, %v2643_v47  ;;  %4820 = vmatmul.mubr.msk.bf16.gmra.mrb[76].mxu1 %vm5848_vm12, %v4813_v27  ;;  %vm5901_vm11 = vmpackc.low %vm5129_vm2, %vm5517_vm4  ;;  %4173 = vmatprep.subr.bf16.mxu1 %v4715_v3 }
 0x65e   :  { %v5865_v7 = vadd.f32 %v2664_v49, %v5723_v33  ;;  %4174 = vmatpush3.bf16.msra.mxu1 %v4716_v4  ;;  %v4739_v33 = vld [vmem:[#allocation17 + $0x28] sm:$0xff]  }
 0x65f   :  { %v2665_v53 = vsel %vm2652_vm13, %v2643_v47, %v2659_v5  ;;  %4452 = vmatpush3.bf16.msra.mxu0 %v4717_v6  ;;  %4175 = vmatprep.subr.bf16.mxu1 %v4718_v41  ;;  %v5921_v47 = vstv %s3803_s25 }
 0x660   :  { %v2676_v31 = vsel %vm5502_vm1, %v5865_v7, 0.0  ;;  %v5873_v36 = vadd.f32 %v2665_v53, %v5729_v61  ;;  %v4822_v46 = vpack.c.bf16 %v5865_v7, %v5837_v34  ;;  %4453 = vmatprep.subr.bf16.mxu0 %v5811_v15 }
 0x662   :  { %v2677_v56 = vsel %vm5517_vm4, %v5873_v36, 0.0  ;;  %4823 = vmatmul.mubr.msk.bf16.gmra.mrb[88].mxu0 %vm5882_vm15, %v4822_v46  ;;  %v4825_v61 = vpack.c.bf16 %v5873_v36, %v5865_v7  ;;  %v4831_v0 = vpack.c.bf16 %v5811_v15, %v5873_v36  ;;  %4176 = vmatpush3.bf16.msra.mxu1 %v4719_v38  ;;  %v3830_v7 = vld [vmem:[#allocation19] ss:$0 sm:$0xff] }
 0x663   :  { %4445 = vmatprep.mubr.msk.bf16.mxu0 %vm5128_vm0, %v5811_v15  ;;  %4454 = vmatpush3.bf16.msra.mxu0 %v4720_v52 }
 0x664   :  { %4826 = vmatprep.mubr.msk.bf16.mxu1 %vm5532_vm10, %v4825_v61  ;;  %4455 = vmatprep.subr.bf16.mxu0 %v5811_v15 }
 0x665   :  { %4829 = vmatmul.mubr.msk.bf16.gmra.mrb[80].mxu1 %vm5882_vm15, %v4822_v46  ;;  %4177 = vmatprep.subr.bf16.mxu1 %v4721_v8 }
 0x666   :  { %4178 = vmatpush3.bf16.msra.mxu1 %v4722_v11 }
 0x667   :  { %4456 = vmatpush3.bf16.msra.mxu0 %v4723_v13  ;;  %4179 = vmatprep.subr.bf16.mxu1 %v4724_v59 }
 0x668   :  { %4457 = vmatprep.subr.bf16.mxu0 %v5811_v15 }
 0x66a   :  { %4832 = vmatmul.mubr.msk.bf16.gmra.mrb[92].mxu0 %vm5901_vm11, %v4831_v0  ;;  %4180 = vmatpush3.bf16.msra.mxu1 %v4725_v14 }
 0x66b   :  { %4465 = vmatprep.mubr.msk.bf16.mxu0 %vm5128_vm0, %v5811_v15  ;;  %4458 = vmatpush3.bf16.msra.mxu0 %v4726_v55 }
 0x66c   :  { %4459 = vmatprep.subr.bf16.mxu0 %v5811_v15  ;;  %4181 = vmatprep.subr.bf16.mxu1 %v4727_v18 }
 0x66e   :  { %4182 = vmatpush3.bf16.msra.mxu1 %v4728_v20 }
 0x66f   :  { %4460 = vmatpush3.bf16.msra.mxu0 %v4729_v23  ;;  %4183 = vmatprep.subr.bf16.mxu1 %v4730_v57  ;;  %v4734_v23 = vld [vmem:[#allocation17] sm:$0xff]  }
 0x670   :  { %4461 = vmatprep.subr.bf16.mxu0 %v5811_v15 }
 0x672   :  { %4184 = vmatpush3.bf16.msra.mxu1 %v4731_v9 }
 0x673   :  { %4462 = vmatpush3.bf16.msra.mxu0 %v4732_v26  ;;  %4477 = vmatprep.subr.bf16.mxu1 %v5811_v15 }
 0x674   :  { %4463 = vmatprep.subr.bf16.mxu0 %v5811_v15 }
 0x677   :  { %4464 = vmatpush3.bf16.msra.mxu0 %v4733_v2 }
 0x728   :  { %v4140_v30 = vpop.f32.mrb[72].mxu1 }
 0x729   :  { %v4141_v63 = vpop.f32.mrb[73].mxu1 }
 0x72a   :  { %v4142_v19 = vadd.f32 %v4141_v63, %v4140_v30  ;;  %v4143_v17 = vpop.f32.mrb[74].mxu1 }
 0x72b   :  { %v4144_v51 = vpop.f32.mrb[75].mxu1 }
 0x72c   :  { %v4145_v37 = vadd.f32 %v4144_v51, %v4143_v17  ;;  %v2939_v42 = vadd.f32 %v4142_v19, %v5918_v35 }
 0x72d   :  { %v2995_v45 = vpop.f32.mrb[84].mxu0 }
 0x72e   :  { %v2996_v40 = vadd.f32 %v2995_v45, %v2939_v42  ;;  %v4439_v27 = vpop.f32.mrb[85].mxu0  ;;  %v2942_v49 = vadd.f32 %v4145_v37, %v5918_v35 }
 0x72f   :  { %v2998_v5 = vpop.f32.mrb[86].mxu0 }
 0x730   :  { %vm3019_vm2 = vcmp.gt.f32.partialorder %v2996_v40, 0.0  ;;  %v3026_v50 = vmul.f32 %v5921_v47, %v2996_v40  ;;  %v2999_v53 = vadd.f32 %v2998_v5, %v2942_v49  ;;  %v4146_v46 = vpop.f32.mrb[76].mxu1  ;;  %v4440_v61 = vpop.f32.mrb[87].mxu0 }
 0x731   :  { %v4147_v0 = vpop.f32.mrb[77].mxu1 }
 0x732   :  { %v3032_v3 = vsel %vm3019_vm2, %v2996_v40, %v3026_v50  ;;  %vm3020_vm13 = vcmp.gt.f32.partialorder %v2999_v53, 0.0  ;;  %v3027_v4 = vmul.f32 %v5921_v47, %v2999_v53  ;;  %v4148_v6 = vadd.f32 %v4147_v0, %v4146_v46  ;;  %v4149_v41 = vpop.f32.mrb[78].mxu1  ;;  %v4735_v40 = vld [vmem:[#allocation17 + $0x8] sm:$0xff]  }
 0x733   :  { %v3038_v38 = vsel %vm5423_vm8, %v3032_v3, 0.0  ;;  %v4150_v52 = vpop.f32.mrb[79].mxu1  ;;  %v4837_v17 = vpack.c.bf16 %v3032_v3, %v5811_v15 }
 0x734   :  { %3044 = vst [vmem:[#allocation3 + $0x8] sm:$0xff] %v3038_v38  ;;  %v3033_v8 = vsel %vm3020_vm13, %v2999_v53, %v3027_v4  ;;  %v4151_v11 = vadd.f32 %v4150_v52, %v4149_v41  ;;  %v2947_v13 = vadd.f32 %v4148_v6, %v5918_v35 }
 0x735   :  { %v3039_v59 = vsel %vm5431_vm14, %v3033_v8, 0.0  ;;  %v3003_v14 = vpop.f32.mrb[88].mxu0  ;;  %v4834_v63 = vpack.c.bf16 %v3033_v8, %v3032_v3 }
 0x736   :  { %3045 = vst [vmem:[#allocation3 + $0x10] sm:$0xff] %v3039_v59  ;;  %v3004_v55 = vadd.f32 %v3003_v14, %v2947_v13  ;;  %v4443_v18 = vpop.f32.mrb[89].mxu0  ;;  %v2950_v20 = vadd.f32 %v4151_v11, %v5918_v35 }
 0x737   :  { %v3006_v57 = vpop.f32.mrb[90].mxu0  ;;  %4835 = vmatprep.mubr.msk.bf16.mxu1 %vm5469_vm7, %v4834_v63  ;;  %v4736_v18 = vld [vmem:[#allocation17 + $0x10] sm:$0xff]  }
 0x738   :  { %vm3021_vm2 = vcmp.gt.f32.partialorder %v3004_v55, 0.0  ;;  %v3028_v9 = vmul.f32 %v5921_v47, %v3004_v55  ;;  %v3007_v26 = vadd.f32 %v3006_v57, %v2950_v20  ;;  %v4152_v2 = vpop.f32.mrb[80].mxu1  ;;  %v4444_v30 = vpop.f32.mrb[91].mxu0  ;;  %4838 = vmatmul.mubr.msk.bf16.vlgmr.msra.gmra.mrb[84].mxu1 %vm5825_vm6, %v4837_v17  ;;  %v4737_v20 = vld [vmem:[#allocation17 + $0x18] sm:$0xff]   ;;  %v4740_v57 = vld [vmem:[#allocation17 + $0x30] sm:$0xff]  }
 0x739   :  { %v4153_v19 = vpop.f32.mrb[81].mxu1  ;;  %4478 = vmatpush3.bf16.msra.mxu1 %v4734_v23  ;;  %v4738_v23 = vld [vmem:[#allocation17 + $0x20] sm:$0xff]  }
 0x73a   :  { %v3034_v51 = vsel %vm3021_vm2, %v3004_v55, %v3028_v9  ;;  %vm3022_vm13 = vcmp.gt.f32.partialorder %v3007_v26, 0.0  ;;  %v3029_v37 = vmul.f32 %v5921_v47, %v3007_v26  ;;  %v4154_v42 = vadd.f32 %v4153_v19, %v4152_v2  ;;  %v4155_v45 = vpop.f32.mrb[82].mxu1  ;;  %4479 = vmatprep.subr.bf16.mxu1 %v5811_v15  ;;  %v5979_v2 = vld [vmem:[#allocation13 + $0x3] ss:$0 sm:$0xff] }
 0x73b   :  { %v3040_v27 = vsel %vm5460_vm5, %v3034_v51, 0.0  ;;  %v4156_v49 = vpop.f32.mrb[83].mxu1  ;;  %v4840_v4 = vpack.c.bf16 %v3034_v51, %v3033_v8 }
 0x73c   :  { %3046 = vst [vmem:[#allocation3 + $0x18] sm:$0xff] %v3040_v27  ;;  %v3035_v5 = vsel %vm3022_vm13, %v3007_v26, %v3029_v37  ;;  %v4157_v50 = vadd.f32 %v4156_v49, %v4155_v45  ;;  %v2955_v28 = vadd.f32 %v4154_v42, %v5918_v35  ;;  %v5982_v42 = vstv %s3829_s26 }
 0x73d   :  { %v3041_v53 = vsel %vm5475_vm9, %v3035_v5, 0.0  ;;  %v3011_v46 = vpop.f32.mrb[92].mxu0  ;;  %4841 = vmatmul.mubr.msk.bf16.vlgmr.msra.gmra.mrb[96].mxu0 %vm5848_vm12, %v4840_v4  ;;  %4480 = vmatpush3.bf16.msra.mxu1 %v4735_v40  ;;  %v4843_v11 = vpack.c.bf16 %v3035_v5, %v3034_v51 }
 0x73e   :  { %3047 = vst [vmem:[#allocation3 + $0x20] sm:$0xff] %v3041_v53  ;;  %v3012_v61 = vadd.f32 %v3011_v46, %v2955_v28  ;;  %v4447_v0 = vpop.f32.mrb[93].mxu0  ;;  %v2958_v3 = vadd.f32 %v4157_v50, %v5918_v35  ;;  %4469 = vmatprep.mubr.msk.bf16.mxu0 %vm5128_vm0, %v5811_v15  ;;  %4481 = vmatprep.subr.bf16.mxu1 %v5811_v15 }
 0x73f   :  { %v3014_v6 = vpop.f32.mrb[94].mxu0  ;;  %4844 = vmatprep.mubr.msk.bf16.mxu1 %vm5511_vm3, %v4843_v11 }
 0x740   :  { %vm3023_vm6 = vcmp.gt.f32.partialorder %v3012_v61, 0.0  ;;  %v3030_v41 = vmul.f32 %v5921_v47, %v3012_v61  ;;  %v3015_v38 = vadd.f32 %v3014_v6, %v2958_v3  ;;  %v4448_v52 = vpop.f32.mrb[95].mxu0  ;;  %4847 = vmatmul.mubr.msk.bf16.gmra.mrb[88].mxu1 %vm5848_vm12, %v4840_v4 }
 0x741   :  { %4482 = vmatpush3.bf16.msra.mxu1 %v4736_v18 }
 0x742   :  { %v3036_v35 = vsel %vm3023_vm6, %v3012_v61, %v3030_v41  ;;  %vm3024_vm2 = vcmp.gt.f32.partialorder %v3015_v38, 0.0  ;;  %v3031_v8 = vmul.f32 %v5921_v47, %v3015_v38  ;;  %4483 = vmatprep.subr.bf16.mxu1 %v5811_v15 }
 0x743   :  { %v3042_v13 = vsel %vm5502_vm1, %v3036_v35, 0.0  ;;  %v4849_v55 = vpack.c.bf16 %v3036_v35, %v3035_v5 }
 0x744   :  { %3048 = vst [vmem:[#allocation3 + $0x28] sm:$0xff] %v3042_v13  ;;  %v3037_v59 = vsel %vm3024_vm2, %v3015_v38, %v3031_v8 }
 0x745   :  { %v3043_v14 = vsel %vm5517_vm4, %v3037_v59, 0.0  ;;  %4850 = vmatmul.mubr.msk.bf16.gmra.mrb[100].mxu0 %vm5882_vm15, %v4849_v55  ;;  %v4852_v16 = vpack.c.bf16 %v3037_v59, %v3036_v35  ;;  %v4858_v47 = vpack.c.bf16 %v5811_v15, %v3037_v59  ;;  %4484 = vmatpush3.bf16.msra.mxu1 %v4737_v20 }
 0x746   :  { %3049 = vst [vmem:[#allocation3 + $0x30] sm:$0xff] %v3043_v14  ;;  %4473 = vmatprep.mubr.msk.bf16.mxu0 %vm5128_vm0, %v5811_v15  ;;  %4485 = vmatprep.subr.bf16.mxu1 %v5811_v15 }
 0x747   :  { %4853 = vmatprep.mubr.msk.bf16.mxu1 %vm5532_vm10, %v4852_v16 }
 0x748   :  { %4856 = vmatmul.mubr.msk.bf16.gmra.mrb[92].mxu1 %vm5882_vm15, %v4849_v55 }
 0x749   :  { %4493 = vmatprep.mubr.msk.bf16.mxu1 %vm5128_vm0, %v5811_v15  ;;  %4486 = vmatpush3.bf16.msra.mxu1 %v4738_v23 }
 0x74a   :  { %4487 = vmatprep.subr.bf16.mxu1 %v5811_v15 }
 0x74d   :  { %4859 = vmatmul.mubr.msk.bf16.gmra.mrb[104].mxu0 %vm5901_vm11, %v4858_v47  ;;  %4488 = vmatpush3.bf16.msra.mxu1 %v4739_v33 }
 0x74e   :  { %4489 = vmatprep.subr.bf16.mxu1 %v5811_v15 }
 0x751   :  { %4490 = vmatpush3.bf16.msra.mxu1 %v4740_v57 }
 0x752   :  { %4491 = vmatprep.subr.bf16.mxu1 %v5811_v15 }
 0x755   :  { %4492 = vmatpush3.bf16.msra.mxu1 %v4741_v62 }
 0x80b   :  { %v4185_v9 = vpop.f32.mrb[84].mxu1 }
 0x80c   :  { %v4186_v26 = vpop.f32.mrb[85].mxu1 }
 0x80d   :  { %v4187_v30 = vadd.f32 %v4186_v26, %v4185_v9  ;;  %v4188_v63 = vpop.f32.mrb[86].mxu1 }
 0x80e   :  { %v4189_v19 = vpop.f32.mrb[87].mxu1 }
 0x80f   :  { %v4190_v17 = vadd.f32 %v4189_v19, %v4188_v63  ;;  %v3311_v51 = vadd.f32 %v4187_v30, %v5979_v2 }
 0x810   :  { %v3367_v37 = vpop.f32.mrb[96].mxu0 }
 0x811   :  { %v3368_v45 = vadd.f32 %v3367_v37, %v3311_v51  ;;  %v4467_v40 = vpop.f32.mrb[97].mxu0  ;;  %v3314_v27 = vadd.f32 %v4190_v17, %v5979_v2 }
 0x812   :  { %v3370_v49 = vpop.f32.mrb[98].mxu0 }
 0x813   :  { %vm3391_vm12 = vcmp.gt.f32.partialorder %v3368_v45, 0.0  ;;  %v3398_v5 = vmul.f32 %v5982_v42, %v3368_v45  ;;  %v3371_v50 = vadd.f32 %v3370_v49, %v3314_v27  ;;  %v4191_v28 = vpop.f32.mrb[88].mxu1  ;;  %v4468_v53 = vpop.f32.mrb[99].mxu0 }
 0x814   :  { %v4192_v46 = vpop.f32.mrb[89].mxu1 }
 0x815   :  { %v3404_v61 = vsel %vm3391_vm12, %v3368_v45, %v3398_v5  ;;  %vm3392_vm15 = vcmp.gt.f32.partialorder %v3371_v50, 0.0  ;;  %v3399_v0 = vmul.f32 %v5982_v42, %v3371_v50  ;;  %v4193_v3 = vadd.f32 %v4192_v46, %v4191_v28  ;;  %v4194_v4 = vpop.f32.mrb[90].mxu1 }
 0x816   :  { %v3410_v6 = vadd.f32 %v3404_v61, %v2672_v1  ;;  %v4195_v41 = vpop.f32.mrb[91].mxu1 }
 0x817   :  { %v3405_v38 = vsel %vm3392_vm15, %v3371_v50, %v3399_v0  ;;  %v4196_v52 = vadd.f32 %v4195_v41, %v4194_v4  ;;  %v3319_v11 = vadd.f32 %v4193_v3, %v5979_v2 }
 0x818   :  { %v3416_v35 = vsel %vm5423_vm8, %v3410_v6, 0.0  ;;  %v3411_v8 = vadd.f32 %v3405_v38, %v2673_v44  ;;  %v3375_v13 = vpop.f32.mrb[100].mxu0 }
 0x819   :  { %3422 = vst [vmem:[#allocation2 + $0x8] sm:$0xff] %v3416_v35  ;;  %v3376_v59 = vadd.f32 %v3375_v13, %v3319_v11  ;;  %v4471_v14 = vpop.f32.mrb[101].mxu0  ;;  %v3322_v22 = vadd.f32 %v4196_v52, %v5979_v2 }
 0x81a   :  { %v3417_v1 = vsel %vm5431_vm14, %v3411_v8, 0.0  ;;  %v3378_v55 = vpop.f32.mrb[102].mxu0  ;;  %v4861_v57 = vpack.c.bf16 %v3411_v8, %v3410_v6 }
 0x81b   :  { %3423 = vst [vmem:[#allocation2 + $0x10] sm:$0xff] %v3417_v1  ;;  %vm3393_vm11 = vcmp.gt.f32.partialorder %v3376_v59, 0.0  ;;  %v3400_v12 = vmul.f32 %v5982_v42, %v3376_v59  ;;  %v3379_v16 = vadd.f32 %v3378_v55, %v3322_v22  ;;  %v4197_v47 = vpop.f32.mrb[92].mxu1  ;;  %v4472_v18 = vpop.f32.mrb[103].mxu0 }
 0x81c   :  { %v4198_v20 = vpop.f32.mrb[93].mxu1  ;;  %4862 = vmatmul.mubr.msk.bf16.vlgmr.msra.gmra.mrb[96].mxu1 %vm5469_vm7, %v4861_v57 }
 0x81d   :  { %v3406_v60 = vsel %vm3393_vm11, %v3376_v59, %v3400_v12  ;;  %vm3394_vm8 = vcmp.gt.f32.partialorder %v3379_v16, 0.0  ;;  %v3401_v44 = vmul.f32 %v5982_v42, %v3379_v16  ;;  %v4199_v23 = vadd.f32 %v4198_v20, %v4197_v47  ;;  %v4200_v33 = vpop.f32.mrb[94].mxu1  ;;  %4497 = vmatprep.mubr.msk.bf16.mxu1 %vm5128_vm0, %v5811_v15 }
 0x81e   :  { %v3412_v21 = vadd.f32 %v3406_v60, %v2674_v32  ;;  %v4201_v62 = vpop.f32.mrb[95].mxu1 }
 0x81f   :  { %v3407_v9 = vsel %vm3394_vm8, %v3379_v16, %v3401_v44  ;;  %v4202_v26 = vadd.f32 %v4201_v62, %v4200_v33  ;;  %v3327_v30 = vadd.f32 %v4199_v23, %v5979_v2 }
 0x820   :  { %v3418_v63 = vsel %vm5460_vm5, %v3412_v21, 0.0  ;;  %v3413_v43 = vadd.f32 %v3407_v9, %v2675_v39  ;;  %v3383_v19 = vpop.f32.mrb[104].mxu0 }
 0x821   :  { %3424 = vst [vmem:[#allocation2 + $0x18] sm:$0xff] %v3418_v63  ;;  %v3384_v25 = vadd.f32 %v3383_v19, %v3327_v30  ;;  %v4475_v32 = vpop.f32.mrb[105].mxu0  ;;  %v3330_v17 = vadd.f32 %v4202_v26, %v5979_v2 }
 0x822   :  { %v3419_v51 = vsel %vm5475_vm9, %v3413_v43, 0.0  ;;  %v3386_v37 = vpop.f32.mrb[106].mxu0  ;;  %v4864_v39 = vpack.c.bf16 %v3413_v43, %v3412_v21 }
 0x823   :  { %3425 = vst [vmem:[#allocation2 + $0x20] sm:$0xff] %v3419_v51  ;;  %vm3395_vm14 = vcmp.gt.f32.partialorder %v3384_v25, 0.0  ;;  %v3402_v48 = vmul.f32 %v5982_v42, %v3384_v25  ;;  %v3387_v45 = vadd.f32 %v3386_v37, %v3330_v17  ;;  %v4476_v40 = vpop.f32.mrb[107].mxu0 }
 0x824   :  { %4865 = vmatmul.mubr.msk.bf16.gmra.mrb[100].mxu1 %vm5511_vm3, %v4864_v39 }
 0x825   :  { %v3408_v27 = vsel %vm3395_vm14, %v3384_v25, %v3402_v48  ;;  %vm3396_vm5 = vcmp.gt.f32.partialorder %v3387_v45, 0.0  ;;  %v3403_v34 = vmul.f32 %v5982_v42, %v3387_v45  ;;  %4501 = vmatprep.mubr.msk.bf16.mxu1 %vm5128_vm0, %v5811_v15 }
 0x826   :  { %v3414_v54 = vadd.f32 %v3408_v27, %v2676_v31 }
 0x827   :  { %v3409_v2 = vsel %vm3396_vm5, %v3387_v45, %v3403_v34 }
 0x828   :  { %v3420_v49 = vsel %vm5502_vm1, %v3414_v54, 0.0  ;;  %v3415_v42 = vadd.f32 %v3409_v2, %v2677_v56 }
 0x829   :  { %3426 = vst [vmem:[#allocation2 + $0x28] sm:$0xff] %v3420_v49 }
 0x82a   :  { %v3421_v58 = vsel %vm5517_vm4, %v3415_v42, 0.0  ;;  %v4867_v5 = vpack.c.bf16 %v3415_v42, %v3414_v54 }
 0x82b   :  { %3427 = vst [vmem:[#allocation2 + $0x30] sm:$0xff] %v3421_v58 }
 0x82c   :  { %4868 = vmatmul.mubr.msk.bf16.gmra.mrb[104].mxu1 %vm5532_vm10, %v4867_v5 }
 0x8ef   :  { %v3542_v15 = vpop.f32.mrb[96].mxu1 }
 0x8f0   :  { %v3543_v31 = vadd.f32 %v3830_v7, %v3542_v15  ;;  %v4495_v50 = vpop.f32.mrb[97].mxu1 }
 0x8f1   :  { %v3545_v24 = vpop.f32.mrb[98].mxu1 }
 0x8f2   :  { %v3839_v28 = vmul.f32 -1.442695, %v3543_v31  ;;  %v3546_v53 = vadd.f32 %v3830_v7, %v3545_v24  ;;  %v4496_v46 = vpop.f32.mrb[99].mxu1 }
 0x8f4   :  { %4742 = vpow2.f32 %v3839_v28  ;;  %v3840_v36 = vmul.f32 -1.442695, %v3546_v53 }
 0x8f6   :  { %4744 = vpow2.f32 %v3840_v36 }
 0x8f7   :  { %v3550_v56 = vpop.f32.mrb[100].mxu1 }
 0x8f8   :  { %v4499_v61 = vpop.f32.mrb[101].mxu1 }
 0x8f9   :  { %v3552_v29 = vpop.f32.mrb[102].mxu1 }
 0x8fa   :  { %v3553_v0 = vadd.f32 %v3830_v7, %v3552_v29  ;;  %v4500_v3 = vpop.f32.mrb[103].mxu1 }
 0x8fc   :  { %v3841_v4 = vmul.f32 -1.442695, %v3553_v0 }
 0x8fe   :  { %v4743_v6 = vpop.eup %4742  ;;  %4746 = vpow2.f32 %v3841_v4 }
 0x8ff   :  { %v3575_v10 = vadd.f32 1.0, %v4743_v6  ;;  %v3557_v41 = vpop.f32.mrb[104].mxu1 }
 0x900   :  { %v4745_v38 = vpop.eup %4744  ;;  %v3558_v52 = vadd.f32 %v3830_v7, %v3557_v41  ;;  %v4503_v11 = vpop.f32.mrb[105].mxu1 }
 0x901   :  { %4748 = vrcp.f32 %v3575_v10  ;;  %v3576_v35 = vadd.f32 1.0, %v4745_v38  ;;  %v3560_v8 = vpop.f32.mrb[106].mxu1 }
 0x902   :  { %v3842_v13 = vmul.f32 -1.442695, %v3558_v52  ;;  %v4504_v59 = vpop.f32.mrb[107].mxu1 }
 0x903   :  { %4750 = vrcp.f32 %v3576_v35 }
 0x904   :  { %4752 = vpow2.f32 %v3842_v13 }
 0x908   :  { %v4747_v14 = vpop.eup %4746 }
 0x909   :  { %v3577_v22 = vadd.f32 1.0, %v4747_v14 }
 0x90b   :  { %v4749_v1 = vpop.eup %4748  ;;  %4754 = vrcp.f32 %v3577_v22 }
 0x90c   :  { %3587 = vst [vmem:[#allocation21] sm:$0xff] %v4749_v1 }
 0x90d   :  { %v4751_v55 = vpop.eup %4750 }
 0x90e   :  { %v4753_v12 = vpop.eup %4752  ;;  %3588 = vst [vmem:[#allocation21 + $0x8] sm:$0xff] %v4751_v55 }
 0x90f   :  { %v3578_v16 = vadd.f32 1.0, %v4753_v12 }
 0x911   :  { %4756 = vrcp.f32 %v3578_v16 }
 0x915   :  { %v4755_v47 = vpop.eup %4754 }
 0x916   :  { %3590 = vst [vmem:[#allocation21 + $0x10] sm:$0xff] %v4755_v47 }
 0x91b   :  { %v4757_v18 = vpop.eup %4756 }
 0x91c   :  { %3591 = vst [vmem:[#allocation21 + $0x18] sm:$0xff] %v4757_v18 }
 0x91d   :  { %5088 = shalt.err (!%p5085_p9)
}
 0x91e   :  { %s5089_s12 = scalar_lea.hbm %s6066_s10, 512 }
 0x91f   :  { %p5090_p10 = scmp.ne.s32.totalorder %s6066_s10, %s5089_s12  ;;  %p5093_p11 = scmp.lt.u32.totalorder %s5089_s12, %s6066_s10 }
 0x921   :  { %p5095_p12 = pnand %p5093_p11, %p5090_p10 }
 0x923   :  { %5098 = shalt.err (!%p5095_p12)
}
 0x924   :  { %3603 = dma.vmem_to_hbm [thread:$0]  %s3598_s29, 512, %s6066_s10, [#allocation6], %s5120_s7, %s5120_s7, %s5121_s23  }
 0x925   :  { %5111 = dma.done.wait [#allocation6], 512  }
 0x926   :  { %5112 = vsyncadd [#allocation6], 4294966784 }
 0x927   :  { %3607 = vsyncpa [#allocation5], 1 }
 0x928   :  { %3608 = vsyncpa [#allocation9], 1 }
 0x929   :  { %3609 = vsyncpa [#allocation12], 1 }
 0x92a   :  { %3610 = vsyncpa [#allocation15], 1 }
 0x92b   :  { %3611 = vsyncpa [#allocation18], 1 }
 0x92c   :  { %3612 = vsyncpa [#allocation6], 1 }
 0x92d   :  { %3613 = vsyncpa [#allocation7], 1 }

</bundles_post_ra>
